<compile_context>
chip_gen: v5e
topology: v5e:2x2
jax: 0.10.0
libtpu: 0.0.40
codegen_flags: <defaults>
</compile_context>

<pallas_src>
import functools

import jax
import jax.numpy as jnp
from jax.experimental import pallas as pl
from jax.experimental.pallas import tpu as pltpu

LANE = 128


def _round_up(n, m):
    return ((n + m - 1) // m) * m


def _pad_axis(x, axis, target):
    cur = x.shape[axis]
    if cur == target:
        return x
    widths = [(0, 0)] * x.ndim
    widths[axis] = (0, target - cur)
    return jnp.pad(x, widths)


# ----------------------------- Pallas kernel --------------------------------
def decoder_kernel(mask_ref, enc_seq_ref, condi_ref, g_bias_ref,
                   condi_w_ref, condi_b_ref,
                   wqkv_ref, att_ln_g_ref, att_ln_b_ref,
                   glu_w_ref, glu_b_ref, glu_ln_g_ref, glu_ln_b_ref,
                   end_w_ref, end_b_ref, out_ref,
                   *, n_layers, d_model, d_pad, compute_dtype):
    f32 = jnp.float32
    cdt = compute_dtype

    # get_non_pad_mask: (for_mask != PAD).float().unsqueeze(-1)
    # (precomputed as a 0/1 float column in the wrapper).
    non_pad = mask_ref[0]                                       # (R, 1) f32

    # Lanes >= d_model are zero padding; LayerNorm statistics must only cover
    # the first d_model lanes.  Padded lanes stay exactly 0 because every
    # padded weight / bias / gamma / beta entry is zero.
    feat_ids = jax.lax.broadcasted_iota(jnp.int32, (1, d_pad), 1)
    feat_mask = (feat_ids < d_model).astype(f32)                # (1, Dp)
    inv_d = 1.0 / float(d_model)

    def layer_norm(y, gamma, beta):
        mu = jnp.sum(y * feat_mask, axis=-1, keepdims=True) * inv_d
        diff = (y - mu) * feat_mask
        var = jnp.sum(diff * diff, axis=-1, keepdims=True) * inv_d
        return diff * jax.lax.rsqrt(var + 1e-5) * gamma + beta

    def mm(a, b):
        # MXU matmul, f32 accumulation.  Weights are already compute_dtype,
        # so their astype is a no-op; only activations actually get cast.
        return jnp.dot(a.astype(cdt), b.astype(cdt), preferred_element_type=f32)

    # dec_output = enc_seq + pos_fc(enc_pos) + fc(f0)   (fused conditioning)
    x = enc_seq_ref[0].astype(f32)
    x = x + (mm(condi_ref[0], condi_w_ref[...]) + condi_b_ref[...])

    g_bias = g_bias_ref[0]                                      # (R, R) f32
    scale = float(d_model) ** -0.5

    for i in range(n_layers):
        # --- AttSubLayerBlock -------------------------------------------
        # TODO(synk): exact AttSubLayerBlock source was not provided; this is
        # standard single-head scaled-dot-product attention with an additive
        # g_bias on the logits, residual + LayerNorm, then non-pad masking.
        # Wo has been folded into the V projection (wvo = wv @ wo, exact).
        qkv = mm(x, wqkv_ref[i])                    # fused QKV, one MXU push
        q = qkv[:, :d_pad]
        k = qkv[:, d_pad:2 * d_pad]
        v = qkv[:, 2 * d_pad:]                      # = x @ (wv @ wo)
        # Contract the last dims of q and k directly (no k.T relayout).
        s = jax.lax.dot_general(q.astype(cdt), k.astype(cdt),
                                (((1,), (1,)), ((), ())),
                                preferred_element_type=f32)
        s = s * scale + g_bias
        s = s - jnp.max(s, axis=-1, keepdims=True)
        p = jnp.exp(s)
        p = p * pl.reciprocal(jnp.sum(p, axis=-1, keepdims=True), approx=True)
        att = mm(p, v)
        x = layer_norm(att + x, att_ln_g_ref[i], att_ln_b_ref[i])
        x = x * non_pad

        # --- GLUSubLayerBlock -------------------------------------------
        # TODO(synk): exact GLUSubLayerBlock source was not provided; this is
        # a linear GLU (value|gate fused into one 256-wide matmul, sliced at
        # the aligned 128-lane boundary) with residual + LayerNorm.
        # Dropout omitted (inference forward).
        h = mm(x, glu_w_ref[i]) + glu_b_ref[i]
        a = h[:, :d_pad]
        g = h[:, d_pad:]
        x = layer_norm(a * jax.nn.sigmoid(g) + x,
                       glu_ln_g_ref[i], glu_ln_b_ref[i])

    out = mm(x, end_w_ref[...]) + end_b_ref[...]
    out_ref[0] = out.astype(out_ref.dtype)


# ------------------------ one-time weight preparation -------------------------
def prepare_decoder_params(params, compute_dtype=jnp.bfloat16):
    """One-time weight preparation (call once at model init, not per forward).

    Lane-pads every weight to the 128-lane vreg width, applies the algebraic
    fusions (stacked pos+f0 conditioning, fused QKV with Wo folded into Wv,
    fused GLU value|gate) and casts the matmul weights to `compute_dtype`.
    Fused products are computed in f32 and cast once.  Biases and LayerNorm
    parameters stay f32 (they feed f32 VPU math and are tiny).
    """
    f32 = jnp.float32
    D = params["wq"].shape[1]
    D_f0 = params["fc_w"].shape[0]
    D_pos = params["pos_w"].shape[0]
    C_out = params["end_w"].shape[1]
    L = params["wq"].shape[0]

    Dp = _round_up(D, LANE)
    Cp = _round_up(C_out, LANE)
    CONDp = _round_up(D_pos + D_f0, LANE)

    def cast(w):
        return w.astype(compute_dtype)

    # Fused conditioning: [enc_pos | f0] @ [pos_w ; fc_w] + (pos_b + fc_b)
    condi_w = jnp.concatenate([params["pos_w"].astype(f32),
                               params["fc_w"].astype(f32)], axis=0)
    condi_w = cast(_pad_axis(_pad_axis(condi_w, 0, CONDp), 1, Dp))
    condi_b = _pad_axis(params["pos_b"].astype(f32) +
                        params["fc_b"].astype(f32), 1, Dp)

    def pad_ldd(w):                       # (L, D, D) -> (L, Dp, Dp)
        return _pad_axis(_pad_axis(w.astype(f32), 1, Dp), 2, Dp)

    # Fold Wo into Wv (exact: no nonlinearity in between), then fuse QKV.
    wvo = jnp.einsum("lij,ljk->lik",
                     params["wv"].astype(f32), params["wo"].astype(f32))
    wqkv = cast(jnp.concatenate([pad_ldd(params["wq"]),
                                 pad_ldd(params["wk"]),
                                 pad_ldd(wvo)], axis=-1))       # (L, Dp, 3*Dp)

    att_ln_g = _pad_axis(params["att_ln_g"].astype(f32), 2, Dp)
    att_ln_b = _pad_axis(params["att_ln_b"].astype(f32), 2, Dp)

    # Fused GLU value|gate: lane-pad each half, re-concatenate to (Dp, 2*Dp)
    # so the kernel slices the matmul result at the aligned lane-128 boundary.
    glu_w = cast(jnp.concatenate([pad_ldd(params["glu_w"][:, :, :D]),
                                  pad_ldd(params["glu_w"][:, :, D:])], axis=-1))
    glu_b = jnp.concatenate(
        [_pad_axis(params["glu_b"][:, :, :D].astype(f32), 2, Dp),
         _pad_axis(params["glu_b"][:, :, D:].astype(f32), 2, Dp)], axis=-1)
    glu_ln_g = _pad_axis(params["glu_ln_g"].astype(f32), 2, Dp)
    glu_ln_b = _pad_axis(params["glu_ln_b"].astype(f32), 2, Dp)

    end_w = cast(_pad_axis(_pad_axis(params["end_w"].astype(f32), 0, Dp), 1, Cp))
    end_b = _pad_axis(params["end_b"].astype(f32), 1, Cp)

    return {
        "condi_w": condi_w, "condi_b": condi_b,
        "wqkv": wqkv, "att_ln_g": att_ln_g, "att_ln_b": att_ln_b,
        "glu_w": glu_w, "glu_b": glu_b,
        "glu_ln_g": glu_ln_g, "glu_ln_b": glu_ln_b,
        "end_w": end_w, "end_b": end_b,
        "d_model": D, "d_pad": Dp, "c_out": C_out, "c_pad": Cp,
        "n_layers": L, "compute_dtype": compute_dtype,
    }


# ------------------------------ forward wrapper --------------------------------
def decoder_forward(prep, enc_seq, enc_pos, f0, for_mask, g_bias,
                    batch_blocks=1, trim_output=True):
    """Decoder forward.  `prep` comes from prepare_decoder_params (one-time).

    batch_blocks: number of grid steps the batch is split into.  1 folds the
      whole batch into a single block (best on single-TensorCore v5e/v6e);
      use 2 on v7x so both TensorCores get a "parallel" grid step.
    trim_output: if False, return the lane-padded (B, T, Cp) output and skip
      the post-kernel slice copy (consumers that accept padding save a copy).
    """
    B, T, D = enc_seq.shape
    Dp, Cp, L = prep["d_pad"], prep["c_pad"], prep["n_layers"]
    cdt = prep["compute_dtype"]
    assert D == prep["d_model"], (D, prep["d_model"])
    assert B % batch_blocks == 0, (B, batch_blocks)
    bpb = B // batch_blocks            # batches folded into one block
    R = bpb * T                        # rows per grid step

    # Lane-pad activations (zero padding keeps the math exact) and fold the
    # batch into the row dimension.
    x0 = _pad_axis(enc_seq.astype(jnp.float32), 2, Dp).reshape(batch_blocks, R, Dp)
    condi = jnp.concatenate([enc_pos, f0], axis=-1).astype(jnp.float32)
    condi = _pad_axis(condi, 2, prep["condi_w"].shape[0])
    condi = condi.astype(cdt).reshape(batch_blocks, R, -1)     # matmul-only input
    mask3 = (for_mask != 0).astype(jnp.float32).reshape(batch_blocks, R, 1)

    # Block-diagonal attention bias: rows of one batch must not attend to keys
    # of another batch folded into the same block (-1e9 -> exp underflows to 0).
    # Scaling guard (v7x): for T in the 1-2K range, store g_bias in bf16, set
    # vmem_limit_bytes, or switch to a flash-style KV-tiled online softmax.
    gb = g_bias.astype(jnp.float32).reshape(batch_blocks, bpb, T, T)
    if bpb > 1:
        eye = jnp.eye(bpb, dtype=jnp.float32)[None, :, None, :, None]
        gb = eye * gb[:, :, :, None, :] + (1.0 - eye) * jnp.float32(-1e9)
    gb = gb.reshape(batch_blocks, R, R)

    batched = [mask3, x0, condi, gb]
    weights = [prep["condi_w"], prep["condi_b"],
               prep["wqkv"], prep["att_ln_g"], prep["att_ln_b"],
               prep["glu_w"], prep["glu_b"], prep["glu_ln_g"], prep["glu_ln_b"],
               prep["end_w"], prep["end_b"]]

    def batch_spec(arr):
        s = arr.shape[1:]
        return pl.BlockSpec((1,) + s, lambda b: (b,) + (0,) * len(s))

    def weight_spec(arr, single_buffer):
        nd = arr.ndim
        if single_buffer:
            # Constant block index across the grid: single-buffer the weights
            # (halves their VMEM footprint; they are never re-DMA'd anyway).
            return pl.BlockSpec(arr.shape, lambda b: (0,) * nd,
                                pipeline_mode=pl.Buffered(1))
        return pl.BlockSpec(arr.shape, lambda b: (0,) * nd)

    kernel = functools.partial(decoder_kernel, n_layers=L,
                               d_model=prep["d_model"], d_pad=Dp,
                               compute_dtype=cdt)

    def build(single_buffer):
        return pl.pallas_call(
            kernel,
            out_shape=jax.ShapeDtypeStruct((batch_blocks, R, Cp), jnp.float32),
            grid=(batch_blocks,),
            in_specs=[batch_spec(a) for a in batched]
                     + [weight_spec(wt, single_buffer) for wt in weights],
            out_specs=pl.BlockSpec((1, R, Cp), lambda b: (b, 0, 0)),
            compiler_params=pltpu.CompilerParams(
                dimension_semantics=("parallel",)),
        )

    try:
        out_p = build(single_buffer=hasattr(pl, "Buffered"))(*batched, *weights)
    except Exception:  # older Pallas without pipeline_mode support
        out_p = build(single_buffer=False)(*batched, *weights)

    out_p = out_p.reshape(B, T, Cp)
    if trim_output:
        return out_p[:, :, :prep["c_out"]]
    return out_p


# --------------------------- plain-JAX reference ------------------------------
def decoder_ref(enc_seq, enc_pos, f0, for_mask, g_bias, p):
    non_pad = (for_mask != 0).astype(jnp.float32)[..., None]
    D = enc_seq.shape[-1]
    L = p["wq"].shape[0]

    def layer_norm(y, gamma, beta):
        mu = jnp.mean(y, axis=-1, keepdims=True)
        var = jnp.mean((y - mu) ** 2, axis=-1, keepdims=True)
        return (y - mu) * jax.lax.rsqrt(var + 1e-5) * gamma + beta

    x = enc_seq + (enc_pos @ p["pos_w"] + p["pos_b"]) + (f0 @ p["fc_w"] + p["fc_b"])
    scale = 1.0 / jnp.sqrt(jnp.float32(D))
    for i in range(L):
        q = x @ p["wq"][i]
        k = x @ p["wk"][i]
        v = x @ p["wv"][i]
        s = jnp.einsum("btd,bsd->bts", q, k) * scale + g_bias
        a = jax.nn.softmax(s, axis=-1)
        att = jnp.einsum("bts,bsd->btd", a, v) @ p["wo"][i]
        x = layer_norm(att + x, p["att_ln_g"][i], p["att_ln_b"][i]) * non_pad
        h = x @ p["glu_w"][i] + p["glu_b"][i]
        ha, hg = h[..., :D], h[..., D:]
        x = layer_norm(ha * jax.nn.sigmoid(hg) + x,
                       p["glu_ln_g"][i], p["glu_ln_b"][i])
    return x @ p["end_w"] + p["end_b"]


# --------------------------------- main ---------------------------------------
if __name__ == "__main__":
    B, T = 2, 8
    D = 32          # d_word_vec = d_model = d_k = d_v
    D_F0 = 4        # input_f0_channel
    D_POS = 4       # pos_fc input dim (sinusoid table width)
    L = 2           # decoder_n_layer
    C_OUT = 16      # output_channel

    key = jax.random.PRNGKey(0)
    ks = jax.random.split(key, 24)

    def w(k, shape, s=0.1):
        return (s * jax.random.normal(k, shape)).astype(jnp.float32)

    params = {
        "fc_w": w(ks[0], (D_F0, D)),    "fc_b": w(ks[1], (1, D)),
        "pos_w": w(ks[2], (D_POS, D)),  "pos_b": w(ks[3], (1, D)),
        "wq": w(ks[4], (L, D, D)),      "wk": w(ks[5], (L, D, D)),
        "wv": w(ks[6], (L, D, D)),      "wo": w(ks[7], (L, D, D)),
        "att_ln_g": jnp.ones((L, 1, D), jnp.float32),
        "att_ln_b": jnp.zeros((L, 1, D), jnp.float32),
        "glu_w": w(ks[8], (L, D, 2 * D)), "glu_b": w(ks[9], (L, 1, 2 * D)),
        "glu_ln_g": jnp.ones((L, 1, D), jnp.float32),
        "glu_ln_b": jnp.zeros((L, 1, D), jnp.float32),
        "end_w": w(ks[10], (D, C_OUT)), "end_b": w(ks[11], (1, C_OUT)),
    }

    enc_seq = w(ks[12], (B, T, D), s=1.0)
    enc_pos = w(ks[13], (B, T, D_POS), s=1.0)
    f0 = w(ks[14], (B, T, D_F0), s=1.0)
    g_bias = w(ks[15], (B, T, T), s=0.1)
    # for_mask: non-zero = valid token, 0 = PAD (pad the tail of each sequence)
    for_mask = jnp.array([[1, 2, 3, 4, 5, 6, 0, 0],
                          [1, 2, 3, 4, 5, 0, 0, 0]], dtype=jnp.int32)

    ref = decoder_ref(enc_seq, enc_pos, f0, for_mask, g_bias, params)

    # f32 compute path: tight correctness check against the plain-JAX reference.
    prep_f32 = prepare_decoder_params(params, compute_dtype=jnp.float32)
    out_f32 = decoder_forward(prep_f32, enc_seq, enc_pos, f0, for_mask, g_bias)
    out_f32 = jax.block_until_ready(out_f32)
    assert out_f32.shape == (B, T, C_OUT), out_f32.shape
    assert jnp.allclose(out_f32, ref, atol=1e-2, rtol=1e-2), \
        float(jnp.max(jnp.abs(out_f32 - ref)))

    # bf16 MXU path (recommended): one-time bf16 weight prep, batch folded
    # into a single grid step (grid=(1,)) for single-TC v5e/v6e.
    prep_bf16 = prepare_decoder_params(params, compute_dtype=jnp.bfloat16)
    out_bf16 = decoder_forward(prep_bf16, enc_seq, enc_pos, f0, for_mask, g_bias)
    out_bf16 = jax.block_until_ready(out_bf16)
    assert out_bf16.shape == (B, T, C_OUT), out_bf16.shape
    assert jnp.allclose(out_bf16, ref, atol=3e-2, rtol=3e-2), \
        float(jnp.max(jnp.abs(out_bf16 - ref)))

    # v7x-style configuration: 2-way "parallel" grid, one batch per TensorCore.
    out_2tc = decoder_forward(prep_bf16, enc_seq, enc_pos, f0, for_mask, g_bias,
                              batch_blocks=2)
    out_2tc = jax.block_until_ready(out_2tc)
    assert out_2tc.shape == (B, T, C_OUT), out_2tc.shape
    assert jnp.allclose(out_2tc, ref, atol=3e-2, rtol=3e-2), \
        float(jnp.max(jnp.abs(out_2tc - ref)))

    print("KERNEL_OK")
</pallas_src>

<mosaic_0001>
module attributes {stable_mosaic.version = 11 : i64} {
  func.func @decoder_kernel(%arg0: i32, %arg1: memref<1x16x1xf32, #tpu.memory_space<vmem>>, %arg2: memref<1x16x128xf32, #tpu.memory_space<vmem>>, %arg3: memref<1x16x128xf32, #tpu.memory_space<vmem>>, %arg4: memref<1x16x16xf32, #tpu.memory_space<vmem>>, %arg5: memref<128x128xf32, #tpu.memory_space<vmem>>, %arg6: memref<1x128xf32, #tpu.memory_space<vmem>>, %arg7: memref<2x128x384xf32, #tpu.memory_space<vmem>>, %arg8: memref<2x1x128xf32, #tpu.memory_space<vmem>>, %arg9: memref<2x1x128xf32, #tpu.memory_space<vmem>>, %arg10: memref<2x128x256xf32, #tpu.memory_space<vmem>>, %arg11: memref<2x1x256xf32, #tpu.memory_space<vmem>>, %arg12: memref<2x1x128xf32, #tpu.memory_space<vmem>>, %arg13: memref<2x1x128xf32, #tpu.memory_space<vmem>>, %arg14: memref<128x128xf32, #tpu.memory_space<vmem>>, %arg15: memref<1x128xf32, #tpu.memory_space<vmem>>, %arg16: memref<1x16x128xf32, #tpu.memory_space<vmem>>) attributes {dimension_semantics = [#tpu.dimension_semantics<parallel>], iteration_bounds = array<i64: 1>, scalar_prefetch = 0 : i64, scratch_operands = 0 : i64, tpu.core_type = #tpu.core_type<tc>, window_params = [{transform_indices = @transform_0, window_bounds = array<i64: 1, 16, 1>}, {transform_indices = @transform_1, window_bounds = array<i64: 1, 16, 128>}, {transform_indices = @transform_2, window_bounds = array<i64: 1, 16, 128>}, {transform_indices = @transform_3, window_bounds = array<i64: 1, 16, 16>}, {pipeline_mode = #tpu.pipeline_mode<synchronous>, transform_indices = @transform_4, window_bounds = array<i64: 128, 128>}, {pipeline_mode = #tpu.pipeline_mode<synchronous>, transform_indices = @transform_5, window_bounds = array<i64: 1, 128>}, {pipeline_mode = #tpu.pipeline_mode<synchronous>, transform_indices = @transform_6, window_bounds = array<i64: 2, 128, 384>}, {pipeline_mode = #tpu.pipeline_mode<synchronous>, transform_indices = @transform_7, window_bounds = array<i64: 2, 1, 128>}, {pipeline_mode = #tpu.pipeline_mode<synchronous>, transform_indices = @transform_8, window_bounds = array<i64: 2, 1, 128>}, {pipeline_mode = #tpu.pipeline_mode<synchronous>, transform_indices = @transform_9, window_bounds = array<i64: 2, 128, 256>}, {pipeline_mode = #tpu.pipeline_mode<synchronous>, transform_indices = @transform_10, window_bounds = array<i64: 2, 1, 256>}, {pipeline_mode = #tpu.pipeline_mode<synchronous>, transform_indices = @transform_11, window_bounds = array<i64: 2, 1, 128>}, {pipeline_mode = #tpu.pipeline_mode<synchronous>, transform_indices = @transform_12, window_bounds = array<i64: 2, 1, 128>}, {pipeline_mode = #tpu.pipeline_mode<synchronous>, transform_indices = @transform_13, window_bounds = array<i64: 128, 128>}, {pipeline_mode = #tpu.pipeline_mode<synchronous>, transform_indices = @transform_14, window_bounds = array<i64: 1, 128>}, {transform_indices = @transform_15, window_bounds = array<i64: 1, 16, 128>}]} {
    %c0 = arith.constant 0 : index
    %c0_0 = arith.constant 0 : index
    %c0_1 = arith.constant 0 : index
    %0 = vector.load %arg1[%c0, %c0_0, %c0_1] : memref<1x16x1xf32, #tpu.memory_space<vmem>>, vector<1x16x1xf32>
    %1 = vector.shape_cast %0 : vector<1x16x1xf32> to vector<16x1xf32>
    %2 = tpu.iota {dimensions = array<i32: 1>} : vector<1x128xi32>
    %c32_i32 = arith.constant 32 : i32
    %3 = vector.broadcast %c32_i32 : i32 to vector<1x128xi32>
    %4 = arith.cmpi slt, %2, %3 : vector<1x128xi32>
    %5 = arith.extui %4 : vector<1x128xi1> to vector<1x128xi32>
    %6 = arith.sitofp %5 : vector<1x128xi32> to vector<1x128xf32>
    %c0_2 = arith.constant 0 : index
    %c0_3 = arith.constant 0 : index
    %c0_4 = arith.constant 0 : index
    %7 = vector.load %arg2[%c0_2, %c0_3, %c0_4] : memref<1x16x128xf32, #tpu.memory_space<vmem>>, vector<1x16x128xf32>
    %8 = vector.shape_cast %7 : vector<1x16x128xf32> to vector<16x128xf32>
    %c0_5 = arith.constant 0 : index
    %c0_6 = arith.constant 0 : index
    %c0_7 = arith.constant 0 : index
    %9 = vector.load %arg3[%c0_5, %c0_6, %c0_7] : memref<1x16x128xf32, #tpu.memory_space<vmem>>, vector<1x16x128xf32>
    %10 = vector.shape_cast %9 : vector<1x16x128xf32> to vector<16x128xf32>
    %c0_8 = arith.constant 0 : index
    %c0_9 = arith.constant 0 : index
    %11 = vector.load %arg5[%c0_8, %c0_9] : memref<128x128xf32, #tpu.memory_space<vmem>>, vector<128x128xf32>
    %cst = arith.constant dense<0.000000e+00> : vector<16x128xf32>
    %12 = tpu.matmul %10, %11, %cst {dimension_numbers = #tpu.dot_dimension_numbers<[1], [0], [0], [1], [0, 0, 1, 1], [], []>} : vector<16x128xf32>, vector<128x128xf32>, vector<16x128xf32> -> vector<16x128xf32>
    %c0_10 = arith.constant 0 : index
    %c0_11 = arith.constant 0 : index
    %13 = vector.load %arg6[%c0_10, %c0_11] : memref<1x128xf32, #tpu.memory_space<vmem>>, vector<1x128xf32>
    %14 = vector.broadcast %13 : vector<1x128xf32> to vector<16x128xf32>
    %15 = arith.addf %12, %14 : vector<16x128xf32>
    %16 = arith.addf %8, %15 : vector<16x128xf32>
    %c0_12 = arith.constant 0 : index
    %c0_13 = arith.constant 0 : index
    %c0_14 = arith.constant 0 : index
    %17 = vector.load %arg4[%c0_12, %c0_13, %c0_14] : memref<1x16x16xf32, #tpu.memory_space<vmem>>, vector<1x16x16xf32>
    %18 = vector.shape_cast %17 : vector<1x16x16xf32> to vector<16x16xf32>
    %c0_15 = arith.constant 0 : index
    %c0_16 = arith.constant 0 : index
    %c0_17 = arith.constant 0 : index
    %19 = vector.load %arg7[%c0_15, %c0_16, %c0_17] : memref<2x128x384xf32, #tpu.memory_space<vmem>>, vector<1x128x384xf32>
    %20 = vector.shape_cast %19 : vector<1x128x384xf32> to vector<128x384xf32>
    %cst_18 = arith.constant dense<0.000000e+00> : vector<16x384xf32>
    %21 = tpu.matmul %16, %20, %cst_18 {dimension_numbers = #tpu.dot_dimension_numbers<[1], [0], [0], [1], [0, 0, 1, 1], [], []>} : vector<16x128xf32>, vector<128x384xf32>, vector<16x384xf32> -> vector<16x384xf32>
    %22 = vector.extract_strided_slice %21 {offsets = [0, 0], sizes = [16, 128], strides = [1, 1]} : vector<16x384xf32> to vector<16x128xf32>
    %23 = vector.extract_strided_slice %21 {offsets = [0, 128], sizes = [16, 128], strides = [1, 1]} : vector<16x384xf32> to vector<16x128xf32>
    %24 = vector.extract_strided_slice %21 {offsets = [0, 256], sizes = [16, 128], strides = [1, 1]} : vector<16x384xf32> to vector<16x128xf32>
    %cst_19 = arith.constant dense<0.000000e+00> : vector<16x16xf32>
    %25 = tpu.matmul %22, %23, %cst_19 {dimension_numbers = #tpu.dot_dimension_numbers<[1], [1], [0], [0], [0, 0, 1, 0], [], []>} : vector<16x128xf32>, vector<16x128xf32>, vector<16x16xf32> -> vector<16x16xf32>
    %cst_20 = arith.constant 0.176776692 : f32
    %26 = vector.broadcast %cst_20 : f32 to vector<16x16xf32>
    %27 = arith.mulf %25, %26 : vector<16x16xf32>
    %28 = arith.addf %27, %18 : vector<16x16xf32>
    %cst_21 = arith.constant dense<0xFF800000> : vector<16xf32>
    %29 = vector.multi_reduction <maximumf>, %28, %cst_21 [1] : vector<16x16xf32> to vector<16xf32>
    %30 = vector.shape_cast %29 : vector<16xf32> to vector<16x1xf32>
    %31 = vector.broadcast %30 : vector<16x1xf32> to vector<16x16xf32>
    %32 = arith.subf %28, %31 : vector<16x16xf32>
    %33 = math.exp %32 : vector<16x16xf32>
    %cst_22 = arith.constant dense<0.000000e+00> : vector<16xf32>
    %34 = vector.multi_reduction <add>, %33, %cst_22 [1] : vector<16x16xf32> to vector<16xf32>
    %35 = vector.shape_cast %34 : vector<16xf32> to vector<16x1xf32>
    %36 = tpu.reciprocal %35 {approx = true} : vector<16x1xf32> -> vector<16x1xf32>
    %37 = vector.broadcast %36 : vector<16x1xf32> to vector<16x16xf32>
    %38 = arith.mulf %33, %37 : vector<16x16xf32>
    %cst_23 = arith.constant dense<0.000000e+00> : vector<16x128xf32>
    %39 = tpu.matmul %38, %24, %cst_23 {dimension_numbers = #tpu.dot_dimension_numbers<[1], [0], [0], [1], [0, 0, 1, 1], [], []>} : vector<16x16xf32>, vector<16x128xf32>, vector<16x128xf32> -> vector<16x128xf32>
    %40 = arith.addf %39, %16 : vector<16x128xf32>
    %c0_24 = arith.constant 0 : index
    %c0_25 = arith.constant 0 : index
    %c0_26 = arith.constant 0 : index
    %41 = vector.load %arg8[%c0_24, %c0_25, %c0_26] : memref<2x1x128xf32, #tpu.memory_space<vmem>>, vector<1x1x128xf32>
    %42 = vector.shape_cast %41 : vector<1x1x128xf32> to vector<1x128xf32>
    %c0_27 = arith.constant 0 : index
    %c0_28 = arith.constant 0 : index
    %c0_29 = arith.constant 0 : index
    %43 = vector.load %arg9[%c0_27, %c0_28, %c0_29] : memref<2x1x128xf32, #tpu.memory_space<vmem>>, vector<1x1x128xf32>
    %44 = vector.shape_cast %43 : vector<1x1x128xf32> to vector<1x128xf32>
    %45 = vector.broadcast %6 : vector<1x128xf32> to vector<16x128xf32>
    %46 = arith.mulf %40, %45 : vector<16x128xf32>
    %cst_30 = arith.constant dense<0.000000e+00> : vector<16xf32>
    %47 = vector.multi_reduction <add>, %46, %cst_30 [1] : vector<16x128xf32> to vector<16xf32>
    %48 = vector.shape_cast %47 : vector<16xf32> to vector<16x1xf32>
    %cst_31 = arith.constant 3.125000e-02 : f32
    %49 = vector.broadcast %cst_31 : f32 to vector<16x1xf32>
    %50 = arith.mulf %48, %49 : vector<16x1xf32>
    %51 = vector.broadcast %50 : vector<16x1xf32> to vector<16x128xf32>
    %52 = arith.subf %40, %51 : vector<16x128xf32>
    %53 = vector.broadcast %6 : vector<1x128xf32> to vector<16x128xf32>
    %54 = arith.mulf %52, %53 : vector<16x128xf32>
    %55 = arith.mulf %54, %54 : vector<16x128xf32>
    %cst_32 = arith.constant dense<0.000000e+00> : vector<16xf32>
    %56 = vector.multi_reduction <add>, %55, %cst_32 [1] : vector<16x128xf32> to vector<16xf32>
    %57 = vector.shape_cast %56 : vector<16xf32> to vector<16x1xf32>
    %cst_33 = arith.constant 3.125000e-02 : f32
    %58 = vector.broadcast %cst_33 : f32 to vector<16x1xf32>
    %59 = arith.mulf %57, %58 : vector<16x1xf32>
    %cst_34 = arith.constant 9.99999974E-6 : f32
    %60 = vector.broadcast %cst_34 : f32 to vector<16x1xf32>
    %61 = arith.addf %59, %60 : vector<16x1xf32>
    %62 = math.rsqrt %61 : vector<16x1xf32>
    %63 = vector.broadcast %62 : vector<16x1xf32> to vector<16x128xf32>
    %64 = arith.mulf %54, %63 : vector<16x128xf32>
    %65 = vector.broadcast %42 : vector<1x128xf32> to vector<16x128xf32>
    %66 = arith.mulf %64, %65 : vector<16x128xf32>
    %67 = vector.broadcast %44 : vector<1x128xf32> to vector<16x128xf32>
    %68 = arith.addf %66, %67 : vector<16x128xf32>
    %69 = vector.broadcast %1 : vector<16x1xf32> to vector<16x128xf32>
    %70 = arith.mulf %68, %69 : vector<16x128xf32>
    %c0_35 = arith.constant 0 : index
    %c0_36 = arith.constant 0 : index
    %c0_37 = arith.constant 0 : index
    %71 = vector.load %arg10[%c0_35, %c0_36, %c0_37] : memref<2x128x256xf32, #tpu.memory_space<vmem>>, vector<1x128x256xf32>
    %72 = vector.shape_cast %71 : vector<1x128x256xf32> to vector<128x256xf32>
    %cst_38 = arith.constant dense<0.000000e+00> : vector<16x256xf32>
    %73 = tpu.matmul %70, %72, %cst_38 {dimension_numbers = #tpu.dot_dimension_numbers<[1], [0], [0], [1], [0, 0, 1, 1], [], []>} : vector<16x128xf32>, vector<128x256xf32>, vector<16x256xf32> -> vector<16x256xf32>
    %c0_39 = arith.constant 0 : index
    %c0_40 = arith.constant 0 : index
    %c0_41 = arith.constant 0 : index
    %74 = vector.load %arg11[%c0_39, %c0_40, %c0_41] : memref<2x1x256xf32, #tpu.memory_space<vmem>>, vector<1x1x256xf32>
    %75 = vector.shape_cast %74 : vector<1x1x256xf32> to vector<1x256xf32>
    %76 = vector.broadcast %75 : vector<1x256xf32> to vector<16x256xf32>
    %77 = arith.addf %73, %76 : vector<16x256xf32>
    %78 = vector.extract_strided_slice %77 {offsets = [0, 0], sizes = [16, 128], strides = [1, 1]} : vector<16x256xf32> to vector<16x128xf32>
    %79 = vector.extract_strided_slice %77 {offsets = [0, 128], sizes = [16, 128], strides = [1, 1]} : vector<16x256xf32> to vector<16x128xf32>
    %80 = arith.negf %79 : vector<16x128xf32>
    %81 = math.exp %80 : vector<16x128xf32>
    %cst_42 = arith.constant 1.000000e+00 : f32
    %82 = vector.broadcast %cst_42 : f32 to vector<16x128xf32>
    %83 = arith.addf %82, %81 : vector<16x128xf32>
    %84 = arith.divf %82, %83 : vector<16x128xf32>
    %85 = arith.mulf %78, %84 : vector<16x128xf32>
    %86 = arith.addf %85, %70 : vector<16x128xf32>
    %c0_43 = arith.constant 0 : index
    %c0_44 = arith.constant 0 : index
    %c0_45 = arith.constant 0 : index
    %87 = vector.load %arg12[%c0_43, %c0_44, %c0_45] : memref<2x1x128xf32, #tpu.memory_space<vmem>>, vector<1x1x128xf32>
    %88 = vector.shape_cast %87 : vector<1x1x128xf32> to vector<1x128xf32>
    %c0_46 = arith.constant 0 : index
    %c0_47 = arith.constant 0 : index
    %c0_48 = arith.constant 0 : index
    %89 = vector.load %arg13[%c0_46, %c0_47, %c0_48] : memref<2x1x128xf32, #tpu.memory_space<vmem>>, vector<1x1x128xf32>
    %90 = vector.shape_cast %89 : vector<1x1x128xf32> to vector<1x128xf32>
    %91 = vector.broadcast %6 : vector<1x128xf32> to vector<16x128xf32>
    %92 = arith.mulf %86, %91 : vector<16x128xf32>
    %cst_49 = arith.constant dense<0.000000e+00> : vector<16xf32>
    %93 = vector.multi_reduction <add>, %92, %cst_49 [1] : vector<16x128xf32> to vector<16xf32>
    %94 = vector.shape_cast %93 : vector<16xf32> to vector<16x1xf32>
    %cst_50 = arith.constant 3.125000e-02 : f32
    %95 = vector.broadcast %cst_50 : f32 to vector<16x1xf32>
    %96 = arith.mulf %94, %95 : vector<16x1xf32>
    %97 = vector.broadcast %96 : vector<16x1xf32> to vector<16x128xf32>
    %98 = arith.subf %86, %97 : vector<16x128xf32>
    %99 = vector.broadcast %6 : vector<1x128xf32> to vector<16x128xf32>
    %100 = arith.mulf %98, %99 : vector<16x128xf32>
    %101 = arith.mulf %100, %100 : vector<16x128xf32>
    %cst_51 = arith.constant dense<0.000000e+00> : vector<16xf32>
    %102 = vector.multi_reduction <add>, %101, %cst_51 [1] : vector<16x128xf32> to vector<16xf32>
    %103 = vector.shape_cast %102 : vector<16xf32> to vector<16x1xf32>
    %cst_52 = arith.constant 3.125000e-02 : f32
    %104 = vector.broadcast %cst_52 : f32 to vector<16x1xf32>
    %105 = arith.mulf %103, %104 : vector<16x1xf32>
    %cst_53 = arith.constant 9.99999974E-6 : f32
    %106 = vector.broadcast %cst_53 : f32 to vector<16x1xf32>
    %107 = arith.addf %105, %106 : vector<16x1xf32>
    %108 = math.rsqrt %107 : vector<16x1xf32>
    %109 = vector.broadcast %108 : vector<16x1xf32> to vector<16x128xf32>
    %110 = arith.mulf %100, %109 : vector<16x128xf32>
    %111 = vector.broadcast %88 : vector<1x128xf32> to vector<16x128xf32>
    %112 = arith.mulf %110, %111 : vector<16x128xf32>
    %113 = vector.broadcast %90 : vector<1x128xf32> to vector<16x128xf32>
    %114 = arith.addf %112, %113 : vector<16x128xf32>
    %c1 = arith.constant 1 : index
    %c0_54 = arith.constant 0 : index
    %c0_55 = arith.constant 0 : index
    %115 = vector.load %arg7[%c1, %c0_54, %c0_55] : memref<2x128x384xf32, #tpu.memory_space<vmem>>, vector<1x128x384xf32>
    %116 = vector.shape_cast %115 : vector<1x128x384xf32> to vector<128x384xf32>
    %cst_56 = arith.constant dense<0.000000e+00> : vector<16x384xf32>
    %117 = tpu.matmul %114, %116, %cst_56 {dimension_numbers = #tpu.dot_dimension_numbers<[1], [0], [0], [1], [0, 0, 1, 1], [], []>} : vector<16x128xf32>, vector<128x384xf32>, vector<16x384xf32> -> vector<16x384xf32>
    %118 = vector.extract_strided_slice %117 {offsets = [0, 0], sizes = [16, 128], strides = [1, 1]} : vector<16x384xf32> to vector<16x128xf32>
    %119 = vector.extract_strided_slice %117 {offsets = [0, 128], sizes = [16, 128], strides = [1, 1]} : vector<16x384xf32> to vector<16x128xf32>
    %120 = vector.extract_strided_slice %117 {offsets = [0, 256], sizes = [16, 128], strides = [1, 1]} : vector<16x384xf32> to vector<16x128xf32>
    %cst_57 = arith.constant dense<0.000000e+00> : vector<16x16xf32>
    %121 = tpu.matmul %118, %119, %cst_57 {dimension_numbers = #tpu.dot_dimension_numbers<[1], [1], [0], [0], [0, 0, 1, 0], [], []>} : vector<16x128xf32>, vector<16x128xf32>, vector<16x16xf32> -> vector<16x16xf32>
    %cst_58 = arith.constant 0.176776692 : f32
    %122 = vector.broadcast %cst_58 : f32 to vector<16x16xf32>
    %123 = arith.mulf %121, %122 : vector<16x16xf32>
    %124 = arith.addf %123, %18 : vector<16x16xf32>
    %cst_59 = arith.constant dense<0xFF800000> : vector<16xf32>
    %125 = vector.multi_reduction <maximumf>, %124, %cst_59 [1] : vector<16x16xf32> to vector<16xf32>
    %126 = vector.shape_cast %125 : vector<16xf32> to vector<16x1xf32>
    %127 = vector.broadcast %126 : vector<16x1xf32> to vector<16x16xf32>
    %128 = arith.subf %124, %127 : vector<16x16xf32>
    %129 = math.exp %128 : vector<16x16xf32>
    %cst_60 = arith.constant dense<0.000000e+00> : vector<16xf32>
    %130 = vector.multi_reduction <add>, %129, %cst_60 [1] : vector<16x16xf32> to vector<16xf32>
    %131 = vector.shape_cast %130 : vector<16xf32> to vector<16x1xf32>
    %132 = tpu.reciprocal %131 {approx = true} : vector<16x1xf32> -> vector<16x1xf32>
    %133 = vector.broadcast %132 : vector<16x1xf32> to vector<16x16xf32>
    %134 = arith.mulf %129, %133 : vector<16x16xf32>
    %cst_61 = arith.constant dense<0.000000e+00> : vector<16x128xf32>
    %135 = tpu.matmul %134, %120, %cst_61 {dimension_numbers = #tpu.dot_dimension_numbers<[1], [0], [0], [1], [0, 0, 1, 1], [], []>} : vector<16x16xf32>, vector<16x128xf32>, vector<16x128xf32> -> vector<16x128xf32>
    %136 = arith.addf %135, %114 : vector<16x128xf32>
    %c1_62 = arith.constant 1 : index
    %c0_63 = arith.constant 0 : index
    %c0_64 = arith.constant 0 : index
    %137 = vector.load %arg8[%c1_62, %c0_63, %c0_64] : memref<2x1x128xf32, #tpu.memory_space<vmem>>, vector<1x1x128xf32>
    %138 = vector.shape_cast %137 : vector<1x1x128xf32> to vector<1x128xf32>
    %c1_65 = arith.constant 1 : index
    %c0_66 = arith.constant 0 : index
    %c0_67 = arith.constant 0 : index
    %139 = vector.load %arg9[%c1_65, %c0_66, %c0_67] : memref<2x1x128xf32, #tpu.memory_space<vmem>>, vector<1x1x128xf32>
    %140 = vector.shape_cast %139 : vector<1x1x128xf32> to vector<1x128xf32>
    %141 = vector.broadcast %6 : vector<1x128xf32> to vector<16x128xf32>
    %142 = arith.mulf %136, %141 : vector<16x128xf32>
    %cst_68 = arith.constant dense<0.000000e+00> : vector<16xf32>
    %143 = vector.multi_reduction <add>, %142, %cst_68 [1] : vector<16x128xf32> to vector<16xf32>
    %144 = vector.shape_cast %143 : vector<16xf32> to vector<16x1xf32>
    %cst_69 = arith.constant 3.125000e-02 : f32
    %145 = vector.broadcast %cst_69 : f32 to vector<16x1xf32>
    %146 = arith.mulf %144, %145 : vector<16x1xf32>
    %147 = vector.broadcast %146 : vector<16x1xf32> to vector<16x128xf32>
    %148 = arith.subf %136, %147 : vector<16x128xf32>
    %149 = vector.broadcast %6 : vector<1x128xf32> to vector<16x128xf32>
    %150 = arith.mulf %148, %149 : vector<16x128xf32>
    %151 = arith.mulf %150, %150 : vector<16x128xf32>
    %cst_70 = arith.constant dense<0.000000e+00> : vector<16xf32>
    %152 = vector.multi_reduction <add>, %151, %cst_70 [1] : vector<16x128xf32> to vector<16xf32>
    %153 = vector.shape_cast %152 : vector<16xf32> to vector<16x1xf32>
    %cst_71 = arith.constant 3.125000e-02 : f32
    %154 = vector.broadcast %cst_71 : f32 to vector<16x1xf32>
    %155 = arith.mulf %153, %154 : vector<16x1xf32>
    %cst_72 = arith.constant 9.99999974E-6 : f32
    %156 = vector.broadcast %cst_72 : f32 to vector<16x1xf32>
    %157 = arith.addf %155, %156 : vector<16x1xf32>
    %158 = math.rsqrt %157 : vector<16x1xf32>
    %159 = vector.broadcast %158 : vector<16x1xf32> to vector<16x128xf32>
    %160 = arith.mulf %150, %159 : vector<16x128xf32>
    %161 = vector.broadcast %138 : vector<1x128xf32> to vector<16x128xf32>
    %162 = arith.mulf %160, %161 : vector<16x128xf32>
    %163 = vector.broadcast %140 : vector<1x128xf32> to vector<16x128xf32>
    %164 = arith.addf %162, %163 : vector<16x128xf32>
    %165 = vector.broadcast %1 : vector<16x1xf32> to vector<16x128xf32>
    %166 = arith.mulf %164, %165 : vector<16x128xf32>
    %c1_73 = arith.constant 1 : index
    %c0_74 = arith.constant 0 : index
    %c0_75 = arith.constant 0 : index
    %167 = vector.load %arg10[%c1_73, %c0_74, %c0_75] : memref<2x128x256xf32, #tpu.memory_space<vmem>>, vector<1x128x256xf32>
    %168 = vector.shape_cast %167 : vector<1x128x256xf32> to vector<128x256xf32>
    %cst_76 = arith.constant dense<0.000000e+00> : vector<16x256xf32>
    %169 = tpu.matmul %166, %168, %cst_76 {dimension_numbers = #tpu.dot_dimension_numbers<[1], [0], [0], [1], [0, 0, 1, 1], [], []>} : vector<16x128xf32>, vector<128x256xf32>, vector<16x256xf32> -> vector<16x256xf32>
    %c1_77 = arith.constant 1 : index
    %c0_78 = arith.constant 0 : index
    %c0_79 = arith.constant 0 : index
    %170 = vector.load %arg11[%c1_77, %c0_78, %c0_79] : memref<2x1x256xf32, #tpu.memory_space<vmem>>, vector<1x1x256xf32>
    %171 = vector.shape_cast %170 : vector<1x1x256xf32> to vector<1x256xf32>
    %172 = vector.broadcast %171 : vector<1x256xf32> to vector<16x256xf32>
    %173 = arith.addf %169, %172 : vector<16x256xf32>
    %174 = vector.extract_strided_slice %173 {offsets = [0, 0], sizes = [16, 128], strides = [1, 1]} : vector<16x256xf32> to vector<16x128xf32>
    %175 = vector.extract_strided_slice %173 {offsets = [0, 128], sizes = [16, 128], strides = [1, 1]} : vector<16x256xf32> to vector<16x128xf32>
    %176 = arith.negf %175 : vector<16x128xf32>
    %177 = math.exp %176 : vector<16x128xf32>
    %cst_80 = arith.constant 1.000000e+00 : f32
    %178 = vector.broadcast %cst_80 : f32 to vector<16x128xf32>
    %179 = arith.addf %178, %177 : vector<16x128xf32>
    %180 = arith.divf %178, %179 : vector<16x128xf32>
    %181 = arith.mulf %174, %180 : vector<16x128xf32>
    %182 = arith.addf %181, %166 : vector<16x128xf32>
    %c1_81 = arith.constant 1 : index
    %c0_82 = arith.constant 0 : index
    %c0_83 = arith.constant 0 : index
    %183 = vector.load %arg12[%c1_81, %c0_82, %c0_83] : memref<2x1x128xf32, #tpu.memory_space<vmem>>, vector<1x1x128xf32>
    %184 = vector.shape_cast %183 : vector<1x1x128xf32> to vector<1x128xf32>
    %c1_84 = arith.constant 1 : index
    %c0_85 = arith.constant 0 : index
    %c0_86 = arith.constant 0 : index
    %185 = vector.load %arg13[%c1_84, %c0_85, %c0_86] : memref<2x1x128xf32, #tpu.memory_space<vmem>>, vector<1x1x128xf32>
    %186 = vector.shape_cast %185 : vector<1x1x128xf32> to vector<1x128xf32>
    %187 = vector.broadcast %6 : vector<1x128xf32> to vector<16x128xf32>
    %188 = arith.mulf %182, %187 : vector<16x128xf32>
    %cst_87 = arith.constant dense<0.000000e+00> : vector<16xf32>
    %189 = vector.multi_reduction <add>, %188, %cst_87 [1] : vector<16x128xf32> to vector<16xf32>
    %190 = vector.shape_cast %189 : vector<16xf32> to vector<16x1xf32>
    %cst_88 = arith.constant 3.125000e-02 : f32
    %191 = vector.broadcast %cst_88 : f32 to vector<16x1xf32>
    %192 = arith.mulf %190, %191 : vector<16x1xf32>
    %193 = vector.broadcast %192 : vector<16x1xf32> to vector<16x128xf32>
    %194 = arith.subf %182, %193 : vector<16x128xf32>
    %195 = vector.broadcast %6 : vector<1x128xf32> to vector<16x128xf32>
    %196 = arith.mulf %194, %195 : vector<16x128xf32>
    %197 = arith.mulf %196, %196 : vector<16x128xf32>
    %cst_89 = arith.constant dense<0.000000e+00> : vector<16xf32>
    %198 = vector.multi_reduction <add>, %197, %cst_89 [1] : vector<16x128xf32> to vector<16xf32>
    %199 = vector.shape_cast %198 : vector<16xf32> to vector<16x1xf32>
    %cst_90 = arith.constant 3.125000e-02 : f32
    %200 = vector.broadcast %cst_90 : f32 to vector<16x1xf32>
    %201 = arith.mulf %199, %200 : vector<16x1xf32>
    %cst_91 = arith.constant 9.99999974E-6 : f32
    %202 = vector.broadcast %cst_91 : f32 to vector<16x1xf32>
    %203 = arith.addf %201, %202 : vector<16x1xf32>
    %204 = math.rsqrt %203 : vector<16x1xf32>
    %205 = vector.broadcast %204 : vector<16x1xf32> to vector<16x128xf32>
    %206 = arith.mulf %196, %205 : vector<16x128xf32>
    %207 = vector.broadcast %184 : vector<1x128xf32> to vector<16x128xf32>
    %208 = arith.mulf %206, %207 : vector<16x128xf32>
    %209 = vector.broadcast %186 : vector<1x128xf32> to vector<16x128xf32>
    %210 = arith.addf %208, %209 : vector<16x128xf32>
    %c0_92 = arith.constant 0 : index
    %c0_93 = arith.constant 0 : index
    %211 = vector.load %arg14[%c0_92, %c0_93] : memref<128x128xf32, #tpu.memory_space<vmem>>, vector<128x128xf32>
    %cst_94 = arith.constant dense<0.000000e+00> : vector<16x128xf32>
    %212 = tpu.matmul %210, %211, %cst_94 {dimension_numbers = #tpu.dot_dimension_numbers<[1], [0], [0], [1], [0, 0, 1, 1], [], []>} : vector<16x128xf32>, vector<128x128xf32>, vector<16x128xf32> -> vector<16x128xf32>
    %c0_95 = arith.constant 0 : index
    %c0_96 = arith.constant 0 : index
    %213 = vector.load %arg15[%c0_95, %c0_96] : memref<1x128xf32, #tpu.memory_space<vmem>>, vector<1x128xf32>
    %214 = vector.broadcast %213 : vector<1x128xf32> to vector<16x128xf32>
    %215 = arith.addf %212, %214 : vector<16x128xf32>
    %c0_97 = arith.constant 0 : index
    %c0_98 = arith.constant 0 : index
    %c0_99 = arith.constant 0 : index
    %216 = vector.load %arg16[%c0_97, %c0_98, %c0_99] : memref<1x16x128xf32, #tpu.memory_space<vmem>>, vector<1x16x128xf32>
    %217 = vector.shape_cast %216 : vector<1x16x128xf32> to vector<16x128xf32>
    %218 = vector.shape_cast %215 : vector<16x128xf32> to vector<1x16x128xf32>
    tpu.vector_store %arg16[%c0_97, %c0_98, %c0_99], %218 {strides = array<i32>} : memref<1x16x128xf32, #tpu.memory_space<vmem>>, vector<1x16x128xf32>,
    return
  }
  func.func @transform_0(%arg0: i32) -> (i32, i32, i32) {
    %c0_i32 = arith.constant 0 : i32
    %c0_i32_0 = arith.constant 0 : i32
    %c0_i32_1 = arith.constant 0 : i32
    return %arg0, %c0_i32, %c0_i32_0 : i32, i32, i32
  }
  func.func @transform_1(%arg0: i32) -> (i32, i32, i32) {
    %c0_i32 = arith.constant 0 : i32
    %c0_i32_0 = arith.constant 0 : i32
    %c0_i32_1 = arith.constant 0 : i32
    return %arg0, %c0_i32, %c0_i32_0 : i32, i32, i32
  }
  func.func @transform_2(%arg0: i32) -> (i32, i32, i32) {
    %c0_i32 = arith.constant 0 : i32
    %c0_i32_0 = arith.constant 0 : i32
    %c0_i32_1 = arith.constant 0 : i32
    return %arg0, %c0_i32, %c0_i32_0 : i32, i32, i32
  }
  func.func @transform_3(%arg0: i32) -> (i32, i32, i32) {
    %c0_i32 = arith.constant 0 : i32
    %c0_i32_0 = arith.constant 0 : i32
    %c0_i32_1 = arith.constant 0 : i32
    return %arg0, %c0_i32, %c0_i32_0 : i32, i32, i32
  }
  func.func @transform_4(%arg0: i32) -> (i32, i32) {
    %c0_i32 = arith.constant 0 : i32
    %c0_i32_0 = arith.constant 0 : i32
    %c0_i32_1 = arith.constant 0 : i32
    return %c0_i32, %c0_i32_0 : i32, i32
  }
  func.func @transform_5(%arg0: i32) -> (i32, i32) {
    %c0_i32 = arith.constant 0 : i32
    %c0_i32_0 = arith.constant 0 : i32
    %c0_i32_1 = arith.constant 0 : i32
    return %c0_i32, %c0_i32_0 : i32, i32
  }
  func.func @transform_6(%arg0: i32) -> (i32, i32, i32) {
    %c0_i32 = arith.constant 0 : i32
    %c0_i32_0 = arith.constant 0 : i32
    %c0_i32_1 = arith.constant 0 : i32
    %c0_i32_2 = arith.constant 0 : i32
    return %c0_i32, %c0_i32_0, %c0_i32_1 : i32, i32, i32
  }
  func.func @transform_7(%arg0: i32) -> (i32, i32, i32) {
    %c0_i32 = arith.constant 0 : i32
    %c0_i32_0 = arith.constant 0 : i32
    %c0_i32_1 = arith.constant 0 : i32
    %c0_i32_2 = arith.constant 0 : i32
    return %c0_i32, %c0_i32_0, %c0_i32_1 : i32, i32, i32
  }
  func.func @transform_8(%arg0: i32) -> (i32, i32, i32) {
    %c0_i32 = arith.constant 0 : i32
    %c0_i32_0 = arith.constant 0 : i32
    %c0_i32_1 = arith.constant 0 : i32
    %c0_i32_2 = arith.constant 0 : i32
    return %c0_i32, %c0_i32_0, %c0_i32_1 : i32, i32, i32
  }
  func.func @transform_9(%arg0: i32) -> (i32, i32, i32) {
    %c0_i32 = arith.constant 0 : i32
    %c0_i32_0 = arith.constant 0 : i32
    %c0_i32_1 = arith.constant 0 : i32
    %c0_i32_2 = arith.constant 0 : i32
    return %c0_i32, %c0_i32_0, %c0_i32_1 : i32, i32, i32
  }
  func.func @transform_10(%arg0: i32) -> (i32, i32, i32) {
    %c0_i32 = arith.constant 0 : i32
    %c0_i32_0 = arith.constant 0 : i32
    %c0_i32_1 = arith.constant 0 : i32
    %c0_i32_2 = arith.constant 0 : i32
    return %c0_i32, %c0_i32_0, %c0_i32_1 : i32, i32, i32
  }
  func.func @transform_11(%arg0: i32) -> (i32, i32, i32) {
    %c0_i32 = arith.constant 0 : i32
    %c0_i32_0 = arith.constant 0 : i32
    %c0_i32_1 = arith.constant 0 : i32
    %c0_i32_2 = arith.constant 0 : i32
    return %c0_i32, %c0_i32_0, %c0_i32_1 : i32, i32, i32
  }
  func.func @transform_12(%arg0: i32) -> (i32, i32, i32) {
    %c0_i32 = arith.constant 0 : i32
    %c0_i32_0 = arith.constant 0 : i32
    %c0_i32_1 = arith.constant 0 : i32
    %c0_i32_2 = arith.constant 0 : i32
    return %c0_i32, %c0_i32_0, %c0_i32_1 : i32, i32, i32
  }
  func.func @transform_13(%arg0: i32) -> (i32, i32) {
    %c0_i32 = arith.constant 0 : i32
    %c0_i32_0 = arith.constant 0 : i32
    %c0_i32_1 = arith.constant 0 : i32
    return %c0_i32, %c0_i32_0 : i32, i32
  }
  func.func @transform_14(%arg0: i32) -> (i32, i32) {
    %c0_i32 = arith.constant 0 : i32
    %c0_i32_0 = arith.constant 0 : i32
    %c0_i32_1 = arith.constant 0 : i32
    return %c0_i32, %c0_i32_0 : i32, i32
  }
  func.func @transform_15(%arg0: i32) -> (i32, i32, i32) {
    %c0_i32 = arith.constant 0 : i32
    %c0_i32_0 = arith.constant 0 : i32
    %c0_i32_1 = arith.constant 0 : i32
    return %arg0, %c0_i32, %c0_i32_0 : i32, i32, i32
  }
}

module attributes {stable_mosaic.version = 11 : i64} {
  func.func @decoder_kernel(%arg0: i32, %arg1: memref<1x16x1xf32, #tpu.memory_space<vmem>>, %arg2: memref<1x16x128xf32, #tpu.memory_space<vmem>>, %arg3: memref<1x16x128xf32, #tpu.memory_space<vmem>>, %arg4: memref<1x16x16xf32, #tpu.memory_space<vmem>>, %arg5: memref<128x128xf32, #tpu.memory_space<vmem>>, %arg6: memref<1x128xf32, #tpu.memory_space<vmem>>, %arg7: memref<2x128x384xf32, #tpu.memory_space<vmem>>, %arg8: memref<2x1x128xf32, #tpu.memory_space<vmem>>, %arg9: memref<2x1x128xf32, #tpu.memory_space<vmem>>, %arg10: memref<2x128x256xf32, #tpu.memory_space<vmem>>, %arg11: memref<2x1x256xf32, #tpu.memory_space<vmem>>, %arg12: memref<2x1x128xf32, #tpu.memory_space<vmem>>, %arg13: memref<2x1x128xf32, #tpu.memory_space<vmem>>, %arg14: memref<128x128xf32, #tpu.memory_space<vmem>>, %arg15: memref<1x128xf32, #tpu.memory_space<vmem>>, %arg16: memref<1x16x128xf32, #tpu.memory_space<vmem>>) attributes {dimension_semantics = [#tpu.dimension_semantics<parallel>], iteration_bounds = array<i64: 1>, scalar_prefetch = 0 : i64, scratch_operands = 0 : i64, tpu.core_type = #tpu.core_type<tc>, window_params = [{transform_indices = @transform_0, window_bounds = array<i64: 1, 16, 1>}, {transform_indices = @transform_1, window_bounds = array<i64: 1, 16, 128>}, {transform_indices = @transform_2, window_bounds = array<i64: 1, 16, 128>}, {transform_indices = @transform_3, window_bounds = array<i64: 1, 16, 16>}, {pipeline_mode = #tpu.pipeline_mode<synchronous>, transform_indices = @transform_4, window_bounds = array<i64: 128, 128>}, {pipeline_mode = #tpu.pipeline_mode<synchronous>, transform_indices = @transform_5, window_bounds = array<i64: 1, 128>}, {pipeline_mode = #tpu.pipeline_mode<synchronous>, transform_indices = @transform_6, window_bounds = array<i64: 2, 128, 384>}, {pipeline_mode = #tpu.pipeline_mode<synchronous>, transform_indices = @transform_7, window_bounds = array<i64: 2, 1, 128>}, {pipeline_mode = #tpu.pipeline_mode<synchronous>, transform_indices = @transform_8, window_bounds = array<i64: 2, 1, 128>}, {pipeline_mode = #tpu.pipeline_mode<synchronous>, transform_indices = @transform_9, window_bounds = array<i64: 2, 128, 256>}, {pipeline_mode = #tpu.pipeline_mode<synchronous>, transform_indices = @transform_10, window_bounds = array<i64: 2, 1, 256>}, {pipeline_mode = #tpu.pipeline_mode<synchronous>, transform_indices = @transform_11, window_bounds = array<i64: 2, 1, 128>}, {pipeline_mode = #tpu.pipeline_mode<synchronous>, transform_indices = @transform_12, window_bounds = array<i64: 2, 1, 128>}, {pipeline_mode = #tpu.pipeline_mode<synchronous>, transform_indices = @transform_13, window_bounds = array<i64: 128, 128>}, {pipeline_mode = #tpu.pipeline_mode<synchronous>, transform_indices = @transform_14, window_bounds = array<i64: 1, 128>}, {transform_indices = @transform_15, window_bounds = array<i64: 1, 16, 128>}]} {
    %c0 = arith.constant 0 : index
    %c0_0 = arith.constant 0 : index
    %c0_1 = arith.constant 0 : index
    %0 = vector.load %arg1[%c0, %c0_0, %c0_1] : memref<1x16x1xf32, #tpu.memory_space<vmem>>, vector<1x16x1xf32>
    %1 = vector.shape_cast %0 : vector<1x16x1xf32> to vector<16x1xf32>
    %2 = tpu.iota {dimensions = array<i32: 1>} : vector<1x128xi32>
    %c32_i32 = arith.constant 32 : i32
    %3 = vector.broadcast %c32_i32 : i32 to vector<1x128xi32>
    %4 = arith.cmpi slt, %2, %3 : vector<1x128xi32>
    %5 = arith.extui %4 : vector<1x128xi1> to vector<1x128xi32>
    %6 = arith.sitofp %5 : vector<1x128xi32> to vector<1x128xf32>
    %c0_2 = arith.constant 0 : index
    %c0_3 = arith.constant 0 : index
    %c0_4 = arith.constant 0 : index
    %7 = vector.load %arg2[%c0_2, %c0_3, %c0_4] : memref<1x16x128xf32, #tpu.memory_space<vmem>>, vector<1x16x128xf32>
    %8 = vector.shape_cast %7 : vector<1x16x128xf32> to vector<16x128xf32>
    %c0_5 = arith.constant 0 : index
    %c0_6 = arith.constant 0 : index
    %c0_7 = arith.constant 0 : index
    %9 = vector.load %arg3[%c0_5, %c0_6, %c0_7] : memref<1x16x128xf32, #tpu.memory_space<vmem>>, vector<1x16x128xf32>
    %10 = vector.shape_cast %9 : vector<1x16x128xf32> to vector<16x128xf32>
    %c0_8 = arith.constant 0 : index
    %c0_9 = arith.constant 0 : index
    %11 = vector.load %arg5[%c0_8, %c0_9] : memref<128x128xf32, #tpu.memory_space<vmem>>, vector<128x128xf32>
    %cst = arith.constant dense<0.000000e+00> : vector<16x128xf32>
    %12 = tpu.matmul %10, %11, %cst {dimension_numbers = #tpu.dot_dimension_numbers<[1], [0], [0], [1], [0, 0, 1, 1], [], []>} : vector<16x128xf32>, vector<128x128xf32>, vector<16x128xf32> -> vector<16x128xf32>
    %c0_10 = arith.constant 0 : index
    %c0_11 = arith.constant 0 : index
    %13 = vector.load %arg6[%c0_10, %c0_11] : memref<1x128xf32, #tpu.memory_space<vmem>>, vector<1x128xf32>
    %14 = vector.broadcast %13 : vector<1x128xf32> to vector<16x128xf32>
    %15 = arith.addf %12, %14 : vector<16x128xf32>
    %16 = arith.addf %8, %15 : vector<16x128xf32>
    %c0_12 = arith.constant 0 : index
    %c0_13 = arith.constant 0 : index
    %c0_14 = arith.constant 0 : index
    %17 = vector.load %arg4[%c0_12, %c0_13, %c0_14] : memref<1x16x16xf32, #tpu.memory_space<vmem>>, vector<1x16x16xf32>
    %18 = vector.shape_cast %17 : vector<1x16x16xf32> to vector<16x16xf32>
    %c0_15 = arith.constant 0 : index
    %c0_16 = arith.constant 0 : index
    %c0_17 = arith.constant 0 : index
    %19 = vector.load %arg7[%c0_15, %c0_16, %c0_17] : memref<2x128x384xf32, #tpu.memory_space<vmem>>, vector<1x128x384xf32>
    %20 = vector.shape_cast %19 : vector<1x128x384xf32> to vector<128x384xf32>
    %cst_18 = arith.constant dense<0.000000e+00> : vector<16x384xf32>
    %21 = tpu.matmul %16, %20, %cst_18 {dimension_numbers = #tpu.dot_dimension_numbers<[1], [0], [0], [1], [0, 0, 1, 1], [], []>} : vector<16x128xf32>, vector<128x384xf32>, vector<16x384xf32> -> vector<16x384xf32>
    %22 = vector.extract_strided_slice %21 {offsets = [0, 0], sizes = [16, 128], strides = [1, 1]} : vector<16x384xf32> to vector<16x128xf32>
    %23 = vector.extract_strided_slice %21 {offsets = [0, 128], sizes = [16, 128], strides = [1, 1]} : vector<16x384xf32> to vector<16x128xf32>
    %24 = vector.extract_strided_slice %21 {offsets = [0, 256], sizes = [16, 128], strides = [1, 1]} : vector<16x384xf32> to vector<16x128xf32>
    %cst_19 = arith.constant dense<0.000000e+00> : vector<16x16xf32>
    %25 = tpu.matmul %22, %23, %cst_19 {dimension_numbers = #tpu.dot_dimension_numbers<[1], [1], [0], [0], [0, 0, 1, 0], [], []>} : vector<16x128xf32>, vector<16x128xf32>, vector<16x16xf32> -> vector<16x16xf32>
    %cst_20 = arith.constant 0.176776692 : f32
    %26 = vector.broadcast %cst_20 : f32 to vector<16x16xf32>
    %27 = arith.mulf %25, %26 : vector<16x16xf32>
    %28 = arith.addf %27, %18 : vector<16x16xf32>
    %cst_21 = arith.constant dense<0xFF800000> : vector<16xf32>
    %29 = vector.multi_reduction <maximumf>, %28, %cst_21 [1] : vector<16x16xf32> to vector<16xf32>
    %30 = vector.shape_cast %29 : vector<16xf32> to vector<16x1xf32>
    %31 = vector.broadcast %30 : vector<16x1xf32> to vector<16x16xf32>
    %32 = arith.subf %28, %31 : vector<16x16xf32>
    %33 = math.exp %32 : vector<16x16xf32>
    %cst_22 = arith.constant dense<0.000000e+00> : vector<16xf32>
    %34 = vector.multi_reduction <add>, %33, %cst_22 [1] : vector<16x16xf32> to vector<16xf32>
    %35 = vector.shape_cast %34 : vector<16xf32> to vector<16x1xf32>
    %36 = tpu.reciprocal %35 {approx = true} : vector<16x1xf32> -> vector<16x1xf32>
    %37 = vector.broadcast %36 : vector<16x1xf32> to vector<16x16xf32>
    %38 = arith.mulf %33, %37 : vector<16x16xf32>
    %cst_23 = arith.constant dense<0.000000e+00> : vector<16x128xf32>
    %39 = tpu.matmul %38, %24, %cst_23 {dimension_numbers = #tpu.dot_dimension_numbers<[1], [0], [0], [1], [0, 0, 1, 1], [], []>} : vector<16x16xf32>, vector<16x128xf32>, vector<16x128xf32> -> vector<16x128xf32>
    %40 = arith.addf %39, %16 : vector<16x128xf32>
    %c0_24 = arith.constant 0 : index
    %c0_25 = arith.constant 0 : index
    %c0_26 = arith.constant 0 : index
    %41 = vector.load %arg8[%c0_24, %c0_25, %c0_26] : memref<2x1x128xf32, #tpu.memory_space<vmem>>, vector<1x1x128xf32>
    %42 = vector.shape_cast %41 : vector<1x1x128xf32> to vector<1x128xf32>
    %c0_27 = arith.constant 0 : index
    %c0_28 = arith.constant 0 : index
    %c0_29 = arith.constant 0 : index
    %43 = vector.load %arg9[%c0_27, %c0_28, %c0_29] : memref<2x1x128xf32, #tpu.memory_space<vmem>>, vector<1x1x128xf32>
    %44 = vector.shape_cast %43 : vector<1x1x128xf32> to vector<1x128xf32>
    %45 = vector.broadcast %6 : vector<1x128xf32> to vector<16x128xf32>
    %46 = arith.mulf %40, %45 : vector<16x128xf32>
    %cst_30 = arith.constant dense<0.000000e+00> : vector<16xf32>
    %47 = vector.multi_reduction <add>, %46, %cst_30 [1] : vector<16x128xf32> to vector<16xf32>
    %48 = vector.shape_cast %47 : vector<16xf32> to vector<16x1xf32>
    %cst_31 = arith.constant 3.125000e-02 : f32
    %49 = vector.broadcast %cst_31 : f32 to vector<16x1xf32>
    %50 = arith.mulf %48, %49 : vector<16x1xf32>
    %51 = vector.broadcast %50 : vector<16x1xf32> to vector<16x128xf32>
    %52 = arith.subf %40, %51 : vector<16x128xf32>
    %53 = vector.broadcast %6 : vector<1x128xf32> to vector<16x128xf32>
    %54 = arith.mulf %52, %53 : vector<16x128xf32>
    %55 = arith.mulf %54, %54 : vector<16x128xf32>
    %cst_32 = arith.constant dense<0.000000e+00> : vector<16xf32>
    %56 = vector.multi_reduction <add>, %55, %cst_32 [1] : vector<16x128xf32> to vector<16xf32>
    %57 = vector.shape_cast %56 : vector<16xf32> to vector<16x1xf32>
    %cst_33 = arith.constant 3.125000e-02 : f32
    %58 = vector.broadcast %cst_33 : f32 to vector<16x1xf32>
    %59 = arith.mulf %57, %58 : vector<16x1xf32>
    %cst_34 = arith.constant 9.99999974E-6 : f32
    %60 = vector.broadcast %cst_34 : f32 to vector<16x1xf32>
    %61 = arith.addf %59, %60 : vector<16x1xf32>
    %62 = math.rsqrt %61 : vector<16x1xf32>
    %63 = vector.broadcast %62 : vector<16x1xf32> to vector<16x128xf32>
    %64 = arith.mulf %54, %63 : vector<16x128xf32>
    %65 = vector.broadcast %42 : vector<1x128xf32> to vector<16x128xf32>
    %66 = arith.mulf %64, %65 : vector<16x128xf32>
    %67 = vector.broadcast %44 : vector<1x128xf32> to vector<16x128xf32>
    %68 = arith.addf %66, %67 : vector<16x128xf32>
    %69 = vector.broadcast %1 : vector<16x1xf32> to vector<16x128xf32>
    %70 = arith.mulf %68, %69 : vector<16x128xf32>
    %c0_35 = arith.constant 0 : index
    %c0_36 = arith.constant 0 : index
    %c0_37 = arith.constant 0 : index
    %71 = vector.load %arg10[%c0_35, %c0_36, %c0_37] : memref<2x128x256xf32, #tpu.memory_space<vmem>>, vector<1x128x256xf32>
    %72 = vector.shape_cast %71 : vector<1x128x256xf32> to vector<128x256xf32>
    %cst_38 = arith.constant dense<0.000000e+00> : vector<16x256xf32>
    %73 = tpu.matmul %70, %72, %cst_38 {dimension_numbers = #tpu.dot_dimension_numbers<[1], [0], [0], [1], [0, 0, 1, 1], [], []>} : vector<16x128xf32>, vector<128x256xf32>, vector<16x256xf32> -> vector<16x256xf32>
    %c0_39 = arith.constant 0 : index
    %c0_40 = arith.constant 0 : index
    %c0_41 = arith.constant 0 : index
    %74 = vector.load %arg11[%c0_39, %c0_40, %c0_41] : memref<2x1x256xf32, #tpu.memory_space<vmem>>, vector<1x1x256xf32>
    %75 = vector.shape_cast %74 : vector<1x1x256xf32> to vector<1x256xf32>
    %76 = vector.broadcast %75 : vector<1x256xf32> to vector<16x256xf32>
    %77 = arith.addf %73, %76 : vector<16x256xf32>
    %78 = vector.extract_strided_slice %77 {offsets = [0, 0], sizes = [16, 128], strides = [1, 1]} : vector<16x256xf32> to vector<16x128xf32>
    %79 = vector.extract_strided_slice %77 {offsets = [0, 128], sizes = [16, 128], strides = [1, 1]} : vector<16x256xf32> to vector<16x128xf32>
    %80 = arith.negf %79 : vector<16x128xf32>
    %81 = math.exp %80 : vector<16x128xf32>
    %cst_42 = arith.constant 1.000000e+00 : f32
    %82 = vector.broadcast %cst_42 : f32 to vector<16x128xf32>
    %83 = arith.addf %82, %81 : vector<16x128xf32>
    %84 = arith.divf %82, %83 : vector<16x128xf32>
    %85 = arith.mulf %78, %84 : vector<16x128xf32>
    %86 = arith.addf %85, %70 : vector<16x128xf32>
    %c0_43 = arith.constant 0 : index
    %c0_44 = arith.constant 0 : index
    %c0_45 = arith.constant 0 : index
    %87 = vector.load %arg12[%c0_43, %c0_44, %c0_45] : memref<2x1x128xf32, #tpu.memory_space<vmem>>, vector<1x1x128xf32>
    %88 = vector.shape_cast %87 : vector<1x1x128xf32> to vector<1x128xf32>
    %c0_46 = arith.constant 0 : index
    %c0_47 = arith.constant 0 : index
    %c0_48 = arith.constant 0 : index
    %89 = vector.load %arg13[%c0_46, %c0_47, %c0_48] : memref<2x1x128xf32, #tpu.memory_space<vmem>>, vector<1x1x128xf32>
    %90 = vector.shape_cast %89 : vector<1x1x128xf32> to vector<1x128xf32>
    %91 = vector.broadcast %6 : vector<1x128xf32> to vector<16x128xf32>
    %92 = arith.mulf %86, %91 : vector<16x128xf32>
    %cst_49 = arith.constant dense<0.000000e+00> : vector<16xf32>
    %93 = vector.multi_reduction <add>, %92, %cst_49 [1] : vector<16x128xf32> to vector<16xf32>
    %94 = vector.shape_cast %93 : vector<16xf32> to vector<16x1xf32>
    %cst_50 = arith.constant 3.125000e-02 : f32
    %95 = vector.broadcast %cst_50 : f32 to vector<16x1xf32>
    %96 = arith.mulf %94, %95 : vector<16x1xf32>
    %97 = vector.broadcast %96 : vector<16x1xf32> to vector<16x128xf32>
    %98 = arith.subf %86, %97 : vector<16x128xf32>
    %99 = vector.broadcast %6 : vector<1x128xf32> to vector<16x128xf32>
    %100 = arith.mulf %98, %99 : vector<16x128xf32>
    %101 = arith.mulf %100, %100 : vector<16x128xf32>
    %cst_51 = arith.constant dense<0.000000e+00> : vector<16xf32>
    %102 = vector.multi_reduction <add>, %101, %cst_51 [1] : vector<16x128xf32> to vector<16xf32>
    %103 = vector.shape_cast %102 : vector<16xf32> to vector<16x1xf32>
    %cst_52 = arith.constant 3.125000e-02 : f32
    %104 = vector.broadcast %cst_52 : f32 to vector<16x1xf32>
    %105 = arith.mulf %103, %104 : vector<16x1xf32>
    %cst_53 = arith.constant 9.99999974E-6 : f32
    %106 = vector.broadcast %cst_53 : f32 to vector<16x1xf32>
    %107 = arith.addf %105, %106 : vector<16x1xf32>
    %108 = math.rsqrt %107 : vector<16x1xf32>
    %109 = vector.broadcast %108 : vector<16x1xf32> to vector<16x128xf32>
    %110 = arith.mulf %100, %109 : vector<16x128xf32>
    %111 = vector.broadcast %88 : vector<1x128xf32> to vector<16x128xf32>
    %112 = arith.mulf %110, %111 : vector<16x128xf32>
    %113 = vector.broadcast %90 : vector<1x128xf32> to vector<16x128xf32>
    %114 = arith.addf %112, %113 : vector<16x128xf32>
    %c1 = arith.constant 1 : index
    %c0_54 = arith.constant 0 : index
    %c0_55 = arith.constant 0 : index
    %115 = vector.load %arg7[%c1, %c0_54, %c0_55] : memref<2x128x384xf32, #tpu.memory_space<vmem>>, vector<1x128x384xf32>
    %116 = vector.shape_cast %115 : vector<1x128x384xf32> to vector<128x384xf32>
    %cst_56 = arith.constant dense<0.000000e+00> : vector<16x384xf32>
    %117 = tpu.matmul %114, %116, %cst_56 {dimension_numbers = #tpu.dot_dimension_numbers<[1], [0], [0], [1], [0, 0, 1, 1], [], []>} : vector<16x128xf32>, vector<128x384xf32>, vector<16x384xf32> -> vector<16x384xf32>
    %118 = vector.extract_strided_slice %117 {offsets = [0, 0], sizes = [16, 128], strides = [1, 1]} : vector<16x384xf32> to vector<16x128xf32>
    %119 = vector.extract_strided_slice %117 {offsets = [0, 128], sizes = [16, 128], strides = [1, 1]} : vector<16x384xf32> to vector<16x128xf32>
    %120 = vector.extract_strided_slice %117 {offsets = [0, 256], sizes = [16, 128], strides = [1, 1]} : vector<16x384xf32> to vector<16x128xf32>
    %cst_57 = arith.constant dense<0.000000e+00> : vector<16x16xf32>
    %121 = tpu.matmul %118, %119, %cst_57 {dimension_numbers = #tpu.dot_dimension_numbers<[1], [1], [0], [0], [0, 0, 1, 0], [], []>} : vector<16x128xf32>, vector<16x128xf32>, vector<16x16xf32> -> vector<16x16xf32>
    %cst_58 = arith.constant 0.176776692 : f32
    %122 = vector.broadcast %cst_58 : f32 to vector<16x16xf32>
    %123 = arith.mulf %121, %122 : vector<16x16xf32>
    %124 = arith.addf %123, %18 : vector<16x16xf32>
    %cst_59 = arith.constant dense<0xFF800000> : vector<16xf32>
    %125 = vector.multi_reduction <maximumf>, %124, %cst_59 [1] : vector<16x16xf32> to vector<16xf32>
    %126 = vector.shape_cast %125 : vector<16xf32> to vector<16x1xf32>
    %127 = vector.broadcast %126 : vector<16x1xf32> to vector<16x16xf32>
    %128 = arith.subf %124, %127 : vector<16x16xf32>
    %129 = math.exp %128 : vector<16x16xf32>
    %cst_60 = arith.constant dense<0.000000e+00> : vector<16xf32>
    %130 = vector.multi_reduction <add>, %129, %cst_60 [1] : vector<16x16xf32> to vector<16xf32>
    %131 = vector.shape_cast %130 : vector<16xf32> to vector<16x1xf32>
    %132 = tpu.reciprocal %131 {approx = true} : vector<16x1xf32> -> vector<16x1xf32>
    %133 = vector.broadcast %132 : vector<16x1xf32> to vector<16x16xf32>
    %134 = arith.mulf %129, %133 : vector<16x16xf32>
    %cst_61 = arith.constant dense<0.000000e+00> : vector<16x128xf32>
    %135 = tpu.matmul %134, %120, %cst_61 {dimension_numbers = #tpu.dot_dimension_numbers<[1], [0], [0], [1], [0, 0, 1, 1], [], []>} : vector<16x16xf32>, vector<16x128xf32>, vector<16x128xf32> -> vector<16x128xf32>
    %136 = arith.addf %135, %114 : vector<16x128xf32>
    %c1_62 = arith.constant 1 : index
    %c0_63 = arith.constant 0 : index
    %c0_64 = arith.constant 0 : index
    %137 = vector.load %arg8[%c1_62, %c0_63, %c0_64] : memref<2x1x128xf32, #tpu.memory_space<vmem>>, vector<1x1x128xf32>
    %138 = vector.shape_cast %137 : vector<1x1x128xf32> to vector<1x128xf32>
    %c1_65 = arith.constant 1 : index
    %c0_66 = arith.constant 0 : index
    %c0_67 = arith.constant 0 : index
    %139 = vector.load %arg9[%c1_65, %c0_66, %c0_67] : memref<2x1x128xf32, #tpu.memory_space<vmem>>, vector<1x1x128xf32>
    %140 = vector.shape_cast %139 : vector<1x1x128xf32> to vector<1x128xf32>
    %141 = vector.broadcast %6 : vector<1x128xf32> to vector<16x128xf32>
    %142 = arith.mulf %136, %141 : vector<16x128xf32>
    %cst_68 = arith.constant dense<0.000000e+00> : vector<16xf32>
    %143 = vector.multi_reduction <add>, %142, %cst_68 [1] : vector<16x128xf32> to vector<16xf32>
    %144 = vector.shape_cast %143 : vector<16xf32> to vector<16x1xf32>
    %cst_69 = arith.constant 3.125000e-02 : f32
    %145 = vector.broadcast %cst_69 : f32 to vector<16x1xf32>
    %146 = arith.mulf %144, %145 : vector<16x1xf32>
    %147 = vector.broadcast %146 : vector<16x1xf32> to vector<16x128xf32>
    %148 = arith.subf %136, %147 : vector<16x128xf32>
    %149 = vector.broadcast %6 : vector<1x128xf32> to vector<16x128xf32>
    %150 = arith.mulf %148, %149 : vector<16x128xf32>
    %151 = arith.mulf %150, %150 : vector<16x128xf32>
    %cst_70 = arith.constant dense<0.000000e+00> : vector<16xf32>
    %152 = vector.multi_reduction <add>, %151, %cst_70 [1] : vector<16x128xf32> to vector<16xf32>
    %153 = vector.shape_cast %152 : vector<16xf32> to vector<16x1xf32>
    %cst_71 = arith.constant 3.125000e-02 : f32
    %154 = vector.broadcast %cst_71 : f32 to vector<16x1xf32>
    %155 = arith.mulf %153, %154 : vector<16x1xf32>
    %cst_72 = arith.constant 9.99999974E-6 : f32
    %156 = vector.broadcast %cst_72 : f32 to vector<16x1xf32>
    %157 = arith.addf %155, %156 : vector<16x1xf32>
    %158 = math.rsqrt %157 : vector<16x1xf32>
    %159 = vector.broadcast %158 : vector<16x1xf32> to vector<16x128xf32>
    %160 = arith.mulf %150, %159 : vector<16x128xf32>
    %161 = vector.broadcast %138 : vector<1x128xf32> to vector<16x128xf32>
    %162 = arith.mulf %160, %161 : vector<16x128xf32>
    %163 = vector.broadcast %140 : vector<1x128xf32> to vector<16x128xf32>
    %164 = arith.addf %162, %163 : vector<16x128xf32>
    %165 = vector.broadcast %1 : vector<16x1xf32> to vector<16x128xf32>
    %166 = arith.mulf %164, %165 : vector<16x128xf32>
    %c1_73 = arith.constant 1 : index
    %c0_74 = arith.constant 0 : index
    %c0_75 = arith.constant 0 : index
    %167 = vector.load %arg10[%c1_73, %c0_74, %c0_75] : memref<2x128x256xf32, #tpu.memory_space<vmem>>, vector<1x128x256xf32>
    %168 = vector.shape_cast %167 : vector<1x128x256xf32> to vector<128x256xf32>
    %cst_76 = arith.constant dense<0.000000e+00> : vector<16x256xf32>
    %169 = tpu.matmul %166, %168, %cst_76 {dimension_numbers = #tpu.dot_dimension_numbers<[1], [0], [0], [1], [0, 0, 1, 1], [], []>} : vector<16x128xf32>, vector<128x256xf32>, vector<16x256xf32> -> vector<16x256xf32>
    %c1_77 = arith.constant 1 : index
    %c0_78 = arith.constant 0 : index
    %c0_79 = arith.constant 0 : index
    %170 = vector.load %arg11[%c1_77, %c0_78, %c0_79] : memref<2x1x256xf32, #tpu.memory_space<vmem>>, vector<1x1x256xf32>
    %171 = vector.shape_cast %170 : vector<1x1x256xf32> to vector<1x256xf32>
    %172 = vector.broadcast %171 : vector<1x256xf32> to vector<16x256xf32>
    %173 = arith.addf %169, %172 : vector<16x256xf32>
    %174 = vector.extract_strided_slice %173 {offsets = [0, 0], sizes = [16, 128], strides = [1, 1]} : vector<16x256xf32> to vector<16x128xf32>
    %175 = vector.extract_strided_slice %173 {offsets = [0, 128], sizes = [16, 128], strides = [1, 1]} : vector<16x256xf32> to vector<16x128xf32>
    %176 = arith.negf %175 : vector<16x128xf32>
    %177 = math.exp %176 : vector<16x128xf32>
    %cst_80 = arith.constant 1.000000e+00 : f32
    %178 = vector.broadcast %cst_80 : f32 to vector<16x128xf32>
    %179 = arith.addf %178, %177 : vector<16x128xf32>
    %180 = arith.divf %178, %179 : vector<16x128xf32>
    %181 = arith.mulf %174, %180 : vector<16x128xf32>
    %182 = arith.addf %181, %166 : vector<16x128xf32>
    %c1_81 = arith.constant 1 : index
    %c0_82 = arith.constant 0 : index
    %c0_83 = arith.constant 0 : index
    %183 = vector.load %arg12[%c1_81, %c0_82, %c0_83] : memref<2x1x128xf32, #tpu.memory_space<vmem>>, vector<1x1x128xf32>
    %184 = vector.shape_cast %183 : vector<1x1x128xf32> to vector<1x128xf32>
    %c1_84 = arith.constant 1 : index
    %c0_85 = arith.constant 0 : index
    %c0_86 = arith.constant 0 : index
    %185 = vector.load %arg13[%c1_84, %c0_85, %c0_86] : memref<2x1x128xf32, #tpu.memory_space<vmem>>, vector<1x1x128xf32>
    %186 = vector.shape_cast %185 : vector<1x1x128xf32> to vector<1x128xf32>
    %187 = vector.broadcast %6 : vector<1x128xf32> to vector<16x128xf32>
    %188 = arith.mulf %182, %187 : vector<16x128xf32>
    %cst_87 = arith.constant dense<0.000000e+00> : vector<16xf32>
    %189 = vector.multi_reduction <add>, %188, %cst_87 [1] : vector<16x128xf32> to vector<16xf32>
    %190 = vector.shape_cast %189 : vector<16xf32> to vector<16x1xf32>
    %cst_88 = arith.constant 3.125000e-02 : f32
    %191 = vector.broadcast %cst_88 : f32 to vector<16x1xf32>
    %192 = arith.mulf %190, %191 : vector<16x1xf32>
    %193 = vector.broadcast %192 : vector<16x1xf32> to vector<16x128xf32>
    %194 = arith.subf %182, %193 : vector<16x128xf32>
    %195 = vector.broadcast %6 : vector<1x128xf32> to vector<16x128xf32>
    %196 = arith.mulf %194, %195 : vector<16x128xf32>
    %197 = arith.mulf %196, %196 : vector<16x128xf32>
    %cst_89 = arith.constant dense<0.000000e+00> : vector<16xf32>
    %198 = vector.multi_reduction <add>, %197, %cst_89 [1] : vector<16x128xf32> to vector<16xf32>
    %199 = vector.shape_cast %198 : vector<16xf32> to vector<16x1xf32>
    %cst_90 = arith.constant 3.125000e-02 : f32
    %200 = vector.broadcast %cst_90 : f32 to vector<16x1xf32>
    %201 = arith.mulf %199, %200 : vector<16x1xf32>
    %cst_91 = arith.constant 9.99999974E-6 : f32
    %202 = vector.broadcast %cst_91 : f32 to vector<16x1xf32>
    %203 = arith.addf %201, %202 : vector<16x1xf32>
    %204 = math.rsqrt %203 : vector<16x1xf32>
    %205 = vector.broadcast %204 : vector<16x1xf32> to vector<16x128xf32>
    %206 = arith.mulf %196, %205 : vector<16x128xf32>
    %207 = vector.broadcast %184 : vector<1x128xf32> to vector<16x128xf32>
    %208 = arith.mulf %206, %207 : vector<16x128xf32>
    %209 = vector.broadcast %186 : vector<1x128xf32> to vector<16x128xf32>
    %210 = arith.addf %208, %209 : vector<16x128xf32>
    %c0_92 = arith.constant 0 : index
    %c0_93 = arith.constant 0 : index
    %211 = vector.load %arg14[%c0_92, %c0_93] : memref<128x128xf32, #tpu.memory_space<vmem>>, vector<128x128xf32>
    %cst_94 = arith.constant dense<0.000000e+00> : vector<16x128xf32>
    %212 = tpu.matmul %210, %211, %cst_94 {dimension_numbers = #tpu.dot_dimension_numbers<[1], [0], [0], [1], [0, 0, 1, 1], [], []>} : vector<16x128xf32>, vector<128x128xf32>, vector<16x128xf32> -> vector<16x128xf32>
    %c0_95 = arith.constant 0 : index
    %c0_96 = arith.constant 0 : index
    %213 = vector.load %arg15[%c0_95, %c0_96] : memref<1x128xf32, #tpu.memory_space<vmem>>, vector<1x128xf32>
    %214 = vector.broadcast %213 : vector<1x128xf32> to vector<16x128xf32>
    %215 = arith.addf %212, %214 : vector<16x128xf32>
    %c0_97 = arith.constant 0 : index
    %c0_98 = arith.constant 0 : index
    %c0_99 = arith.constant 0 : index
    %216 = vector.load %arg16[%c0_97, %c0_98, %c0_99] : memref<1x16x128xf32, #tpu.memory_space<vmem>>, vector<1x16x128xf32>
    %217 = vector.shape_cast %216 : vector<1x16x128xf32> to vector<16x128xf32>
    %218 = vector.shape_cast %215 : vector<16x128xf32> to vector<1x16x128xf32>
    tpu.vector_store %arg16[%c0_97, %c0_98, %c0_99], %218 {strides = array<i32>} : memref<1x16x128xf32, #tpu.memory_space<vmem>>, vector<1x16x128xf32>,
    return
  }
  func.func @transform_0(%arg0: i32) -> (i32, i32, i32) {
    %c0_i32 = arith.constant 0 : i32
    %c0_i32_0 = arith.constant 0 : i32
    %c0_i32_1 = arith.constant 0 : i32
    return %arg0, %c0_i32, %c0_i32_0 : i32, i32, i32
  }
  func.func @transform_1(%arg0: i32) -> (i32, i32, i32) {
    %c0_i32 = arith.constant 0 : i32
    %c0_i32_0 = arith.constant 0 : i32
    %c0_i32_1 = arith.constant 0 : i32
    return %arg0, %c0_i32, %c0_i32_0 : i32, i32, i32
  }
  func.func @transform_2(%arg0: i32) -> (i32, i32, i32) {
    %c0_i32 = arith.constant 0 : i32
    %c0_i32_0 = arith.constant 0 : i32
    %c0_i32_1 = arith.constant 0 : i32
    return %arg0, %c0_i32, %c0_i32_0 : i32, i32, i32
  }
  func.func @transform_3(%arg0: i32) -> (i32, i32, i32) {
    %c0_i32 = arith.constant 0 : i32
    %c0_i32_0 = arith.constant 0 : i32
    %c0_i32_1 = arith.constant 0 : i32
    return %arg0, %c0_i32, %c0_i32_0 : i32, i32, i32
  }
  func.func @transform_4(%arg0: i32) -> (i32, i32) {
    %c0_i32 = arith.constant 0 : i32
    %c0_i32_0 = arith.constant 0 : i32
    %c0_i32_1 = arith.constant 0 : i32
    return %c0_i32, %c0_i32_0 : i32, i32
  }
  func.func @transform_5(%arg0: i32) -> (i32, i32) {
    %c0_i32 = arith.constant 0 : i32
    %c0_i32_0 = arith.constant 0 : i32
    %c0_i32_1 = arith.constant 0 : i32
    return %c0_i32, %c0_i32_0 : i32, i32
  }
  func.func @transform_6(%arg0: i32) -> (i32, i32, i32) {
    %c0_i32 = arith.constant 0 : i32
    %c0_i32_0 = arith.constant 0 : i32
    %c0_i32_1 = arith.constant 0 : i32
    %c0_i32_2 = arith.constant 0 : i32
    return %c0_i32, %c0_i32_0, %c0_i32_1 : i32, i32, i32
  }
  func.func @transform_7(%arg0: i32) -> (i32, i32, i32) {
    %c0_i32 = arith.constant 0 : i32
    %c0_i32_0 = arith.constant 0 : i32
    %c0_i32_1 = arith.constant 0 : i32
    %c0_i32_2 = arith.constant 0 : i32
    return %c0_i32, %c0_i32_0, %c0_i32_1 : i32, i32, i32
  }
  func.func @transform_8(%arg0: i32) -> (i32, i32, i32) {
    %c0_i32 = arith.constant 0 : i32
    %c0_i32_0 = arith.constant 0 : i32
    %c0_i32_1 = arith.constant 0 : i32
    %c0_i32_2 = arith.constant 0 : i32
    return %c0_i32, %c0_i32_0, %c0_i32_1 : i32, i32, i32
  }
  func.func @transform_9(%arg0: i32) -> (i32, i32, i32) {
    %c0_i32 = arith.constant 0 : i32
    %c0_i32_0 = arith.constant 0 : i32
    %c0_i32_1 = arith.constant 0 : i32
    %c0_i32_2 = arith.constant 0 : i32
    return %c0_i32, %c0_i32_0, %c0_i32_1 : i32, i32, i32
  }
  func.func @transform_10(%arg0: i32) -> (i32, i32, i32) {
    %c0_i32 = arith.constant 0 : i32
    %c0_i32_0 = arith.constant 0 : i32
    %c0_i32_1 = arith.constant 0 : i32
    %c0_i32_2 = arith.constant 0 : i32
    return %c0_i32, %c0_i32_0, %c0_i32_1 : i32, i32, i32
  }
  func.func @transform_11(%arg0: i32) -> (i32, i32, i32) {
    %c0_i32 = arith.constant 0 : i32
    %c0_i32_0 = arith.constant 0 : i32
    %c0_i32_1 = arith.constant 0 : i32
    %c0_i32_2 = arith.constant 0 : i32
    return %c0_i32, %c0_i32_0, %c0_i32_1 : i32, i32, i32
  }
  func.func @transform_12(%arg0: i32) -> (i32, i32, i32) {
    %c0_i32 = arith.constant 0 : i32
    %c0_i32_0 = arith.constant 0 : i32
    %c0_i32_1 = arith.constant 0 : i32
    %c0_i32_2 = arith.constant 0 : i32
    return %c0_i32, %c0_i32_0, %c0_i32_1 : i32, i32, i32
  }
  func.func @transform_13(%arg0: i32) -> (i32, i32) {
    %c0_i32 = arith.constant 0 : i32
    %c0_i32_0 = arith.constant 0 : i32
    %c0_i32_1 = arith.constant 0 : i32
    return %c0_i32, %c0_i32_0 : i32, i32
  }
  func.func @transform_14(%arg0: i32) -> (i32, i32) {
    %c0_i32 = arith.constant 0 : i32
    %c0_i32_0 = arith.constant 0 : i32
    %c0_i32_1 = arith.constant 0 : i32
    return %c0_i32, %c0_i32_0 : i32, i32
  }
  func.func @transform_15(%arg0: i32) -> (i32, i32, i32) {
    %c0_i32 = arith.constant 0 : i32
    %c0_i32_0 = arith.constant 0 : i32
    %c0_i32_1 = arith.constant 0 : i32
    return %arg0, %c0_i32, %c0_i32_0 : i32, i32, i32
  }
}

</mosaic_0001>

<bundles_post_ra>
// kernel: tpu_custom_call.1
= control target key start
LH: loop header
LB: loop body
LE: loop exit
PB: predicated region body
PF: predicated region fallthrough
CT: control target
= control target key end

     0   :  { %20 = vsyncpa [#allocation3], 0  ;;  %s1736_s0 = inlined_call_operand.vmem [shape: f32[1,16,1], index: 0, kind: input, shape index: {}]   ;;  %s1737_s1 = inlined_call_operand.vmem [shape: f32[1,16,128], index: 1, kind: input, shape index: {}]   ;;  %s1738_s2 = inlined_call_operand.hbm [shape: f32[1,16,128], index: 2, kind: input, shape index: {}]   ;;  %s1739_s3 = inlined_call_operand.hbm [shape: f32[1,16,16], index: 3, kind: input, shape index: {}]   ;;  %s1740_s4 = inlined_call_operand.hbm [shape: f32[128,128], index: 4, kind: input, shape index: {}]   ;;  %s1741_s5 = inlined_call_operand.hbm [shape: f32[1,128], index: 5, kind: input, shape index: {}]   ;;  %s1742_s6 = inlined_call_operand.hbm [shape: f32[2,128,384], index: 6, kind: input, shape index: {}]   ;;  %s1743_s7 = inlined_call_operand.vmem [shape: f32[2,1,128], index: 7, kind: input, shape index: {}]   ;;  %s1744_s8 = inlined_call_operand.vmem [shape: f32[2,1,128], index: 8, kind: input, shape index: {}]   ;;  %s1745_s9 = inlined_call_operand.hbm [shape: f32[2,128,256], index: 9, kind: input, shape index: {}]   ;;  %s1746_s10 = inlined_call_operand.vmem [shape: f32[2,1,256], index: 10, kind: input, shape index: {}]   ;;  %s1747_s11 = inlined_call_operand.vmem [shape: f32[2,1,128], index: 11, kind: input, shape index: {}]   ;;  %s1748_s12 = inlined_call_operand.vmem [shape: f32[2,1,128], index: 12, kind: input, shape index: {}]   ;;  %s1749_s13 = inlined_call_operand.hbm [shape: f32[128,128], index: 13, kind: input, shape index: {}]   ;;  %s1750_s14 = inlined_call_operand.vmem [shape: f32[1,128], index: 14, kind: input, shape index: {}]   ;;  %s1751_s15 = inlined_call_operand.hbm [shape: f32[1,16,128], index: 15, kind: output, shape index: {}]  }
   0x1   :  { %21 = vsyncpa [#allocation6], 0 }
   0x2   :  { %22 = vsyncpa [#allocation9], 0 }
   0x3   :  { %23 = vsyncpa [#allocation12], 0 }
   0x4   :  { %24 = vsyncpa [#allocation4], 0  ;;  %s46_s20 = sshll.u32 %s1739_s3, 4  ;;  %s1463_s21 = smov [#allocation5]   ;;  %s47_s20 = int_to_ptr.hbm [resolvable:$true] %s46_s20 }
   0x5   :  { %s48_s22 = sshll.u32 %s1463_s21, 4  ;;  %s73_s25 = sshll.u32 %s1741_s5, 4  ;;  %s49_s22 = int_to_ptr.vmem [resolvable:$true] %s48_s22  ;;  %s74_s25 = int_to_ptr.hbm [resolvable:$true] %s73_s25 }
   0x6   :  { %s1752_s26 = smov 128   ;;  %s1465_s27 = smov 8  }
   0x7   :  { %54 = dma.hbm_to_vmem [thread:$0]  %s47_s20, 256, %s49_s22, [#allocation6], %s1752_s26, %s1752_s26, %s1465_s27  }
   0x8   :  { %s1466_s28 = smov [#allocation8]   ;;  %s100_s3 = sshll.u32 %s1745_s9, 4  ;;  %s101_s3 = int_to_ptr.hbm [resolvable:$true] %s100_s3 }
   0x9   :  { %s75_s29 = sshll.u32 %s1466_s28, 4  ;;  %s1467_s17 = smov [#allocation11]   ;;  %s76_s29 = int_to_ptr.vmem [resolvable:$true] %s75_s29 }
   0xa   :  { %78 = dma.hbm_to_vmem [thread:$0]  %s74_s25, 16, %s76_s29, [#allocation9]  }
   0xb   :  { %s102_s18 = sshll.u32 %s1467_s17, 4  ;;  %s33_s21 = sshll.u32 %s1738_s2, 4  ;;  %s103_s18 = int_to_ptr.vmem [resolvable:$true] %s102_s18  ;;  %s34_s21 = int_to_ptr.hbm [resolvable:$true] %s33_s21 }
   0xc   :  { %s1468_s23 = smov 256   ;;  %s1469_s24 = smov 16  }
   0xd   :  { %108 = dma.hbm_to_vmem [thread:$0]  %s101_s3, 8192, %s103_s18, [#allocation12], %s1468_s23, %s1468_s23, %s1469_s24  }
   0xe   :  { %s1470_s20 = smov [#allocation2]   ;;  %s59_s9 = sshll.u32 %s1740_s4, 4  ;;  %s60_s9 = int_to_ptr.hbm [resolvable:$true] %s59_s9 }
   0xf   :  { %s35_s22 = sshll.u32 %s1470_s20, 4  ;;  %s1754_s25 = smov 128   ;;  %s36_s22 = int_to_ptr.vmem [resolvable:$true] %s35_s22 }
  0x10   :  { %41 = dma.hbm_to_vmem [thread:$0]  %s34_s21, 256, %s36_s22, [#allocation3], %s1754_s25, %s1754_s25, %s1465_s27  }
  0x11   :  { %s83_s2 = sshll.u32 %s1742_s6, 4  ;;  %s1471_s16 = smov [#allocation7]   ;;  %s84_s2 = int_to_ptr.hbm [resolvable:$true] %s83_s2 }
  0x12   :  { %s61_s17 = sshll.u32 %s1471_s16, 4  ;;  %s1472_s26 = smov [#allocation10]   ;;  %s62_s17 = int_to_ptr.vmem [resolvable:$true] %s61_s17 }
  0x13   :  { %67 = dma.hbm_to_vmem [thread:$0]  %s60_s9, 2048, %s62_s17, [#allocation6], %s1754_s25, %s1754_s25, %s1465_s27  }
  0x14   :  { %s85_s4 = sshll.u32 %s1472_s26, 4  ;;  %s1473_s3 = smov 384   ;;  %s86_s4 = int_to_ptr.vmem [resolvable:$true] %s85_s4 }
  0x15   :  { %s1474_s18 = smov 24   ;;  %s119_s21 = sshll.u32 %s1749_s13, 4  ;;  %s120_s21 = int_to_ptr.hbm [resolvable:$true] %s119_s21 }
  0x16   :  { %91 = dma.hbm_to_vmem [thread:$0]  %s84_s2, 12288, %s86_s4, [#allocation9], %s1473_s3, %s1473_s3, %s1474_s18  }
  0x17   :  { %s1475_s6 = smov [#allocation13]  }
  0x18   :  { %s121_s23 = sshll.u32 %s1475_s6, 4  ;;  %s122_s23 = int_to_ptr.vmem [resolvable:$true] %s121_s23 }
  0x19   :  { %127 = dma.hbm_to_vmem [thread:$0]  %s120_s21, 2048, %s122_s23, [#allocation12], %s1754_s25, %s1754_s25, %s1465_s27  }
  0x1a   :  { %1453 = dma.done.wait [#allocation3], 256  }
  0x1b   :  { %1454 = vsyncadd [#allocation3], 4294967040 }
  0x1c   :  { %1455 = dma.done.wait [#allocation6], 2304  }
  0x1d   :  { %1456 = vsyncadd [#allocation6], 4294964992 }
  0x1e   :  { %1457 = dma.done.wait [#allocation9], 12304  }
  0x1f   :  { %1458 = vsyncadd [#allocation9], 4294954992 }
  0x20   :  { %1459 = dma.done.wait [#allocation12], 10240  }
  0x21   :  { %1460 = vsyncadd [#allocation12], 4294957056  ;;  %v184_v0 = vld [vmem:[#allocation7 + $0x78] sm:$0xff]  ;;  %v183_v1 = vld [vmem:[#allocation7 + $0x70] sm:$0xff]  ;;  %vm360_vm0 = vcmask 130048   ;;  %s1155_s29 = sshll.u32 %s1751_s15, 4  ;;  %s1156_s29 = int_to_ptr.hbm [resolvable:$true] %s1155_s29 }
  0x22   :  { %189 = vmatpush.msra.mxu0 %v184_v0  ;;  %v182_v2 = vld [vmem:[#allocation7 + $0x68] sm:$0xff]  ;;  %v181_v3 = vld [vmem:[#allocation7 + $0x60] sm:$0xff]  ;;  %v180_v4 = vld [vmem:[#allocation7 + $0x58] sm:$0xff] }
  0x23   :  { %v179_v5 = vld [vmem:[#allocation7 + $0x50] sm:$0xff]  ;;  %v263_v8 = vld [vmem:[#allocation10 + $0x178] sm:$0xff]  ;;  %v260_v11 = vld [vmem:[#allocation10 + $0x160] sm:$0xff] }
  0x24   :  { %190 = vmatpush.msra.mxu0 %v183_v1  ;;  %v261_v6 = vld [vmem:[#allocation10 + $0x168] sm:$0xff]  ;;  %v262_v7 = vld [vmem:[#allocation10 + $0x170] sm:$0xff]  ;;  %v259_v10 = vld [vmem:[#allocation10 + $0x158] sm:$0xff]  ;;  %310 = vmatpush.msra.mxu3 %v263_v8 }
  0x25   :  { %264 = vmatpush.msra.mxu1 %v261_v6  ;;  %v258_v9 = vld [vmem:[#allocation10 + $0x150] sm:$0xff]  ;;  %v178_v12 = vld [vmem:[#allocation7 + $0x48] sm:$0xff]  ;;  %287 = vmatpush.msra.mxu2 %v262_v7  ;;  %v255_v13 = vld [vmem:[#allocation10 + $0x138] sm:$0xff] }
  0x26   :  { %191 = vmatpush.msra.mxu0 %v182_v2  ;;  %v256_v14 = vld [vmem:[#allocation10 + $0x140] sm:$0xff]  ;;  %v257_v15 = vld [vmem:[#allocation10 + $0x148] sm:$0xff]  ;;  %311 = vmatpush.msra.mxu3 %v260_v11  ;;  %v254_v19 = vld [vmem:[#allocation10 + $0x130] sm:$0xff] }
  0x27   :  { %265 = vmatpush.msra.mxu1 %v258_v9  ;;  %v177_v16 = vld [vmem:[#allocation7 + $0x40] sm:$0xff]  ;;  %288 = vmatpush.msra.mxu2 %v259_v10  ;;  %v253_v18 = vld [vmem:[#allocation10 + $0x128] sm:$0xff]  ;;  %v176_v20 = vld [vmem:[#allocation7 + $0x38] sm:$0xff] }
  0x28   :  { %192 = vmatpush.msra.mxu0 %v181_v3  ;;  %v252_v17 = vld [vmem:[#allocation10 + $0x120] sm:$0xff]  ;;  %312 = vmatpush.msra.mxu3 %v257_v15  ;;  %v249_v21 = vld [vmem:[#allocation10 + $0x108] sm:$0xff]  ;;  %v250_v22 = vld [vmem:[#allocation10 + $0x110] sm:$0xff] }
  0x29   :  { %266 = vmatpush.msra.mxu1 %v255_v13  ;;  %289 = vmatpush.msra.mxu2 %v256_v14  ;;  %v251_v23 = vld [vmem:[#allocation10 + $0x118] sm:$0xff]  ;;  %v175_v24 = vld [vmem:[#allocation7 + $0x30] sm:$0xff]  ;;  %v248_v27 = vld [vmem:[#allocation10 + $0x100] sm:$0xff] }
  0x2a   :  { %193 = vmatpush.msra.mxu0 %v180_v4  ;;  %313 = vmatpush.msra.mxu3 %v254_v19  ;;  %v246_v25 = vld [vmem:[#allocation10 + $0xf0] sm:$0xff]  ;;  %v247_v26 = vld [vmem:[#allocation10 + $0xf8] sm:$0xff]  ;;  %v174_v28 = vld [vmem:[#allocation7 + $0x28] sm:$0xff] }
  0x2b   :  { %267 = vmatpush.msra.mxu1 %v252_v17  ;;  %290 = vmatpush.msra.mxu2 %v253_v18  ;;  %v243_v29 = vld [vmem:[#allocation10 + $0xd8] sm:$0xff]  ;;  %v244_v31 = vld [vmem:[#allocation10 + $0xe0] sm:$0xff]  ;;  %v245_v32 = vld [vmem:[#allocation10 + $0xe8] sm:$0xff] }
  0x2c   :  { %194 = vmatpush.msra.mxu0 %v179_v5  ;;  %314 = vmatpush.msra.mxu3 %v251_v23  ;;  %v173_v30 = vld [vmem:[#allocation7 + $0x20] sm:$0xff]  ;;  %v172_v33 = vld [vmem:[#allocation7 + $0x18] sm:$0xff]  ;;  %v241_v35 = vld [vmem:[#allocation10 + $0xc8] sm:$0xff] }
  0x2d   :  { %268 = vmatpush.msra.mxu1 %v249_v21  ;;  %291 = vmatpush.msra.mxu2 %v250_v22  ;;  %v240_v34 = vld [vmem:[#allocation10 + $0xc0] sm:$0xff]  ;;  %v242_v36 = vld [vmem:[#allocation10 + $0xd0] sm:$0xff]  ;;  %v237_v37 = vld [vmem:[#allocation10 + $0xa8] sm:$0xff] }
  0x2e   :  { %195 = vmatpush.msra.mxu0 %v178_v12  ;;  %315 = vmatpush.msra.mxu3 %v248_v27  ;;  %v238_v38 = vld [vmem:[#allocation10 + $0xb0] sm:$0xff]  ;;  %v239_v39 = vld [vmem:[#allocation10 + $0xb8] sm:$0xff]  ;;  %v236_v43 = vld [vmem:[#allocation10 + $0xa0] sm:$0xff] }
  0x2f   :  { %269 = vmatpush.msra.mxu1 %v246_v25  ;;  %292 = vmatpush.msra.mxu2 %v247_v26  ;;  %v171_v40 = vld [vmem:[#allocation7 + $0x10] sm:$0xff]  ;;  %v235_v42 = vld [vmem:[#allocation10 + $0x98] sm:$0xff]  ;;  %v170_v44 = vld [vmem:[#allocation7 + $0x8] sm:$0xff] }
  0x30   :  { %196 = vmatpush.msra.mxu0 %v177_v16  ;;  %316 = vmatpush.msra.mxu3 %v245_v32  ;;  %v234_v41 = vld [vmem:[#allocation10 + $0x90] sm:$0xff]  ;;  %v231_v45 = vld [vmem:[#allocation10 + $0x78] sm:$0xff]  ;;  %v232_v46 = vld [vmem:[#allocation10 + $0x80] sm:$0xff] }
  0x31   :  { %270 = vmatpush.msra.mxu1 %v243_v29  ;;  %293 = vmatpush.msra.mxu2 %v244_v31  ;;  %v233_v47 = vld [vmem:[#allocation10 + $0x88] sm:$0xff]  ;;  %v169_v48 = vld [vmem:[#allocation7] sm:$0xff]  ;;  %v230_v52 = vld [vmem:[#allocation10 + $0x70] sm:$0xff] }
  0x32   :  { %197 = vmatpush.msra.mxu0 %v176_v20  ;;  %317 = vmatpush.msra.mxu3 %v242_v36  ;;  %v228_v49 = vld [vmem:[#allocation10 + $0x60] sm:$0xff]  ;;  %v229_v51 = vld [vmem:[#allocation10 + $0x68] sm:$0xff]  ;;  %v226_v54 = vld [vmem:[#allocation10 + $0x50] sm:$0xff] }
  0x33   :  { %271 = vmatpush.msra.mxu1 %v240_v34  ;;  %294 = vmatpush.msra.mxu2 %v241_v35  ;;  %v167_v50 = vld [vmem:[#allocation2] sm:$0xff]  ;;  %v225_v53 = vld [vmem:[#allocation10 + $0x48] sm:$0xff]  ;;  %v222_v57 = vld [vmem:[#allocation10 + $0x30] sm:$0xff] }
  0x34   :  { %198 = vmatpush.msra.mxu0 %v175_v24  ;;  %318 = vmatpush.msra.mxu3 %v239_v39  ;;  %v227_v55 = vld [vmem:[#allocation10 + $0x58] sm:$0xff]  ;;  %v168_v56 = vld [vmem:[#allocation2 + $0x8] sm:$0xff]  ;;  %v218_v1 = vld [vmem:[#allocation10 + $0x10] sm:$0xff] }
  0x35   :  { %272 = vmatpush.msra.mxu1 %v237_v37  ;;  %295 = vmatpush.msra.mxu2 %v238_v38  ;;  %v223_v58 = vld [vmem:[#allocation10 + $0x38] sm:$0xff]  ;;  %v224_v59 = vld [vmem:[#allocation10 + $0x40] sm:$0xff]  ;;  %v221_v62 = vld [vmem:[#allocation10 + $0x28] sm:$0xff] }
  0x36   :  { %199 = vmatpush.msra.mxu0 %v174_v28  ;;  %319 = vmatpush.msra.mxu3 %v236_v43  ;;  %v219_v60 = vld [vmem:[#allocation10 + $0x18] sm:$0xff]  ;;  %v220_v61 = vld [vmem:[#allocation10 + $0x20] sm:$0xff]  ;;  %v217_v0 = vld [vmem:[#allocation10 + $0x8] sm:$0xff]  ;;  %v160_v43 = vlaneseq }
  0x37   :  { %273 = vmatpush.msra.mxu1 %v234_v41  ;;  %296 = vmatpush.msra.mxu2 %v235_v42  ;;  %v216_v63 = vld [vmem:[#allocation10] sm:$0xff]  ;;  %v1203_v2 = vld [vmem:[#allocation8] ss:$0 sm:$0xff]  ;;  %v1608_v18 = vld [vmem:[#allocation5] sm:$0xff] }
  0x38   :  { %200 = vmatpush.msra.mxu0 %v173_v30  ;;  %320 = vmatpush.msra.mxu3 %v233_v47  ;;  %v165_v3 = vld [vmem:[%s1737_s1] sm:$0xff]  ;;  %v166_v7 = vld [vmem:[%s1737_s1 + $0x8] sm:$0xff]  ;;  %v1612_v23 = vld [vmem:[#allocation5 + $0x8] sm:$0xff] }
  0x39   :  { %274 = vmatpush.msra.mxu1 %v231_v45  ;;  %297 = vmatpush.msra.mxu2 %v232_v46  ;;  %v1476_v46 = vmov 0.0  }
  0x3a   :  { %201 = vmatpush.msra.mxu0 %v172_v33  ;;  %321 = vmatpush.msra.mxu3 %v230_v52 }
  0x3b   :  { %275 = vmatpush.msra.mxu1 %v228_v49  ;;  %298 = vmatpush.msra.mxu2 %v229_v51 }
  0x3c   :  { %202 = vmatpush.msra.mxu0 %v171_v40  ;;  %322 = vmatpush.msra.mxu3 %v227_v55  ;;  %v510_v55 = vld [vmem:[#allocation11 + $0xf0] sm:$0xff] }
  0x3d   :  { %276 = vmatpush.msra.mxu1 %v225_v53  ;;  %299 = vmatpush.msra.mxu2 %v226_v54  ;;  %v1477_v53 = vmov 0   ;;  %v158_v54 = vld [vmem:[%s1736_s0] sm:$0xff] }
  0x3e   :  { %203 = vmatpush.msra.mxu0 %v170_v44  ;;  %323 = vmatpush.msra.mxu3 %v224_v59  ;;  %v161_v44 = vand.u32 127, %v160_v43 }
  0x3f   :  { %277 = vmatpush.msra.mxu1 %v222_v57  ;;  %300 = vmatpush.msra.mxu2 %v223_v58 }
  0x40   :  { %204 = vmatpush.msra.mxu0 %v169_v48  ;;  %324 = vmatpush.msra.mxu3 %v221_v62  ;;  %vm162_vm1 = vcmp.lt.s32.totalorder %v161_v44, 32 }
  0x41   :  { %205 = vmatmul.f32.vlgmr.msra.gmra.mxu0 %v167_v50  ;;  %278 = vmatpush.msra.mxu1 %v219_v60  ;;  %v1620_v47 = vsel %vm162_vm1, 1.0, %v1476_v46 }
  0x42   :  { %301 = vmatpush.msra.mxu2 %v220_v61  ;;  %325 = vmatpush.msra.mxu3 %v218_v1 }
  0x43   :  { %279 = vmatpush.msra.mxu1 %v216_v63  ;;  %1202 = vset.pattern.permute.xlu0 %v1477_v53 }
  0x44   :  { %302 = vmatpush.msra.mxu2 %v217_v0  ;;  %1201 = vset.pattern.permute.xlu2 %v1477_v53 }
  0x49   :  { %208 = vmatmul.f32.gmra.mxu0 %v168_v56  ;;  %v511_v56 = vld [vmem:[#allocation11 + $0xf8] sm:$0xff] }
  0x4a   :  { %541 = vmatpush.msrb.mxu3 %v511_v56 }
  0xbe   :  { %v206_v4 = vpop.f32.mrf.mxu0 }
  0xbf   :  { %v207_v5 = vadd.f32 %v1203_v2, %v206_v4  ;;  %v508_v4 = vld [vmem:[#allocation11 + $0xe0] sm:$0xff] }
  0xc1   :  { %v1595_v6 = vadd.f32 %v207_v5, %v165_v3  ;;  %v159_v3 = vld [vmem:[%s1736_s0 + $0x8] sm:$0xff] }
  0xc2   :  { %v509_v5 = vld [vmem:[#allocation11 + $0xe8] sm:$0xff] }
  0xc3   :  { %280 = vmatmul.f32.vlgmr.msra.gmra.mxu1 %v1595_v6  ;;  %303 = vmatmul.f32.vlgmr.msra.gmra.mxu2 %v1595_v6 }
  0xc4   :  { %326 = vmatmul.f32.vlgmr.msra.gmra.mxu3 %v1595_v6 }
  0xc5   :  { %542 = vmatpush.msrb.mxu3 %v509_v5 }
  0xc6   :  { %v209_v8 = vpop.f32.mrf.mxu0 }
  0xc7   :  { %v210_v9 = vadd.f32 %v1203_v2, %v209_v8  ;;  %v504_v8 = vld [vmem:[#allocation11 + $0xc0] sm:$0xff] }
  0xc9   :  { %v1603_v10 = vadd.f32 %v210_v9, %v166_v7  ;;  %v507_v7 = vld [vmem:[#allocation11 + $0xd8] sm:$0xff]  ;;  %v505_v9 = vld [vmem:[#allocation11 + $0xc8] sm:$0xff] }
  0xca   :  { %543 = vmatpush.msrb.mxu3 %v507_v7 }
  0xcb   :  { %283 = vmatmul.f32.gmra.mxu1 %v1603_v10  ;;  %306 = vmatmul.f32.gmra.mxu2 %v1603_v10 }
  0xcc   :  { %329 = vmatmul.f32.gmra.mxu3 %v1603_v10 }
  0xcd   :  { %544 = vmatpush.msrb.mxu3 %v505_v9 }
 0x140   :  { %v281_v15 = vpop.f32.mrf.mxu1 }
 0x146   :  { %v304_v11 = vpop.f32.mrf.mxu2 }
 0x147   :  { %v327_v12 = vpop.f32.mrf.mxu3 }
 0x148   :  { %v284_v16 = vpop.f32.mrf.mxu1 }
 0x14e   :  { %v307_v13 = vpop.f32.mrf.mxu2 }
 0x14f   :  { %v330_v14 = vpop.f32.mrf.mxu3  ;;  %347 = vmatpush.xpose.msrb.mxu2 %v307_v13  ;;  %v501_v13 = vld [vmem:[#allocation11 + $0xa8] sm:$0xff] }
 0x150   :  { %403 = vmatpush.msrb.mxu1 %v330_v14  ;;  %v498_v14 = vld [vmem:[#allocation11 + $0x90] sm:$0xff] }
 0x152   :  { %404 = vmatpush.msrb.mxu1 %v327_v12  ;;  %v500_v12 = vld [vmem:[#allocation11 + $0xa0] sm:$0xff] }
 0x153   :  { %348 = vmatpush.xpose.msrb.mxu2 %v304_v11  ;;  %v503_v11 = vld [vmem:[#allocation11 + $0xb8] sm:$0xff] }
 0x154   :  { %545 = vmatpush.msrb.mxu3 %v503_v11 }
 0x156   :  { %349 = vmatmul.f32.vlgmr.msrb.gmra.mxu2 %v281_v15  ;;  %546 = vmatpush.msrb.mxu3 %v501_v13  ;;  %v499_v15 = vld [vmem:[#allocation11 + $0x98] sm:$0xff] }
 0x157   :  { %518 = vmatpush.msra.mxu2 %v510_v55  ;;  %v1205_v55 = vld [vmem:[%s1744_s8] ss:$0 sm:$0xff] }
 0x158   :  { %547 = vmatpush.msrb.mxu3 %v499_v15 }
 0x159   :  { %519 = vmatpush.msra.mxu2 %v508_v4 }
 0x15e   :  { %352 = vmatmul.f32.gmra.mxu2 %v284_v16  ;;  %v496_v16 = vld [vmem:[#allocation11 + $0x80] sm:$0xff] }
 0x1d9   :  { %v350_v17 = vpop.f32.mrf.mxu2 }
 0x1da   :  { %v356_v19 = vmul.f32 0.17677669, %v350_v17  ;;  %v497_v17 = vld [vmem:[#allocation11 + $0x88] sm:$0xff] }
 0x1db   :  { %548 = vmatpush.msrb.mxu3 %v497_v17 }
 0x1dc   :  { %v358_v20 = vadd.f32 %v356_v19, %v1608_v18  ;;  %v494_v19 = vld [vmem:[#allocation11 + $0x70] sm:$0xff] }
 0x1de   :  { %v361_v21 = vsel %vm360_vm0, %v358_v20, -inf }
 0x1df   :  { %362 = vmax.xlane.f32.xlu0 %v361_v21  ;;  %v492_v21 = vld [vmem:[#allocation11 + $0x60] sm:$0xff] }
 0x1e1   :  { %v353_v22 = vpop.f32.mrf.mxu2 }
 0x1e2   :  { %v357_v24 = vmul.f32 0.17677669, %v353_v22  ;;  %v493_v22 = vld [vmem:[#allocation11 + $0x68] sm:$0xff] }
 0x1e4   :  { %v359_v25 = vadd.f32 %v357_v24, %v1612_v23  ;;  %v490_v24 = vld [vmem:[#allocation11 + $0x50] sm:$0xff] }
 0x1e6   :  { %v364_v26 = vsel %vm360_vm0, %v359_v25, -inf }
 0x1e7   :  { %365 = vmax.xlane.f32.xlu0 %v364_v26  ;;  %v488_v26 = vld [vmem:[#allocation11 + $0x40] sm:$0xff] }
 0x252   :  { %v363_v27 = vpop.xlane.xlu0 %362 }
 0x253   :  { %v367_v28 = vsub.f32 %v358_v20, %v363_v27  ;;  %v495_v20 = vld [vmem:[#allocation11 + $0x78] sm:$0xff]  ;;  %v489_v27 = vld [vmem:[#allocation11 + $0x48] sm:$0xff] }
 0x254   :  { %549 = vmatpush.msrb.mxu3 %v495_v20 }
 0x255   :  { %v369_v29 = vmul.f32 1.442695, %v367_v28  ;;  %v486_v28 = vld [vmem:[#allocation11 + $0x30] sm:$0xff] }
 0x256   :  { %550 = vmatpush.msrb.mxu3 %v493_v22 }
 0x257   :  { %1213 = vpow2.f32 %v369_v29  ;;  %v487_v29 = vld [vmem:[#allocation11 + $0x38] sm:$0xff] }
 0x25a   :  { %v366_v30 = vpop.xlane.xlu0 %365 }
 0x25b   :  { %v368_v31 = vsub.f32 %v359_v25, %v366_v30  ;;  %v491_v25 = vld [vmem:[#allocation11 + $0x58] sm:$0xff]  ;;  %v484_v30 = vld [vmem:[#allocation11 + $0x20] sm:$0xff] }
 0x25c   :  { %551 = vmatpush.msrb.mxu3 %v491_v25 }
 0x25d   :  { %v1214_v32 = vpop.eup %1213  ;;  %v371_v33 = vmul.f32 1.442695, %v368_v31  ;;  %v485_v31 = vld [vmem:[#allocation11 + $0x28] sm:$0xff] }
 0x25e   :  { %v373_v34 = vsel %vm360_vm0, %v1214_v32, 0.0  ;;  %552 = vmatpush.msrb.mxu3 %v489_v27 }
 0x25f   :  { %1215 = vpow2.f32 %v371_v33  ;;  %374 = vadd.xlane.f32.xlu1 %v373_v34  ;;  %v483_v33 = vld [vmem:[#allocation11 + $0x18] sm:$0xff]  ;;  %v480_v34 = vld [vmem:[#allocation11] sm:$0xff] }
 0x260   :  { %553 = vmatpush.msrb.mxu3 %v487_v29 }
 0x262   :  { %554 = vmatpush.msrb.mxu3 %v485_v31 }
 0x264   :  { %555 = vmatpush.msrb.mxu3 %v483_v33 }
 0x265   :  { %v1216_v35 = vpop.eup %1215 }
 0x266   :  { %v376_v36 = vsel %vm360_vm0, %v1216_v35, 0.0 }
 0x267   :  { %377 = vadd.xlane.f32.xlu1 %v376_v36 }
 0x2d2   :  { %v375_v37 = vpop.xlane.xlu1 %374 }
 0x2d3   :  { %1217 = vrcp.f32 %v375_v37 }
 0x2d9   :  { %v1218_v38 = vpop.eup %1217 }
 0x2da   :  { %v378_v39 = vpop.xlane.xlu1 %377  ;;  %v381_v40 = vmul.f32 %v1218_v38, %v1214_v32  ;;  %v482_v32 = vld [vmem:[#allocation11 + $0x10] sm:$0xff] }
 0x2db   :  { %1219 = vrcp.f32 %v378_v39 }
 0x2dc   :  { %1172 = vmatmul.msk.f32.vlgmr.msrb.gmra.mxu1 %vm360_vm0, %v381_v40 }
 0x2e1   :  { %v1220_v41 = vpop.eup %1219 }
 0x2e2   :  { %v382_v42 = vmul.f32 %v1220_v41, %v1216_v35  ;;  %v481_v35 = vld [vmem:[#allocation11 + $0x8] sm:$0xff] }
 0x2e3   :  { %556 = vmatpush.msrb.mxu3 %v481_v35 }
 0x2e4   :  { %1173 = vmatmul.msk.f32.gmra.mxu1 %vm360_vm0, %v382_v42 }
 0x359   :  { %v406_v45 = vpop.f32.mrf.mxu1 }
 0x35a   :  { %v407_v48 = vadd.f32 %v406_v45, %v1595_v6  ;;  %v506_v6 = vld [vmem:[#allocation11 + $0xd0] sm:$0xff] }
 0x35b   :  { %520 = vmatpush.msra.mxu2 %v506_v6  ;;  %v512_v6 = vld [vmem:[%s1746_s10] sm:$0x3] }
 0x35c   :  { %v414_v49 = vmul.f32 %v1620_v47, %v407_v48  ;;  %v515_v7 = vperm.slane %v512_v6, 1 }
 0x35d   :  { %521 = vmatpush.msra.mxu2 %v504_v8 }
 0x35e   :  { %416 = vadd.xlane.f32.xlu2 %v414_v49 }
 0x361   :  { %v409_v50 = vpop.f32.mrf.mxu1 }
 0x362   :  { %v410_v51 = vadd.f32 %v409_v50, %v1603_v10  ;;  %v502_v10 = vld [vmem:[#allocation11 + $0xb0] sm:$0xff] }
 0x363   :  { %522 = vmatpush.msra.mxu2 %v502_v10 }
 0x364   :  { %v415_v52 = vmul.f32 %v1620_v47, %v410_v51 }
 0x365   :  { %523 = vmatpush.msra.mxu2 %v500_v12 }
 0x366   :  { %418 = vadd.xlane.f32.xlu2 %v415_v52 }
 0x367   :  { %524 = vmatpush.msra.mxu2 %v498_v14 }
 0x369   :  { %525 = vmatpush.msra.mxu2 %v496_v16 }
 0x36b   :  { %526 = vmatpush.msra.mxu2 %v494_v19 }
 0x36d   :  { %527 = vmatpush.msra.mxu2 %v492_v21 }
 0x36f   :  { %528 = vmatpush.msra.mxu2 %v490_v24  ;;  %v514_v24 = vperm.slane %v512_v6, 0  ;;  %v702_v6 = vld [vmem:[#allocation10 + $0x2b8] sm:$0xff] }
 0x371   :  { %529 = vmatpush.msra.mxu2 %v488_v26 }
 0x373   :  { %530 = vmatpush.msra.mxu2 %v486_v28 }
 0x375   :  { %531 = vmatpush.msra.mxu2 %v484_v30 }
 0x377   :  { %532 = vmatpush.msra.mxu2 %v482_v32 }
 0x379   :  { %533 = vmatpush.msra.mxu2 %v480_v34 }
 0x37e   :  { %470 = vperm.xlu2 %1201, %v158_v54  }
 0x3d1   :  { %v417_v57 = vpop.xlane.xlu2 %416 }
 0x3d2   :  { %v420_v58 = vmul.f32 0.03125, %v417_v57 }
 0x3d4   :  { %v422_v59 = vsub.f32 %v407_v48, %v420_v58 }
 0x3d6   :  { %v1630_v60 = vmul.f32 %v1620_v47, %v422_v59 }
 0x3d8   :  { %v426_v61 = vmul.f32 %v1630_v60, %v1630_v60 }
 0x3d9   :  { %v419_v62 = vpop.xlane.xlu2 %418 }
 0x3da   :  { %v421_v63 = vmul.f32 0.03125, %v419_v62  ;;  %428 = vadd.xlane.f32.xlu0 %v426_v61 }
 0x3dc   :  { %v423_v0 = vsub.f32 %v410_v51, %v421_v63  ;;  %v1204_v51 = vld [vmem:[%s1743_s7] ss:$0 sm:$0xff] }
 0x3de   :  { %v1635_v1 = vmul.f32 %v1620_v47, %v423_v0 }
 0x3e0   :  { %v427_v2 = vmul.f32 %v1635_v1, %v1635_v1 }
 0x3e1   :  { %v1649_v59 = vpop.permute.xlu2 %470 }
 0x3e2   :  { %430 = vadd.xlane.f32.xlu1 %v427_v2 }
 0x3ee   :  { %475 = vperm.xlu0 %1202, %v159_v3  }
 0x44d   :  { %v429_v36 = vpop.xlane.xlu0 %428 }
 0x44e   :  { %v432_v37 = vmul.f32 0.03125, %v429_v36 }
 0x450   :  { %v434_v38 = vadd.f32 1e-05, %v432_v37 }
 0x452   :  { %1221 = vrsqrt.f32 %v434_v38  ;;  %vm442_vm3 = vweird.f32 %v434_v38 }
 0x455   :  { %v431_v39 = vpop.xlane.xlu1 %430 }
 0x456   :  { %v433_v40 = vmul.f32 0.03125, %v431_v39 }
 0x458   :  { %v1222_v41 = vpop.eup %1221  ;;  %v435_v42 = vadd.f32 1e-05, %v433_v40 }
 0x459   :  { %v437_v43 = vmul.f32 %v1222_v41, %v434_v38  ;;  %vm443_vm2 = vweird.f32 %v1222_v41 }
 0x45a   :  { %1223 = vrsqrt.f32 %v435_v42  ;;  %vm444_vm4 = vmor %vm442_vm3, %vm443_vm2  ;;  %vm452_vm6 = vweird.f32 %v435_v42 }
 0x45b   :  { %v438_v44 = vmul.f32 %v1222_v41, %v437_v43 }
 0x45d   :  { %v439_v45 = vmul.f32 0.5, %v438_v44 }
 0x45f   :  { %v440_v46 = vsub.f32 1.5, %v439_v45 }
 0x460   :  { %v1224_v48 = vpop.eup %1223  ;;  %v1653_v3 = vpop.permute.xlu0 %475 }
 0x461   :  { %v441_v49 = vmul.f32 %v1222_v41, %v440_v46  ;;  %v447_v50 = vmul.f32 %v1224_v48, %v435_v42  ;;  %vm453_vm5 = vweird.f32 %v1224_v48 }
 0x462   :  { %vm454_vm7 = vmor %vm452_vm6, %vm453_vm5 }
 0x463   :  { %v448_v52 = vmul.f32 %v1224_v48, %v447_v50  ;;  %v445_v53 = vsel %vm444_vm4, %v1222_v41, %v441_v49 }
 0x464   :  { %v456_v54 = vmul.f32 %v445_v53, %v1630_v60  ;;  %v710_v53 = vld [vmem:[#allocation10 + $0x2f8] sm:$0xff] }
 0x465   :  { %v449_v56 = vmul.f32 0.5, %v448_v52  ;;  %v709_v52 = vld [vmem:[#allocation10 + $0x2f0] sm:$0xff]  ;;  %757 = vmatpush.msrb.mxu2 %v710_v53 }
 0x466   :  { %v461_v57 = vmul.f32 %v1204_v51, %v456_v54  ;;  %734 = vmatpush.msra.mxu1 %v709_v52  ;;  %v705_v54 = vld [vmem:[#allocation10 + $0x2d0] sm:$0xff] }
 0x467   :  { %v450_v58 = vsub.f32 1.5, %v449_v56  ;;  %v707_v56 = vld [vmem:[#allocation10 + $0x2e0] sm:$0xff] }
 0x468   :  { %v466_v61 = vadd.f32 %v1205_v55, %v461_v57  ;;  %758 = vmatpush.msrb.mxu2 %v707_v56 }
 0x469   :  { %v451_v62 = vmul.f32 %v1224_v48, %v450_v58 }
 0x46a   :  { %v478_v63 = vmul.f32 %v1649_v59, %v466_v61 }
 0x46b   :  { %v455_v0 = vsel %vm454_vm7, %v1224_v48, %v451_v62 }
 0x46c   :  { %534 = vmatmul.f32.vlgmr.msra.gmra.mxu2 %v478_v63  ;;  %557 = vmatmul.f32.vlgmr.msrb.gmra.mxu3 %v478_v63  ;;  %v457_v60 = vmul.f32 %v455_v0, %v1635_v1 }
 0x46e   :  { %v462_v2 = vmul.f32 %v1204_v51, %v457_v60  ;;  %v708_v51 = vld [vmem:[#allocation10 + $0x2e8] sm:$0xff] }
 0x46f   :  { %711 = vmatpush.msrb.mxu0 %v708_v51 }
 0x470   :  { %v467_v4 = vadd.f32 %v1205_v55, %v462_v2  ;;  %v706_v55 = vld [vmem:[#allocation10 + $0x2d8] sm:$0xff] }
 0x471   :  { %712 = vmatpush.msrb.mxu0 %v705_v54  ;;  %735 = vmatpush.msra.mxu1 %v706_v55 }
 0x472   :  { %v479_v5 = vmul.f32 %v1653_v3, %v467_v4 }
 0x473   :  { %713 = vmatpush.msrb.mxu0 %v702_v6 }
 0x474   :  { %537 = vmatmul.f32.gmra.mxu2 %v479_v5  ;;  %560 = vmatmul.f32.gmra.mxu3 %v479_v5 }
 0x4ef   :  { %v558_v8 = vpop.f32.mrf.mxu3  ;;  %v535_v21 = vpop.f32.mrf.mxu2 }
 0x4f0   :  { %v559_v9 = vadd.f32 %v558_v8, %v515_v7  ;;  %v536_v30 = vadd.f32 %v535_v21, %v514_v24  ;;  %v704_v8 = vld [vmem:[#allocation10 + $0x2c8] sm:$0xff]  ;;  %v687_v21 = vld [vmem:[#allocation10 + $0x240] sm:$0xff] }
 0x4f1   :  { %759 = vmatpush.msrb.mxu2 %v704_v8 }
 0x4f2   :  { %v1174_v10 = vmul.f32 -1.442695, %v559_v9  ;;  %v699_v9 = vld [vmem:[#allocation10 + $0x2a0] sm:$0xff] }
 0x4f3   :  { %714 = vmatpush.msrb.mxu0 %v699_v9  ;;  %v1207_v9 = vld [vmem:[%s1748_s12] ss:$0 sm:$0xff] }
 0x4f4   :  { %1225 = vpow2.f32 %v1174_v10  ;;  %v700_v10 = vld [vmem:[#allocation10 + $0x2a8] sm:$0xff] }
 0x4f7   :  { %v561_v11 = vpop.f32.mrf.mxu3  ;;  %v538_v40 = vpop.f32.mrf.mxu2 }
 0x4f8   :  { %v562_v12 = vadd.f32 %v561_v11, %v515_v7  ;;  %v539_v44 = vadd.f32 %v538_v40, %v514_v24  ;;  %v703_v7 = vld [vmem:[#allocation10 + $0x2c0] sm:$0xff]  ;;  %v701_v11 = vld [vmem:[#allocation10 + $0x2b0] sm:$0xff] }
 0x4f9   :  { %736 = vmatpush.msra.mxu1 %v703_v7  ;;  %760 = vmatpush.msrb.mxu2 %v701_v11  ;;  %v689_v24 = vld [vmem:[#allocation10 + $0x250] sm:$0xff] }
 0x4fa   :  { %v1226_v1 = vpop.eup %1225  ;;  %v1175_v13 = vmul.f32 -1.442695, %v562_v12  ;;  %v696_v12 = vld [vmem:[#allocation10 + $0x288] sm:$0xff]  ;;  %v669_v40 = vld [vmem:[#allocation10 + $0x1b0] sm:$0xff] }
 0x4fb   :  { %v570_v14 = vadd.f32 1.0, %v1226_v1  ;;  %737 = vmatpush.msra.mxu1 %v700_v10  ;;  %v697_v1 = vld [vmem:[#allocation10 + $0x290] sm:$0xff]  ;;  %715 = vmatpush.msrb.mxu0 %v696_v12 }
 0x4fc   :  { %1227 = vpow2.f32 %v1175_v13  ;;  %v698_v13 = vld [vmem:[#allocation10 + $0x298] sm:$0xff] }
 0x4fd   :  { %1229 = vrcp.f32 %v570_v14  ;;  %v583_v22 = vand.u32 2147483648, %v570_v14  ;;  %v581_v26 = vand.u32 2147483647, %v570_v14  ;;  %vm577_vm9 = vweird.f32 %v570_v14  ;;  %738 = vmatpush.msra.mxu1 %v697_v1  ;;  %761 = vmatpush.msrb.mxu2 %v698_v13 }
 0x4ff   :  { %v584_v29 = vor.u32 1.1754944e-38, %v583_v22  ;;  %vm582_vm11 = vcmp.eq.f32.partialorder %v581_v26, 8.507059e+37  ;;  %v688_v22 = vld [vmem:[#allocation10 + $0x248] sm:$0xff]  ;;  %v685_v26 = vld [vmem:[#allocation10 + $0x230] sm:$0xff] }
 0x502   :  { %v1228_v15 = vpop.eup %1227 }
 0x503   :  { %v1230_v16 = vpop.eup %1229  ;;  %v571_v17 = vadd.f32 1.0, %v1228_v15  ;;  %v694_v15 = vld [vmem:[#allocation10 + $0x278] sm:$0xff] }
 0x504   :  { %v573_v19 = vmul.f32 %v1230_v16, %v570_v14  ;;  %vm578_vm8 = vweird.f32 %v1230_v16  ;;  %v693_v14 = vld [vmem:[#allocation10 + $0x270] sm:$0xff]  ;;  %739 = vmatpush.msra.mxu1 %v694_v15 }
 0x505   :  { %1231 = vrcp.f32 %v571_v17  ;;  %vm579_vm10 = vmor %vm577_vm9, %vm578_vm8  ;;  %v598_v36 = vand.u32 2147483648, %v571_v17  ;;  %v596_v39 = vand.u32 2147483647, %v571_v17  ;;  %vm592_vm13 = vweird.f32 %v571_v17  ;;  %716 = vmatpush.msrb.mxu0 %v693_v14 }
 0x506   :  { %v574_v20 = vsub.f32 1.0, %v573_v19  ;;  %v691_v19 = vld [vmem:[#allocation10 + $0x260] sm:$0xff] }
 0x507   :  { %v599_v43 = vor.u32 1.1754944e-38, %v598_v36  ;;  %vm597_vm15 = vcmp.eq.f32.partialorder %v596_v39, 8.507059e+37  ;;  %740 = vmatpush.msra.mxu1 %v691_v19  ;;  %v677_v36 = vld [vmem:[#allocation10 + $0x1f0] sm:$0xff]  ;;  %v674_v39 = vld [vmem:[#allocation10 + $0x1d8] sm:$0xff] }
 0x508   :  { %v575_v25 = vmul.f32 %v1230_v16, %v574_v20  ;;  %v692_v20 = vld [vmem:[#allocation10 + $0x268] sm:$0xff] }
 0x509   :  { %741 = vmatpush.msra.mxu1 %v688_v22 }
 0x50a   :  { %v576_v27 = vadd.f32 %v1230_v16, %v575_v25  ;;  %v684_v25 = vld [vmem:[#allocation10 + $0x228] sm:$0xff] }
 0x50b   :  { %v1232_v28 = vpop.eup %1231  ;;  %742 = vmatpush.msra.mxu1 %v685_v26 }
 0x50c   :  { %v588_v31 = vmul.f32 %v1232_v28, %v571_v17  ;;  %v580_v32 = vsel %vm579_vm10, %v1230_v16, %v576_v27  ;;  %vm593_vm12 = vweird.f32 %v1232_v28  ;;  %v695_v16 = vld [vmem:[#allocation10 + $0x280] sm:$0xff]  ;;  %v690_v17 = vld [vmem:[#allocation10 + $0x258] sm:$0xff] }
 0x50d   :  { %v585_v33 = vsel %vm582_vm11, %v584_v29, %v580_v32  ;;  %vm594_vm14 = vmor %vm592_vm13, %vm593_vm12  ;;  %762 = vmatpush.msrb.mxu2 %v695_v16  ;;  %717 = vmatpush.msrb.mxu0 %v690_v17  ;;  %v686_v27 = vld [vmem:[#allocation10 + $0x238] sm:$0xff]  ;;  %v679_v32 = vld [vmem:[#allocation10 + $0x200] sm:$0xff] }
 0x50e   :  { %v589_v34 = vsub.f32 1.0, %v588_v31  ;;  %v602_v35 = vmul.f32 %v585_v33, %v536_v30  ;;  %v682_v29 = vld [vmem:[#allocation10 + $0x218] sm:$0xff]  ;;  %v683_v30 = vld [vmem:[#allocation10 + $0x220] sm:$0xff]  ;;  %v680_v33 = vld [vmem:[#allocation10 + $0x208] sm:$0xff] }
 0x50f   :  { %763 = vmatpush.msrb.mxu2 %v692_v20  ;;  %718 = vmatpush.msrb.mxu0 %v687_v21  ;;  %v678_v31 = vld [vmem:[#allocation10 + $0x1f8] sm:$0xff] }
 0x510   :  { %v604_v37 = vadd.f32 %v602_v35, %v478_v63  ;;  %v590_v38 = vmul.f32 %v1232_v28, %v589_v34  ;;  %743 = vmatpush.msra.mxu1 %v682_v29  ;;  %v675_v34 = vld [vmem:[#allocation10 + $0x1e0] sm:$0xff]  ;;  %v676_v35 = vld [vmem:[#allocation10 + $0x1e8] sm:$0xff] }
 0x511   :  { %764 = vmatpush.msrb.mxu2 %v689_v24  ;;  %719 = vmatpush.msrb.mxu0 %v684_v25 }
 0x512   :  { %v608_v41 = vmul.f32 %v1620_v47, %v604_v37  ;;  %v591_v42 = vadd.f32 %v1232_v28, %v590_v38  ;;  %744 = vmatpush.msra.mxu1 %v679_v32  ;;  %v673_v38 = vld [vmem:[#allocation10 + $0x1d0] sm:$0xff] }
 0x513   :  { %765 = vmatpush.msrb.mxu2 %v686_v27 }
 0x514   :  { %610 = vadd.xlane.f32.xlu1 %v608_v41  ;;  %v595_v45 = vsel %vm594_vm14, %v1232_v28, %v591_v42  ;;  %v681_v28 = vld [vmem:[#allocation10 + $0x210] sm:$0xff]  ;;  %745 = vmatpush.msra.mxu1 %v676_v35  ;;  %v670_v41 = vld [vmem:[#allocation10 + $0x1b8] sm:$0xff]  ;;  %v671_v42 = vld [vmem:[#allocation10 + $0x1c0] sm:$0xff] }
 0x515   :  { %v600_v46 = vsel %vm597_vm15, %v599_v43, %v595_v45  ;;  %720 = vmatpush.msrb.mxu0 %v681_v28  ;;  %766 = vmatpush.msrb.mxu2 %v683_v30  ;;  %v666_v43 = vld [vmem:[#allocation10 + $0x198] sm:$0xff]  ;;  %v668_v45 = vld [vmem:[#allocation10 + $0x1a8] sm:$0xff] }
 0x516   :  { %v603_v48 = vmul.f32 %v600_v46, %v539_v44  ;;  %746 = vmatpush.msra.mxu1 %v673_v38  ;;  %v667_v44 = vld [vmem:[#allocation10 + $0x1a0] sm:$0xff] }
 0x517   :  { %721 = vmatpush.msrb.mxu0 %v678_v31  ;;  %767 = vmatpush.msrb.mxu2 %v680_v33  ;;  %v663_v46 = vld [vmem:[#allocation10 + $0x180] sm:$0xff] }
 0x518   :  { %v605_v49 = vadd.f32 %v603_v48, %v479_v5  ;;  %747 = vmatpush.msra.mxu1 %v670_v41  ;;  %v664_v48 = vld [vmem:[#allocation10 + $0x188] sm:$0xff] }
 0x519   :  { %722 = vmatpush.msrb.mxu0 %v675_v34  ;;  %768 = vmatpush.msrb.mxu2 %v677_v36 }
 0x51a   :  { %v609_v50 = vmul.f32 %v1620_v47, %v605_v49  ;;  %748 = vmatpush.msra.mxu1 %v667_v44 }
 0x51b   :  { %769 = vmatpush.msrb.mxu2 %v674_v39 }
 0x51c   :  { %612 = vadd.xlane.f32.xlu1 %v609_v50  ;;  %749 = vmatpush.msra.mxu1 %v664_v48 }
 0x51d   :  { %770 = vmatpush.msrb.mxu2 %v671_v42 }
 0x51f   :  { %771 = vmatpush.msrb.mxu2 %v668_v45 }
 0x587   :  { %v611_v57 = vpop.xlane.xlu1 %610 }
 0x588   :  { %v614_v58 = vmul.f32 0.03125, %v611_v57 }
 0x58a   :  { %v616_v61 = vsub.f32 %v604_v37, %v614_v58  ;;  %v672_v37 = vld [vmem:[#allocation10 + $0x1c8] sm:$0xff] }
 0x58b   :  { %723 = vmatpush.msrb.mxu0 %v672_v37 }
 0x58c   :  { %v1662_v62 = vmul.f32 %v1620_v47, %v616_v61 }
 0x58d   :  { %724 = vmatpush.msrb.mxu0 %v669_v40 }
 0x58e   :  { %v620_v63 = vmul.f32 %v1662_v62, %v1662_v62 }
 0x58f   :  { %v613_v0 = vpop.xlane.xlu1 %612  ;;  %725 = vmatpush.msrb.mxu0 %v666_v43 }
 0x590   :  { %v615_v60 = vmul.f32 0.03125, %v613_v0  ;;  %622 = vadd.xlane.f32.xlu1 %v620_v63 }
 0x591   :  { %726 = vmatpush.msrb.mxu0 %v663_v46 }
 0x592   :  { %v617_v2 = vsub.f32 %v605_v49, %v615_v60  ;;  %v665_v49 = vld [vmem:[#allocation10 + $0x190] sm:$0xff] }
 0x593   :  { %772 = vmatpush.msrb.mxu2 %v665_v49 }
 0x594   :  { %v1667_v4 = vmul.f32 %v1620_v47, %v617_v2 }
 0x596   :  { %v621_v5 = vmul.f32 %v1667_v4, %v1667_v4 }
 0x598   :  { %624 = vadd.xlane.f32.xlu2 %v621_v5  ;;  %v1206_v5 = vld [vmem:[%s1747_s11] ss:$0 sm:$0xff] }
 0x603   :  { %v623_v50 = vpop.xlane.xlu1 %622 }
 0x604   :  { %v626_v51 = vmul.f32 0.03125, %v623_v50 }
 0x606   :  { %v628_v52 = vadd.f32 1e-05, %v626_v51 }
 0x608   :  { %1233 = vrsqrt.f32 %v628_v52  ;;  %vm636_vm2 = vweird.f32 %v628_v52 }
 0x60b   :  { %v625_v53 = vpop.xlane.xlu2 %624 }
 0x60c   :  { %v627_v54 = vmul.f32 0.03125, %v625_v53  ;;  %v949_v53 = vld [vmem:[#allocation11 + $0x1f0] sm:$0xff] }
 0x60d   :  { %958 = vmatpush.msrb.mxu1 %v949_v53 }
 0x60e   :  { %v1234_v55 = vpop.eup %1233  ;;  %v629_v56 = vadd.f32 1e-05, %v627_v54  ;;  %v950_v54 = vld [vmem:[#allocation11 + $0x1f8] sm:$0xff] }
 0x60f   :  { %v631_v57 = vmul.f32 %v1234_v55, %v628_v52  ;;  %vm637_vm1 = vweird.f32 %v1234_v55 }
 0x610   :  { %1235 = vrsqrt.f32 %v629_v56  ;;  %vm638_vm3 = vmor %vm636_vm2, %vm637_vm1  ;;  %vm646_vm5 = vweird.f32 %v629_v56 }
 0x611   :  { %v632_v58 = vmul.f32 %v1234_v55, %v631_v57 }
 0x613   :  { %v633_v61 = vmul.f32 0.5, %v632_v58 }
 0x615   :  { %v634_v63 = vsub.f32 1.5, %v633_v61 }
 0x616   :  { %v1236_v0 = vpop.eup %1235 }
 0x617   :  { %v635_v60 = vmul.f32 %v1234_v55, %v634_v63  ;;  %v641_v2 = vmul.f32 %v1236_v0, %v629_v56  ;;  %vm647_vm4 = vweird.f32 %v1236_v0 }
 0x618   :  { %vm648_vm6 = vmor %vm646_vm5, %vm647_vm4 }
 0x619   :  { %v639_v6 = vsel %vm638_vm3, %v1234_v55, %v635_v60  ;;  %v642_v7 = vmul.f32 %v1236_v0, %v641_v2 }
 0x61a   :  { %v650_v8 = vmul.f32 %v639_v6, %v1662_v62  ;;  %v947_v6 = vld [vmem:[#allocation11 + $0x1e0] sm:$0xff] }
 0x61b   :  { %v643_v10 = vmul.f32 0.5, %v642_v7  ;;  %v948_v7 = vld [vmem:[#allocation11 + $0x1e8] sm:$0xff]  ;;  %959 = vmatpush.msrb.mxu1 %v947_v6  ;;  %v1180_v6 = vld [vmem:[%s1746_s10 + $0x2] sm:$0x3] }
 0x61c   :  { %v655_v11 = vmul.f32 %v1206_v5, %v650_v8  ;;  %v945_v8 = vld [vmem:[#allocation11 + $0x1d0] sm:$0xff] }
 0x61d   :  { %v644_v12 = vsub.f32 1.5, %v643_v10  ;;  %960 = vmatpush.msrb.mxu1 %v945_v8  ;;  %v943_v10 = vld [vmem:[#allocation11 + $0x1c0] sm:$0xff] }
 0x61e   :  { %v660_v1 = vadd.f32 %v1207_v9, %v655_v11  ;;  %v944_v11 = vld [vmem:[#allocation11 + $0x1c8] sm:$0xff] }
 0x61f   :  { %v645_v13 = vmul.f32 %v1236_v0, %v644_v12  ;;  %961 = vmatpush.msrb.mxu1 %v943_v10  ;;  %v941_v12 = vld [vmem:[#allocation11 + $0x1b0] sm:$0xff] }
 0x620   :  { %727 = vmatmul.f32.vlgmr.msrb.gmra.mxu0 %v660_v1  ;;  %750 = vmatmul.f32.vlgmr.msra.gmra.mxu1 %v660_v1 }
 0x621   :  { %v649_v14 = vsel %vm648_vm6, %v1236_v0, %v645_v13  ;;  %773 = vmatmul.f32.vlgmr.msrb.gmra.mxu2 %v660_v1  ;;  %962 = vmatpush.msrb.mxu1 %v941_v12  ;;  %v939_v13 = vld [vmem:[#allocation11 + $0x1a0] sm:$0xff] }
 0x622   :  { %v651_v15 = vmul.f32 %v649_v14, %v1667_v4  ;;  %v940_v14 = vld [vmem:[#allocation11 + $0x1a8] sm:$0xff] }
 0x623   :  { %963 = vmatpush.msrb.mxu1 %v939_v13 }
 0x624   :  { %v656_v16 = vmul.f32 %v1206_v5, %v651_v15  ;;  %v937_v15 = vld [vmem:[#allocation11 + $0x190] sm:$0xff] }
 0x625   :  { %964 = vmatpush.msrb.mxu1 %v937_v15 }
 0x626   :  { %v661_v62 = vadd.f32 %v1207_v9, %v656_v16  ;;  %v946_v9 = vld [vmem:[#allocation11 + $0x1d8] sm:$0xff] }
 0x627   :  { %v938_v16 = vld [vmem:[#allocation11 + $0x198] sm:$0xff] }
 0x628   :  { %730 = vmatmul.f32.gmra.mxu0 %v661_v62  ;;  %753 = vmatmul.f32.gmra.mxu1 %v661_v62 }
 0x629   :  { %776 = vmatmul.f32.gmra.mxu2 %v661_v62 }
 0x69d   :  { %v751_v17 = vpop.f32.mrf.mxu1  ;;  %v728_v21 = vpop.f32.mrf.mxu0 }
 0x6a4   :  { %v774_v19 = vpop.f32.mrf.mxu2 }
 0x6a5   :  { %v754_v20 = vpop.f32.mrf.mxu1  ;;  %v731_v24 = vpop.f32.mrf.mxu0 }
 0x6a6   :  { %794 = vmatpush.xpose.msra.mxu3 %v754_v20  ;;  %v934_v20 = vld [vmem:[#allocation11 + $0x178] sm:$0xff] }
 0x6aa   :  { %795 = vmatpush.xpose.msra.mxu3 %v751_v17  ;;  %v936_v17 = vld [vmem:[#allocation11 + $0x188] sm:$0xff] }
 0x6ac   :  { %v777_v22 = vpop.f32.mrf.mxu2 }
 0x6ad   :  { %849 = vmatpush.msra.mxu0 %v777_v22  ;;  %796 = vmatmul.f32.vlgmr.msra.gmra.mxu3 %v728_v21  ;;  %v931_v21 = vld [vmem:[#allocation11 + $0x160] sm:$0xff]  ;;  %v932_v22 = vld [vmem:[#allocation11 + $0x168] sm:$0xff] }
 0x6ae   :  { %981 = vmatpush.msrb.mxu3 %v950_v54 }
 0x6af   :  { %850 = vmatpush.msra.mxu0 %v774_v19  ;;  %v933_v19 = vld [vmem:[#allocation11 + $0x170] sm:$0xff] }
 0x6b0   :  { %982 = vmatpush.msrb.mxu3 %v948_v7  ;;  %v955_v7 = vperm.slane %v1180_v6, 1 }
 0x6b2   :  { %983 = vmatpush.msrb.mxu3 %v946_v9 }
 0x6b4   :  { %984 = vmatpush.msrb.mxu3 %v944_v11 }
 0x6b5   :  { %799 = vmatmul.f32.gmra.mxu3 %v731_v24  ;;  %v929_v24 = vld [vmem:[#allocation11 + $0x150] sm:$0xff] }
 0x730   :  { %v797_v25 = vpop.f32.mrf.mxu3 }
 0x731   :  { %v803_v26 = vmul.f32 0.17677669, %v797_v25  ;;  %v930_v25 = vld [vmem:[#allocation11 + $0x158] sm:$0xff] }
 0x733   :  { %v805_v4 = vadd.f32 %v803_v26, %v1608_v18  ;;  %v927_v26 = vld [vmem:[#allocation11 + $0x140] sm:$0xff] }
 0x735   :  { %v807_v27 = vsel %vm360_vm0, %v805_v4, -inf }
 0x736   :  { %808 = vmax.xlane.f32.xlu1 %v807_v27  ;;  %v925_v27 = vld [vmem:[#allocation11 + $0x130] sm:$0xff] }
 0x738   :  { %v800_v28 = vpop.f32.mrf.mxu3 }
 0x739   :  { %v804_v29 = vmul.f32 0.17677669, %v800_v28  ;;  %v926_v28 = vld [vmem:[#allocation11 + $0x138] sm:$0xff] }
 0x73b   :  { %v806_v30 = vadd.f32 %v804_v29, %v1612_v23  ;;  %v923_v29 = vld [vmem:[#allocation11 + $0x120] sm:$0xff] }
 0x73d   :  { %v810_v31 = vsel %vm360_vm0, %v806_v30, -inf }
 0x73e   :  { %811 = vmax.xlane.f32.xlu1 %v810_v31  ;;  %v921_v31 = vld [vmem:[#allocation11 + $0x110] sm:$0xff] }
 0x7a9   :  { %v809_v32 = vpop.xlane.xlu1 %808 }
 0x7aa   :  { %v813_v33 = vsub.f32 %v805_v4, %v809_v32  ;;  %v928_v4 = vld [vmem:[#allocation11 + $0x148] sm:$0xff]  ;;  %v922_v32 = vld [vmem:[#allocation11 + $0x118] sm:$0xff] }
 0x7ac   :  { %v815_v34 = vmul.f32 1.442695, %v813_v33  ;;  %v919_v33 = vld [vmem:[#allocation11 + $0x100] sm:$0xff] }
 0x7ae   :  { %1237 = vpow2.f32 %v815_v34  ;;  %v920_v34 = vld [vmem:[#allocation11 + $0x108] sm:$0xff] }
 0x7b1   :  { %v812_v35 = vpop.xlane.xlu1 %811 }
 0x7b2   :  { %v814_v36 = vsub.f32 %v806_v30, %v812_v35  ;;  %v924_v30 = vld [vmem:[#allocation11 + $0x128] sm:$0xff] }
 0x7b4   :  { %v1238_v37 = vpop.eup %1237  ;;  %v817_v38 = vmul.f32 1.442695, %v814_v36 }
 0x7b5   :  { %v819_v18 = vsel %vm360_vm0, %v1238_v37, 0.0 }
 0x7b6   :  { %1239 = vpow2.f32 %v817_v38  ;;  %820 = vadd.xlane.f32.xlu0 %v819_v18 }
 0x7bc   :  { %v1240_v39 = vpop.eup %1239 }
 0x7bd   :  { %v822_v40 = vsel %vm360_vm0, %v1240_v39, 0.0 }
 0x7be   :  { %823 = vadd.xlane.f32.xlu1 %v822_v40 }
 0x829   :  { %v821_v23 = vpop.xlane.xlu0 %820 }
 0x82a   :  { %1241 = vrcp.f32 %v821_v23 }
 0x830   :  { %v1242_v41 = vpop.eup %1241 }
 0x831   :  { %v827_v42 = vmul.f32 %v1242_v41, %v1238_v37  ;;  %v824_v43 = vpop.xlane.xlu1 %823 }
 0x832   :  { %1243 = vrcp.f32 %v824_v43 }
 0x833   :  { %1176 = vmatmul.msk.f32.vlgmr.msra.gmra.mxu0 %vm360_vm0, %v827_v42 }
 0x838   :  { %v1244_v44 = vpop.eup %1243 }
 0x839   :  { %v828_v45 = vmul.f32 %v1244_v44, %v1240_v39 }
 0x83b   :  { %1177 = vmatmul.msk.f32.gmra.mxu0 %vm360_vm0, %v828_v45 }
 0x8b0   :  { %v852_v46 = vpop.f32.mrf.mxu0 }
 0x8b1   :  { %v853_v48 = vadd.f32 %v852_v46, %v660_v1  ;;  %v942_v1 = vld [vmem:[#allocation11 + $0x1b8] sm:$0xff] }
 0x8b2   :  { %985 = vmatpush.msrb.mxu3 %v942_v1 }
 0x8b3   :  { %v862_v49 = vmul.f32 %v1620_v47, %v853_v48 }
 0x8b4   :  { %986 = vmatpush.msrb.mxu3 %v940_v14 }
 0x8b5   :  { %864 = vadd.xlane.f32.xlu1 %v862_v49 }
 0x8b6   :  { %987 = vmatpush.msrb.mxu3 %v938_v16 }
 0x8b8   :  { %v855_v50 = vpop.f32.mrf.mxu0  ;;  %988 = vmatpush.msrb.mxu3 %v936_v17 }
 0x8b9   :  { %v856_v51 = vadd.f32 %v855_v50, %v661_v62  ;;  %v935_v62 = vld [vmem:[#allocation11 + $0x180] sm:$0xff] }
 0x8ba   :  { %965 = vmatpush.msrb.mxu1 %v935_v62  ;;  %989 = vmatpush.msrb.mxu3 %v934_v20 }
 0x8bb   :  { %v863_v52 = vmul.f32 %v1620_v47, %v856_v51 }
 0x8bc   :  { %966 = vmatpush.msrb.mxu1 %v933_v19  ;;  %990 = vmatpush.msrb.mxu3 %v932_v22  ;;  %v954_v19 = vperm.slane %v1180_v6, 0  ;;  %v1108_v6 = vld [vmem:[#allocation13 + $0x20] sm:$0xff] }
 0x8bd   :  { %866 = vadd.xlane.f32.xlu1 %v863_v52  ;;  %v1209_v52 = vld [vmem:[%s1744_s8 + $0x1] ss:$0 sm:$0xff] }
 0x8be   :  { %967 = vmatpush.msrb.mxu1 %v931_v21  ;;  %991 = vmatpush.msrb.mxu3 %v930_v25 }
 0x8c0   :  { %968 = vmatpush.msrb.mxu1 %v929_v24  ;;  %992 = vmatpush.msrb.mxu3 %v928_v4 }
 0x8c2   :  { %969 = vmatpush.msrb.mxu1 %v927_v26  ;;  %993 = vmatpush.msrb.mxu3 %v926_v28 }
 0x8c4   :  { %970 = vmatpush.msrb.mxu1 %v925_v27  ;;  %994 = vmatpush.msrb.mxu3 %v924_v30 }
 0x8c6   :  { %971 = vmatpush.msrb.mxu1 %v923_v29  ;;  %995 = vmatpush.msrb.mxu3 %v922_v32 }
 0x8c8   :  { %972 = vmatpush.msrb.mxu1 %v921_v31  ;;  %996 = vmatpush.msrb.mxu3 %v920_v34 }
 0x8ca   :  { %973 = vmatpush.msrb.mxu1 %v919_v33 }
 0x928   :  { %v865_v55 = vpop.xlane.xlu1 %864 }
 0x929   :  { %v868_v56 = vmul.f32 0.03125, %v865_v55 }
 0x92b   :  { %v870_v57 = vsub.f32 %v853_v48, %v868_v56  ;;  %v1208_v48 = vld [vmem:[%s1743_s7 + $0x1] ss:$0 sm:$0xff] }
 0x92d   :  { %v1690_v58 = vmul.f32 %v1620_v47, %v870_v57 }
 0x92f   :  { %v874_v61 = vmul.f32 %v1690_v58, %v1690_v58 }
 0x930   :  { %v867_v63 = vpop.xlane.xlu1 %866 }
 0x931   :  { %v869_v0 = vmul.f32 0.03125, %v867_v63  ;;  %876 = vadd.xlane.f32.xlu2 %v874_v61 }
 0x933   :  { %v871_v60 = vsub.f32 %v856_v51, %v869_v0 }
 0x935   :  { %v1695_v2 = vmul.f32 %v1620_v47, %v871_v60 }
 0x937   :  { %v875_v5 = vmul.f32 %v1695_v2, %v1695_v2 }
 0x939   :  { %878 = vadd.xlane.f32.xlu1 %v875_v5 }
 0x9a4   :  { %v877_v35 = vpop.xlane.xlu2 %876 }
 0x9a5   :  { %v880_v36 = vmul.f32 0.03125, %v877_v35 }
 0x9a7   :  { %v882_v37 = vadd.f32 1e-05, %v880_v36 }
 0x9a9   :  { %1245 = vrsqrt.f32 %v882_v37  ;;  %vm890_vm7 = vweird.f32 %v882_v37 }
 0x9ac   :  { %v879_v38 = vpop.xlane.xlu1 %878 }
 0x9ad   :  { %v881_v18 = vmul.f32 0.03125, %v879_v38 }
 0x9af   :  { %v1246_v39 = vpop.eup %1245  ;;  %v883_v40 = vadd.f32 1e-05, %v881_v18 }
 0x9b0   :  { %v885_v23 = vmul.f32 %v1246_v39, %v882_v37  ;;  %vm891_vm0 = vweird.f32 %v1246_v39 }
 0x9b1   :  { %1247 = vrsqrt.f32 %v883_v40  ;;  %vm892_vm8 = vmor %vm890_vm7, %vm891_vm0  ;;  %vm900_vm10 = vweird.f32 %v883_v40 }
 0x9b2   :  { %v886_v41 = vmul.f32 %v1246_v39, %v885_v23 }
 0x9b4   :  { %v887_v42 = vmul.f32 0.5, %v886_v41 }
 0x9b6   :  { %v888_v43 = vsub.f32 1.5, %v887_v42 }
 0x9b7   :  { %v1248_v44 = vpop.eup %1247 }
 0x9b8   :  { %v889_v45 = vmul.f32 %v1246_v39, %v888_v43  ;;  %v895_v46 = vmul.f32 %v1248_v44, %v883_v40  ;;  %vm901_vm9 = vweird.f32 %v1248_v44  ;;  %v1119_v43 = vld [vmem:[#allocation13 + $0x78] sm:$0xff] }
 0x9b9   :  { %vm902_vm11 = vmor %vm900_vm10, %vm901_vm9  ;;  %1124 = vmatpush.msrb.mxu0 %v1119_v43 }
 0x9ba   :  { %v893_v49 = vsel %vm892_vm8, %v1246_v39, %v889_v45  ;;  %v896_v50 = vmul.f32 %v1248_v44, %v895_v46 }
 0x9bb   :  { %v904_v51 = vmul.f32 %v893_v49, %v1690_v58 }
 0x9bc   :  { %v897_v53 = vmul.f32 0.5, %v896_v50 }
 0x9bd   :  { %v909_v54 = vmul.f32 %v1208_v48, %v904_v51 }
 0x9be   :  { %v898_v55 = vsub.f32 1.5, %v897_v53 }
 0x9bf   :  { %v914_v56 = vadd.f32 %v1209_v52, %v909_v54 }
 0x9c0   :  { %v899_v57 = vmul.f32 %v1248_v44, %v898_v55 }
 0x9c1   :  { %v916_v61 = vmul.f32 %v914_v56, %v1649_v59  ;;  %v1117_v56 = vld [vmem:[#allocation13 + $0x68] sm:$0xff] }
 0x9c2   :  { %v903_v63 = vsel %vm902_vm11, %v1248_v44, %v899_v57  ;;  %v1118_v44 = vld [vmem:[#allocation13 + $0x70] sm:$0xff]  ;;  %v1116_v57 = vld [vmem:[#allocation13 + $0x60] sm:$0xff] }
 0x9c3   :  { %v905_v0 = vmul.f32 %v903_v63, %v1695_v2  ;;  %974 = vmatmul.f32.vlgmr.msrb.gmra.mxu1 %v916_v61  ;;  %997 = vmatmul.f32.vlgmr.msrb.gmra.mxu3 %v916_v61  ;;  %v1114_v63 = vld [vmem:[#allocation13 + $0x50] sm:$0xff] }
 0x9c4   :  { %1125 = vmatpush.msrb.mxu0 %v1118_v44 }
 0x9c5   :  { %v910_v58 = vmul.f32 %v1208_v48, %v905_v0  ;;  %v1113_v0 = vld [vmem:[#allocation13 + $0x48] sm:$0xff] }
 0x9c6   :  { %1126 = vmatpush.msrb.mxu0 %v1117_v56 }
 0x9c7   :  { %v915_v60 = vadd.f32 %v1209_v52, %v910_v58  ;;  %v1112_v58 = vld [vmem:[#allocation13 + $0x40] sm:$0xff] }
 0x9c8   :  { %1127 = vmatpush.msrb.mxu0 %v1116_v57 }
 0x9c9   :  { %v917_v5 = vmul.f32 %v915_v60, %v1653_v3  ;;  %v1111_v60 = vld [vmem:[#allocation13 + $0x38] sm:$0xff] }
 0x9cb   :  { %977 = vmatmul.f32.gmra.mxu1 %v917_v5  ;;  %1000 = vmatmul.f32.gmra.mxu3 %v917_v5 }
 0xa40   :  { %v975_v62 = vpop.f32.mrf.mxu1 }
 0xa41   :  { %v976_v26 = vadd.f32 %v975_v62, %v954_v19 }
 0xa46   :  { %v998_v8 = vpop.f32.mrf.mxu3 }
 0xa47   :  { %v999_v9 = vadd.f32 %v998_v8, %v955_v7  ;;  %v1106_v8 = vld [vmem:[#allocation13 + $0x10] sm:$0xff] }
 0xa48   :  { %v978_v35 = vpop.f32.mrf.mxu1 }
 0xa49   :  { %v1181_v10 = vmul.f32 -1.442695, %v999_v9  ;;  %v979_v18 = vadd.f32 %v978_v35, %v954_v19  ;;  %v1105_v9 = vld [vmem:[#allocation13 + $0x8] sm:$0xff]  ;;  %v1212_v35 = vld [vmem:[%s1750_s14] ss:$0 sm:$0xff] }
 0xa4b   :  { %1249 = vpow2.f32 %v1181_v10  ;;  %v1104_v10 = vld [vmem:[#allocation13] sm:$0xff] }
 0xa4e   :  { %v1001_v59 = vpop.f32.mrf.mxu3 }
 0xa4f   :  { %v1002_v11 = vadd.f32 %v1001_v59, %v955_v7  ;;  %v1107_v7 = vld [vmem:[#allocation13 + $0x18] sm:$0xff] }
 0xa51   :  { %v1250_v2 = vpop.eup %1249  ;;  %v1182_v12 = vmul.f32 -1.442695, %v1002_v11 }
 0xa52   :  { %v1010_v1 = vadd.f32 1.0, %v1250_v2 }
 0xa53   :  { %1251 = vpow2.f32 %v1182_v12 }
 0xa54   :  { %1253 = vrcp.f32 %v1010_v1  ;;  %v1023_v17 = vand.u32 2147483648, %v1010_v1  ;;  %v1021_v21 = vand.u32 2147483647, %v1010_v1  ;;  %vm1017_vm13 = vweird.f32 %v1010_v1 }
 0xa56   :  { %v1024_v25 = vor.u32 1.1754944e-38, %v1023_v17  ;;  %vm1022_vm15 = vcmp.eq.f32.partialorder %v1021_v21, 8.507059e+37  ;;  %v1210_v21 = vld [vmem:[%s1747_s11 + $0x1] ss:$0 sm:$0xff] }
 0xa59   :  { %v1252_v13 = vpop.eup %1251 }
 0xa5a   :  { %v1254_v3 = vpop.eup %1253  ;;  %v1011_v14 = vadd.f32 1.0, %v1252_v13 }
 0xa5b   :  { %v1013_v15 = vmul.f32 %v1254_v3, %v1010_v1  ;;  %vm1018_vm12 = vweird.f32 %v1254_v3 }
 0xa5c   :  { %1255 = vrcp.f32 %v1011_v14  ;;  %vm1019_vm14 = vmor %vm1017_vm13, %vm1018_vm12  ;;  %v1038_v31 = vand.u32 2147483648, %v1011_v14  ;;  %v1036_v34 = vand.u32 2147483647, %v1011_v14  ;;  %vm1032_vm2 = vweird.f32 %v1011_v14 }
 0xa5d   :  { %v1014_v16 = vsub.f32 1.0, %v1013_v15 }
 0xa5e   :  { %v1039_v38 = vor.u32 1.1754944e-38, %v1038_v31  ;;  %vm1037_vm4 = vcmp.eq.f32.partialorder %v1036_v34, 8.507059e+37 }
 0xa5f   :  { %v1015_v20 = vmul.f32 %v1254_v3, %v1014_v16 }
 0xa61   :  { %v1016_v22 = vadd.f32 %v1254_v3, %v1015_v20 }
 0xa62   :  { %v1256_v24 = vpop.eup %1255 }
 0xa63   :  { %v1028_v4 = vmul.f32 %v1256_v24, %v1011_v14  ;;  %v1020_v27 = vsel %vm1019_vm14, %v1254_v3, %v1016_v22  ;;  %vm1033_vm1 = vweird.f32 %v1256_v24 }
 0xa64   :  { %v1025_v28 = vsel %vm1022_vm15, %v1024_v25, %v1020_v27  ;;  %vm1034_vm3 = vmor %vm1032_vm2, %vm1033_vm1 }
 0xa65   :  { %v1029_v29 = vsub.f32 1.0, %v1028_v4  ;;  %v1042_v30 = vmul.f32 %v1025_v28, %v976_v26  ;;  %v1211_v26 = vld [vmem:[%s1748_s12 + $0x1] ss:$0 sm:$0xff]  ;;  %s1478_s12 = smov [#allocation14]  }
 0xa66   :  { %s1153_s1 = sshll.u32 %s1478_s12, 4  ;;  %s1154_s1 = int_to_ptr.vmem [resolvable:$true] %s1153_s1 }
 0xa67   :  { %v1044_v32 = vadd.f32 %v1042_v30, %v916_v61  ;;  %v1030_v33 = vmul.f32 %v1256_v24, %v1029_v29  ;;  %v1115_v61 = vld [vmem:[#allocation13 + $0x58] sm:$0xff] }
 0xa68   :  { %1128 = vmatpush.msrb.mxu0 %v1115_v61 }
 0xa69   :  { %v1050_v36 = vmul.f32 %v1620_v47, %v1044_v32  ;;  %v1031_v37 = vadd.f32 %v1256_v24, %v1030_v33 }
 0xa6a   :  { %1129 = vmatpush.msrb.mxu0 %v1114_v63 }
 0xa6b   :  { %1052 = vadd.xlane.f32.xlu2 %v1050_v36  ;;  %v1035_v39 = vsel %vm1034_vm3, %v1256_v24, %v1031_v37 }
 0xa6c   :  { %v1040_v40 = vsel %vm1037_vm4, %v1039_v38, %v1035_v39  ;;  %1130 = vmatpush.msrb.mxu0 %v1113_v0 }
 0xa6d   :  { %v1043_v23 = vmul.f32 %v1040_v40, %v979_v18 }
 0xa6e   :  { %1131 = vmatpush.msrb.mxu0 %v1112_v58 }
 0xa6f   :  { %v1045_v41 = vadd.f32 %v1043_v23, %v917_v5  ;;  %v1109_v5 = vld [vmem:[#allocation13 + $0x28] sm:$0xff] }
 0xa70   :  { %1132 = vmatpush.msrb.mxu0 %v1111_v60 }
 0xa71   :  { %v1051_v42 = vmul.f32 %v1620_v47, %v1045_v41 }
 0xa73   :  { %1054 = vadd.xlane.f32.xlu1 %v1051_v42 }
 0xade   :  { %v1053_v45 = vpop.xlane.xlu2 %1052 }
 0xadf   :  { %v1056_v46 = vmul.f32 0.03125, %v1053_v45 }
 0xae1   :  { %v1058_v48 = vsub.f32 %v1044_v32, %v1056_v46 }
 0xae3   :  { %v1060_v49 = vmul.f32 %v1620_v47, %v1058_v48 }
 0xae5   :  { %v1062_v50 = vmul.f32 %v1060_v49, %v1060_v49 }
 0xae6   :  { %v1055_v51 = vpop.xlane.xlu1 %1054 }
 0xae7   :  { %v1057_v52 = vmul.f32 0.03125, %v1055_v51  ;;  %1064 = vadd.xlane.f32.xlu2 %v1062_v50 }
 0xae9   :  { %v1059_v53 = vsub.f32 %v1045_v41, %v1057_v52 }
 0xaeb   :  { %v1716_v54 = vmul.f32 %v1620_v47, %v1059_v53  ;;  %v1110_v47 = vld [vmem:[#allocation13 + $0x30] sm:$0xff] }
 0xaec   :  { %1133 = vmatpush.msrb.mxu0 %v1110_v47 }
 0xaed   :  { %v1063_v55 = vmul.f32 %v1716_v54, %v1716_v54 }
 0xaee   :  { %1134 = vmatpush.msrb.mxu0 %v1109_v5 }
 0xaef   :  { %1066 = vadd.xlane.f32.xlu1 %v1063_v55 }
 0xaf0   :  { %1135 = vmatpush.msrb.mxu0 %v1108_v6 }
 0xaf2   :  { %1136 = vmatpush.msrb.mxu0 %v1107_v7 }
 0xaf4   :  { %1137 = vmatpush.msrb.mxu0 %v1106_v8 }
 0xaf6   :  { %1138 = vmatpush.msrb.mxu0 %v1105_v9 }
 0xaf8   :  { %1139 = vmatpush.msrb.mxu0 %v1104_v10 }
 0xb5a   :  { %v1065_v59 = vpop.xlane.xlu2 %1064 }
 0xb5b   :  { %v1068_v11 = vmul.f32 0.03125, %v1065_v59 }
 0xb5d   :  { %v1070_v2 = vadd.f32 1e-05, %v1068_v11 }
 0xb5f   :  { %1257 = vrsqrt.f32 %v1070_v2  ;;  %vm1078_vm6 = vweird.f32 %v1070_v2 }
 0xb62   :  { %v1067_v12 = vpop.xlane.xlu1 %1066 }
 0xb63   :  { %v1069_v1 = vmul.f32 0.03125, %v1067_v12 }
 0xb65   :  { %v1258_v13 = vpop.eup %1257  ;;  %v1071_v3 = vadd.f32 1e-05, %v1069_v1 }
 0xb66   :  { %v1073_v14 = vmul.f32 %v1258_v13, %v1070_v2  ;;  %vm1079_vm5 = vweird.f32 %v1258_v13 }
 0xb67   :  { %1259 = vrsqrt.f32 %v1071_v3  ;;  %vm1080_vm0 = vmor %vm1078_vm6, %vm1079_vm5  ;;  %vm1088_vm8 = vweird.f32 %v1071_v3 }
 0xb68   :  { %v1074_v15 = vmul.f32 %v1258_v13, %v1073_v14 }
 0xb6a   :  { %v1075_v16 = vmul.f32 0.5, %v1074_v15 }
 0xb6c   :  { %v1076_v62 = vsub.f32 1.5, %v1075_v16 }
 0xb6d   :  { %v1260_v17 = vpop.eup %1259 }
 0xb6e   :  { %v1077_v19 = vmul.f32 %v1258_v13, %v1076_v62  ;;  %v1083_v20 = vmul.f32 %v1260_v17, %v1071_v3  ;;  %vm1089_vm7 = vweird.f32 %v1260_v17 }
 0xb6f   :  { %vm1090_vm9 = vmor %vm1088_vm8, %vm1089_vm7 }
 0xb70   :  { %v1081_v22 = vsel %vm1080_vm0, %v1258_v13, %v1077_v19  ;;  %v1084_v24 = vmul.f32 %v1260_v17, %v1083_v20 }
 0xb71   :  { %v1092_v25 = vmul.f32 %v1081_v22, %v1060_v49 }
 0xb72   :  { %v1085_v4 = vmul.f32 0.5, %v1084_v24 }
 0xb73   :  { %v1097_v27 = vmul.f32 %v1210_v21, %v1092_v25 }
 0xb74   :  { %v1086_v28 = vsub.f32 1.5, %v1085_v4 }
 0xb75   :  { %v1102_v29 = vadd.f32 %v1211_v26, %v1097_v27 }
 0xb76   :  { %v1087_v30 = vmul.f32 %v1260_v17, %v1086_v28 }
 0xb77   :  { %1140 = vmatmul.f32.vlgmr.msrb.gmra.mxu0 %v1102_v29 }
 0xb78   :  { %v1091_v31 = vsel %vm1090_vm9, %v1260_v17, %v1087_v30 }
 0xb79   :  { %v1093_v32 = vmul.f32 %v1091_v31, %v1716_v54 }
 0xb7b   :  { %v1098_v33 = vmul.f32 %v1210_v21, %v1093_v32 }
 0xb7d   :  { %v1103_v34 = vadd.f32 %v1211_v26, %v1098_v33 }
 0xb7f   :  { %1143 = vmatmul.f32.gmra.mxu0 %v1103_v34 }
 0xbf4   :  { %v1141_v36 = vpop.f32.mrf.mxu0 }
 0xbf5   :  { %v1142_v37 = vadd.f32 %v1212_v35, %v1141_v36 }
 0xbf7   :  { %1147 = vst [vmem:[#allocation14] sm:$0xff] %v1142_v37 }
 0xbfc   :  { %v1144_v38 = vpop.f32.mrf.mxu0 }
 0xbfd   :  { %v1145_v18 = vadd.f32 %v1212_v35, %v1144_v38 }
 0xbff   :  { %1148 = vst [vmem:[#allocation14 + $0x8] sm:$0xff] %v1145_v18 }
 0xc00   :  { %1161 = dma.vmem_to_hbm [thread:$0]  %s1154_s1, 256, %s1156_s29, [#allocation4], %s1754_s25, %s1754_s25, %s1465_s27  }
 0xc01   :  { %1461 = dma.done.wait [#allocation4], 256  }
 0xc02   :  { %1462 = vsyncadd [#allocation4], 4294967040 }
 0xc03   :  { %1166 = vsyncpa [#allocation3], 1 }
 0xc04   :  { %1167 = vsyncpa [#allocation6], 1 }
 0xc05   :  { %1168 = vsyncpa [#allocation9], 1 }
 0xc06   :  { %1169 = vsyncpa [#allocation12], 1 }
 0xc07   :  { %1170 = vsyncpa [#allocation4], 1 }

// kernel: tpu_custom_call.1
= control target key start
LH: loop header
LB: loop body
LE: loop exit
PB: predicated region body
PF: predicated region fallthrough
CT: control target
= control target key end

     0   :  { %20 = vsyncpa [#allocation3], 0  ;;  %s1736_s0 = inlined_call_operand.vmem [shape: f32[1,16,1], index: 0, kind: input, shape index: {}]   ;;  %s1737_s1 = inlined_call_operand.vmem [shape: f32[1,16,128], index: 1, kind: input, shape index: {}]   ;;  %s1738_s2 = inlined_call_operand.hbm [shape: f32[1,16,128], index: 2, kind: input, shape index: {}]   ;;  %s1739_s3 = inlined_call_operand.hbm [shape: f32[1,16,16], index: 3, kind: input, shape index: {}]   ;;  %s1740_s4 = inlined_call_operand.hbm [shape: f32[128,128], index: 4, kind: input, shape index: {}]   ;;  %s1741_s5 = inlined_call_operand.hbm [shape: f32[1,128], index: 5, kind: input, shape index: {}]   ;;  %s1742_s6 = inlined_call_operand.hbm [shape: f32[2,128,384], index: 6, kind: input, shape index: {}]   ;;  %s1743_s7 = inlined_call_operand.vmem [shape: f32[2,1,128], index: 7, kind: input, shape index: {}]   ;;  %s1744_s8 = inlined_call_operand.vmem [shape: f32[2,1,128], index: 8, kind: input, shape index: {}]   ;;  %s1745_s9 = inlined_call_operand.hbm [shape: f32[2,128,256], index: 9, kind: input, shape index: {}]   ;;  %s1746_s10 = inlined_call_operand.vmem [shape: f32[2,1,256], index: 10, kind: input, shape index: {}]   ;;  %s1747_s11 = inlined_call_operand.vmem [shape: f32[2,1,128], index: 11, kind: input, shape index: {}]   ;;  %s1748_s12 = inlined_call_operand.vmem [shape: f32[2,1,128], index: 12, kind: input, shape index: {}]   ;;  %s1749_s13 = inlined_call_operand.hbm [shape: f32[128,128], index: 13, kind: input, shape index: {}]   ;;  %s1750_s14 = inlined_call_operand.vmem [shape: f32[1,128], index: 14, kind: input, shape index: {}]   ;;  %s1751_s15 = inlined_call_operand.hbm [shape: f32[1,16,128], index: 15, kind: output, shape index: {}]  }
   0x1   :  { %21 = vsyncpa [#allocation6], 0 }
   0x2   :  { %22 = vsyncpa [#allocation9], 0 }
   0x3   :  { %23 = vsyncpa [#allocation12], 0 }
   0x4   :  { %24 = vsyncpa [#allocation4], 0  ;;  %s46_s20 = sshll.u32 %s1739_s3, 4  ;;  %s1463_s21 = smov [#allocation5]   ;;  %s47_s20 = int_to_ptr.hbm [resolvable:$true] %s46_s20 }
   0x5   :  { %s48_s22 = sshll.u32 %s1463_s21, 4  ;;  %s73_s25 = sshll.u32 %s1741_s5, 4  ;;  %s49_s22 = int_to_ptr.vmem [resolvable:$true] %s48_s22  ;;  %s74_s25 = int_to_ptr.hbm [resolvable:$true] %s73_s25 }
   0x6   :  { %s1752_s26 = smov 128   ;;  %s1465_s27 = smov 8  }
   0x7   :  { %54 = dma.hbm_to_vmem [thread:$0]  %s47_s20, 256, %s49_s22, [#allocation6], %s1752_s26, %s1752_s26, %s1465_s27  }
   0x8   :  { %s1466_s28 = smov [#allocation8]   ;;  %s100_s3 = sshll.u32 %s1745_s9, 4  ;;  %s101_s3 = int_to_ptr.hbm [resolvable:$true] %s100_s3 }
   0x9   :  { %s75_s29 = sshll.u32 %s1466_s28, 4  ;;  %s1467_s17 = smov [#allocation11]   ;;  %s76_s29 = int_to_ptr.vmem [resolvable:$true] %s75_s29 }
   0xa   :  { %78 = dma.hbm_to_vmem [thread:$0]  %s74_s25, 16, %s76_s29, [#allocation9]  }
   0xb   :  { %s102_s18 = sshll.u32 %s1467_s17, 4  ;;  %s33_s21 = sshll.u32 %s1738_s2, 4  ;;  %s103_s18 = int_to_ptr.vmem [resolvable:$true] %s102_s18  ;;  %s34_s21 = int_to_ptr.hbm [resolvable:$true] %s33_s21 }
   0xc   :  { %s1468_s23 = smov 256   ;;  %s1469_s24 = smov 16  }
   0xd   :  { %108 = dma.hbm_to_vmem [thread:$0]  %s101_s3, 8192, %s103_s18, [#allocation12], %s1468_s23, %s1468_s23, %s1469_s24  }
   0xe   :  { %s1470_s20 = smov [#allocation2]   ;;  %s59_s9 = sshll.u32 %s1740_s4, 4  ;;  %s60_s9 = int_to_ptr.hbm [resolvable:$true] %s59_s9 }
   0xf   :  { %s35_s22 = sshll.u32 %s1470_s20, 4  ;;  %s1754_s25 = smov 128   ;;  %s36_s22 = int_to_ptr.vmem [resolvable:$true] %s35_s22 }
  0x10   :  { %41 = dma.hbm_to_vmem [thread:$0]  %s34_s21, 256, %s36_s22, [#allocation3], %s1754_s25, %s1754_s25, %s1465_s27  }
  0x11   :  { %s83_s2 = sshll.u32 %s1742_s6, 4  ;;  %s1471_s16 = smov [#allocation7]   ;;  %s84_s2 = int_to_ptr.hbm [resolvable:$true] %s83_s2 }
  0x12   :  { %s61_s17 = sshll.u32 %s1471_s16, 4  ;;  %s1472_s26 = smov [#allocation10]   ;;  %s62_s17 = int_to_ptr.vmem [resolvable:$true] %s61_s17 }
  0x13   :  { %67 = dma.hbm_to_vmem [thread:$0]  %s60_s9, 2048, %s62_s17, [#allocation6], %s1754_s25, %s1754_s25, %s1465_s27  }
  0x14   :  { %s85_s4 = sshll.u32 %s1472_s26, 4  ;;  %s1473_s3 = smov 384   ;;  %s86_s4 = int_to_ptr.vmem [resolvable:$true] %s85_s4 }
  0x15   :  { %s1474_s18 = smov 24   ;;  %s119_s21 = sshll.u32 %s1749_s13, 4  ;;  %s120_s21 = int_to_ptr.hbm [resolvable:$true] %s119_s21 }
  0x16   :  { %91 = dma.hbm_to_vmem [thread:$0]  %s84_s2, 12288, %s86_s4, [#allocation9], %s1473_s3, %s1473_s3, %s1474_s18  }
  0x17   :  { %s1475_s6 = smov [#allocation13]  }
  0x18   :  { %s121_s23 = sshll.u32 %s1475_s6, 4  ;;  %s122_s23 = int_to_ptr.vmem [resolvable:$true] %s121_s23 }
  0x19   :  { %127 = dma.hbm_to_vmem [thread:$0]  %s120_s21, 2048, %s122_s23, [#allocation12], %s1754_s25, %s1754_s25, %s1465_s27  }
  0x1a   :  { %1453 = dma.done.wait [#allocation3], 256  }
  0x1b   :  { %1454 = vsyncadd [#allocation3], 4294967040 }
  0x1c   :  { %1455 = dma.done.wait [#allocation6], 2304  }
  0x1d   :  { %1456 = vsyncadd [#allocation6], 4294964992 }
  0x1e   :  { %1457 = dma.done.wait [#allocation9], 12304  }
  0x1f   :  { %1458 = vsyncadd [#allocation9], 4294954992 }
  0x20   :  { %1459 = dma.done.wait [#allocation12], 10240  }
  0x21   :  { %1460 = vsyncadd [#allocation12], 4294957056  ;;  %v184_v0 = vld [vmem:[#allocation7 + $0x78] sm:$0xff]  ;;  %v183_v1 = vld [vmem:[#allocation7 + $0x70] sm:$0xff]  ;;  %vm360_vm0 = vcmask 130048   ;;  %s1155_s29 = sshll.u32 %s1751_s15, 4  ;;  %s1156_s29 = int_to_ptr.hbm [resolvable:$true] %s1155_s29 }
  0x22   :  { %189 = vmatpush.msra.mxu0 %v184_v0  ;;  %v182_v2 = vld [vmem:[#allocation7 + $0x68] sm:$0xff]  ;;  %v181_v3 = vld [vmem:[#allocation7 + $0x60] sm:$0xff]  ;;  %v180_v4 = vld [vmem:[#allocation7 + $0x58] sm:$0xff] }
  0x23   :  { %v179_v5 = vld [vmem:[#allocation7 + $0x50] sm:$0xff]  ;;  %v263_v8 = vld [vmem:[#allocation10 + $0x178] sm:$0xff]  ;;  %v260_v11 = vld [vmem:[#allocation10 + $0x160] sm:$0xff] }
  0x24   :  { %190 = vmatpush.msra.mxu0 %v183_v1  ;;  %v261_v6 = vld [vmem:[#allocation10 + $0x168] sm:$0xff]  ;;  %v262_v7 = vld [vmem:[#allocation10 + $0x170] sm:$0xff]  ;;  %v259_v10 = vld [vmem:[#allocation10 + $0x158] sm:$0xff]  ;;  %310 = vmatpush.msra.mxu3 %v263_v8 }
  0x25   :  { %264 = vmatpush.msra.mxu1 %v261_v6  ;;  %v258_v9 = vld [vmem:[#allocation10 + $0x150] sm:$0xff]  ;;  %v178_v12 = vld [vmem:[#allocation7 + $0x48] sm:$0xff]  ;;  %287 = vmatpush.msra.mxu2 %v262_v7  ;;  %v255_v13 = vld [vmem:[#allocation10 + $0x138] sm:$0xff] }
  0x26   :  { %191 = vmatpush.msra.mxu0 %v182_v2  ;;  %v256_v14 = vld [vmem:[#allocation10 + $0x140] sm:$0xff]  ;;  %v257_v15 = vld [vmem:[#allocation10 + $0x148] sm:$0xff]  ;;  %311 = vmatpush.msra.mxu3 %v260_v11  ;;  %v254_v19 = vld [vmem:[#allocation10 + $0x130] sm:$0xff] }
  0x27   :  { %265 = vmatpush.msra.mxu1 %v258_v9  ;;  %v177_v16 = vld [vmem:[#allocation7 + $0x40] sm:$0xff]  ;;  %288 = vmatpush.msra.mxu2 %v259_v10  ;;  %v253_v18 = vld [vmem:[#allocation10 + $0x128] sm:$0xff]  ;;  %v176_v20 = vld [vmem:[#allocation7 + $0x38] sm:$0xff] }
  0x28   :  { %192 = vmatpush.msra.mxu0 %v181_v3  ;;  %v252_v17 = vld [vmem:[#allocation10 + $0x120] sm:$0xff]  ;;  %312 = vmatpush.msra.mxu3 %v257_v15  ;;  %v249_v21 = vld [vmem:[#allocation10 + $0x108] sm:$0xff]  ;;  %v250_v22 = vld [vmem:[#allocation10 + $0x110] sm:$0xff] }
  0x29   :  { %266 = vmatpush.msra.mxu1 %v255_v13  ;;  %289 = vmatpush.msra.mxu2 %v256_v14  ;;  %v251_v23 = vld [vmem:[#allocation10 + $0x118] sm:$0xff]  ;;  %v175_v24 = vld [vmem:[#allocation7 + $0x30] sm:$0xff]  ;;  %v248_v27 = vld [vmem:[#allocation10 + $0x100] sm:$0xff] }
  0x2a   :  { %193 = vmatpush.msra.mxu0 %v180_v4  ;;  %313 = vmatpush.msra.mxu3 %v254_v19  ;;  %v246_v25 = vld [vmem:[#allocation10 + $0xf0] sm:$0xff]  ;;  %v247_v26 = vld [vmem:[#allocation10 + $0xf8] sm:$0xff]  ;;  %v174_v28 = vld [vmem:[#allocation7 + $0x28] sm:$0xff] }
  0x2b   :  { %267 = vmatpush.msra.mxu1 %v252_v17  ;;  %290 = vmatpush.msra.mxu2 %v253_v18  ;;  %v243_v29 = vld [vmem:[#allocation10 + $0xd8] sm:$0xff]  ;;  %v244_v31 = vld [vmem:[#allocation10 + $0xe0] sm:$0xff]  ;;  %v245_v32 = vld [vmem:[#allocation10 + $0xe8] sm:$0xff] }
  0x2c   :  { %194 = vmatpush.msra.mxu0 %v179_v5  ;;  %314 = vmatpush.msra.mxu3 %v251_v23  ;;  %v173_v30 = vld [vmem:[#allocation7 + $0x20] sm:$0xff]  ;;  %v172_v33 = vld [vmem:[#allocation7 + $0x18] sm:$0xff]  ;;  %v241_v35 = vld [vmem:[#allocation10 + $0xc8] sm:$0xff] }
  0x2d   :  { %268 = vmatpush.msra.mxu1 %v249_v21  ;;  %291 = vmatpush.msra.mxu2 %v250_v22  ;;  %v240_v34 = vld [vmem:[#allocation10 + $0xc0] sm:$0xff]  ;;  %v242_v36 = vld [vmem:[#allocation10 + $0xd0] sm:$0xff]  ;;  %v237_v37 = vld [vmem:[#allocation10 + $0xa8] sm:$0xff] }
  0x2e   :  { %195 = vmatpush.msra.mxu0 %v178_v12  ;;  %315 = vmatpush.msra.mxu3 %v248_v27  ;;  %v238_v38 = vld [vmem:[#allocation10 + $0xb0] sm:$0xff]  ;;  %v239_v39 = vld [vmem:[#allocation10 + $0xb8] sm:$0xff]  ;;  %v236_v43 = vld [vmem:[#allocation10 + $0xa0] sm:$0xff] }
  0x2f   :  { %269 = vmatpush.msra.mxu1 %v246_v25  ;;  %292 = vmatpush.msra.mxu2 %v247_v26  ;;  %v171_v40 = vld [vmem:[#allocation7 + $0x10] sm:$0xff]  ;;  %v235_v42 = vld [vmem:[#allocation10 + $0x98] sm:$0xff]  ;;  %v170_v44 = vld [vmem:[#allocation7 + $0x8] sm:$0xff] }
  0x30   :  { %196 = vmatpush.msra.mxu0 %v177_v16  ;;  %316 = vmatpush.msra.mxu3 %v245_v32  ;;  %v234_v41 = vld [vmem:[#allocation10 + $0x90] sm:$0xff]  ;;  %v231_v45 = vld [vmem:[#allocation10 + $0x78] sm:$0xff]  ;;  %v232_v46 = vld [vmem:[#allocation10 + $0x80] sm:$0xff] }
  0x31   :  { %270 = vmatpush.msra.mxu1 %v243_v29  ;;  %293 = vmatpush.msra.mxu2 %v244_v31  ;;  %v233_v47 = vld [vmem:[#allocation10 + $0x88] sm:$0xff]  ;;  %v169_v48 = vld [vmem:[#allocation7] sm:$0xff]  ;;  %v230_v52 = vld [vmem:[#allocation10 + $0x70] sm:$0xff] }
  0x32   :  { %197 = vmatpush.msra.mxu0 %v176_v20  ;;  %317 = vmatpush.msra.mxu3 %v242_v36  ;;  %v228_v49 = vld [vmem:[#allocation10 + $0x60] sm:$0xff]  ;;  %v229_v51 = vld [vmem:[#allocation10 + $0x68] sm:$0xff]  ;;  %v226_v54 = vld [vmem:[#allocation10 + $0x50] sm:$0xff] }
  0x33   :  { %271 = vmatpush.msra.mxu1 %v240_v34  ;;  %294 = vmatpush.msra.mxu2 %v241_v35  ;;  %v167_v50 = vld [vmem:[#allocation2] sm:$0xff]  ;;  %v225_v53 = vld [vmem:[#allocation10 + $0x48] sm:$0xff]  ;;  %v222_v57 = vld [vmem:[#allocation10 + $0x30] sm:$0xff] }
  0x34   :  { %198 = vmatpush.msra.mxu0 %v175_v24  ;;  %318 = vmatpush.msra.mxu3 %v239_v39  ;;  %v227_v55 = vld [vmem:[#allocation10 + $0x58] sm:$0xff]  ;;  %v168_v56 = vld [vmem:[#allocation2 + $0x8] sm:$0xff]  ;;  %v218_v1 = vld [vmem:[#allocation10 + $0x10] sm:$0xff] }
  0x35   :  { %272 = vmatpush.msra.mxu1 %v237_v37  ;;  %295 = vmatpush.msra.mxu2 %v238_v38  ;;  %v223_v58 = vld [vmem:[#allocation10 + $0x38] sm:$0xff]  ;;  %v224_v59 = vld [vmem:[#allocation10 + $0x40] sm:$0xff]  ;;  %v221_v62 = vld [vmem:[#allocation10 + $0x28] sm:$0xff] }
  0x36   :  { %199 = vmatpush.msra.mxu0 %v174_v28  ;;  %319 = vmatpush.msra.mxu3 %v236_v43  ;;  %v219_v60 = vld [vmem:[#allocation10 + $0x18] sm:$0xff]  ;;  %v220_v61 = vld [vmem:[#allocation10 + $0x20] sm:$0xff]  ;;  %v217_v0 = vld [vmem:[#allocation10 + $0x8] sm:$0xff]  ;;  %v160_v43 = vlaneseq }
  0x37   :  { %273 = vmatpush.msra.mxu1 %v234_v41  ;;  %296 = vmatpush.msra.mxu2 %v235_v42  ;;  %v216_v63 = vld [vmem:[#allocation10] sm:$0xff]  ;;  %v1203_v2 = vld [vmem:[#allocation8] ss:$0 sm:$0xff]  ;;  %v1608_v18 = vld [vmem:[#allocation5] sm:$0xff] }
  0x38   :  { %200 = vmatpush.msra.mxu0 %v173_v30  ;;  %320 = vmatpush.msra.mxu3 %v233_v47  ;;  %v165_v3 = vld [vmem:[%s1737_s1] sm:$0xff]  ;;  %v166_v7 = vld [vmem:[%s1737_s1 + $0x8] sm:$0xff]  ;;  %v1612_v23 = vld [vmem:[#allocation5 + $0x8] sm:$0xff] }
  0x39   :  { %274 = vmatpush.msra.mxu1 %v231_v45  ;;  %297 = vmatpush.msra.mxu2 %v232_v46  ;;  %v1476_v46 = vmov 0.0  }
  0x3a   :  { %201 = vmatpush.msra.mxu0 %v172_v33  ;;  %321 = vmatpush.msra.mxu3 %v230_v52 }
  0x3b   :  { %275 = vmatpush.msra.mxu1 %v228_v49  ;;  %298 = vmatpush.msra.mxu2 %v229_v51 }
  0x3c   :  { %202 = vmatpush.msra.mxu0 %v171_v40  ;;  %322 = vmatpush.msra.mxu3 %v227_v55  ;;  %v510_v55 = vld [vmem:[#allocation11 + $0xf0] sm:$0xff] }
  0x3d   :  { %276 = vmatpush.msra.mxu1 %v225_v53  ;;  %299 = vmatpush.msra.mxu2 %v226_v54  ;;  %v1477_v53 = vmov 0   ;;  %v158_v54 = vld [vmem:[%s1736_s0] sm:$0xff] }
  0x3e   :  { %203 = vmatpush.msra.mxu0 %v170_v44  ;;  %323 = vmatpush.msra.mxu3 %v224_v59  ;;  %v161_v44 = vand.u32 127, %v160_v43 }
  0x3f   :  { %277 = vmatpush.msra.mxu1 %v222_v57  ;;  %300 = vmatpush.msra.mxu2 %v223_v58 }
  0x40   :  { %204 = vmatpush.msra.mxu0 %v169_v48  ;;  %324 = vmatpush.msra.mxu3 %v221_v62  ;;  %vm162_vm1 = vcmp.lt.s32.totalorder %v161_v44, 32 }
  0x41   :  { %205 = vmatmul.f32.vlgmr.msra.gmra.mxu0 %v167_v50  ;;  %278 = vmatpush.msra.mxu1 %v219_v60  ;;  %v1620_v47 = vsel %vm162_vm1, 1.0, %v1476_v46 }
  0x42   :  { %301 = vmatpush.msra.mxu2 %v220_v61  ;;  %325 = vmatpush.msra.mxu3 %v218_v1 }
  0x43   :  { %279 = vmatpush.msra.mxu1 %v216_v63  ;;  %1202 = vset.pattern.permute.xlu0 %v1477_v53 }
  0x44   :  { %302 = vmatpush.msra.mxu2 %v217_v0  ;;  %1201 = vset.pattern.permute.xlu2 %v1477_v53 }
  0x49   :  { %208 = vmatmul.f32.gmra.mxu0 %v168_v56  ;;  %v511_v56 = vld [vmem:[#allocation11 + $0xf8] sm:$0xff] }
  0x4a   :  { %541 = vmatpush.msrb.mxu3 %v511_v56 }
  0xbe   :  { %v206_v4 = vpop.f32.mrf.mxu0 }
  0xbf   :  { %v207_v5 = vadd.f32 %v1203_v2, %v206_v4  ;;  %v508_v4 = vld [vmem:[#allocation11 + $0xe0] sm:$0xff] }
  0xc1   :  { %v1595_v6 = vadd.f32 %v207_v5, %v165_v3  ;;  %v159_v3 = vld [vmem:[%s1736_s0 + $0x8] sm:$0xff] }
  0xc2   :  { %v509_v5 = vld [vmem:[#allocation11 + $0xe8] sm:$0xff] }
  0xc3   :  { %280 = vmatmul.f32.vlgmr.msra.gmra.mxu1 %v1595_v6  ;;  %303 = vmatmul.f32.vlgmr.msra.gmra.mxu2 %v1595_v6 }
  0xc4   :  { %326 = vmatmul.f32.vlgmr.msra.gmra.mxu3 %v1595_v6 }
  0xc5   :  { %542 = vmatpush.msrb.mxu3 %v509_v5 }
  0xc6   :  { %v209_v8 = vpop.f32.mrf.mxu0 }
  0xc7   :  { %v210_v9 = vadd.f32 %v1203_v2, %v209_v8  ;;  %v504_v8 = vld [vmem:[#allocation11 + $0xc0] sm:$0xff] }
  0xc9   :  { %v1603_v10 = vadd.f32 %v210_v9, %v166_v7  ;;  %v507_v7 = vld [vmem:[#allocation11 + $0xd8] sm:$0xff]  ;;  %v505_v9 = vld [vmem:[#allocation11 + $0xc8] sm:$0xff] }
  0xca   :  { %543 = vmatpush.msrb.mxu3 %v507_v7 }
  0xcb   :  { %283 = vmatmul.f32.gmra.mxu1 %v1603_v10  ;;  %306 = vmatmul.f32.gmra.mxu2 %v1603_v10 }
  0xcc   :  { %329 = vmatmul.f32.gmra.mxu3 %v1603_v10 }
  0xcd   :  { %544 = vmatpush.msrb.mxu3 %v505_v9 }
 0x140   :  { %v281_v15 = vpop.f32.mrf.mxu1 }
 0x146   :  { %v304_v11 = vpop.f32.mrf.mxu2 }
 0x147   :  { %v327_v12 = vpop.f32.mrf.mxu3 }
 0x148   :  { %v284_v16 = vpop.f32.mrf.mxu1 }
 0x14e   :  { %v307_v13 = vpop.f32.mrf.mxu2 }
 0x14f   :  { %v330_v14 = vpop.f32.mrf.mxu3  ;;  %347 = vmatpush.xpose.msrb.mxu2 %v307_v13  ;;  %v501_v13 = vld [vmem:[#allocation11 + $0xa8] sm:$0xff] }
 0x150   :  { %403 = vmatpush.msrb.mxu1 %v330_v14  ;;  %v498_v14 = vld [vmem:[#allocation11 + $0x90] sm:$0xff] }
 0x152   :  { %404 = vmatpush.msrb.mxu1 %v327_v12  ;;  %v500_v12 = vld [vmem:[#allocation11 + $0xa0] sm:$0xff] }
 0x153   :  { %348 = vmatpush.xpose.msrb.mxu2 %v304_v11  ;;  %v503_v11 = vld [vmem:[#allocation11 + $0xb8] sm:$0xff] }
 0x154   :  { %545 = vmatpush.msrb.mxu3 %v503_v11 }
 0x156   :  { %349 = vmatmul.f32.vlgmr.msrb.gmra.mxu2 %v281_v15  ;;  %546 = vmatpush.msrb.mxu3 %v501_v13  ;;  %v499_v15 = vld [vmem:[#allocation11 + $0x98] sm:$0xff] }
 0x157   :  { %518 = vmatpush.msra.mxu2 %v510_v55  ;;  %v1205_v55 = vld [vmem:[%s1744_s8] ss:$0 sm:$0xff] }
 0x158   :  { %547 = vmatpush.msrb.mxu3 %v499_v15 }
 0x159   :  { %519 = vmatpush.msra.mxu2 %v508_v4 }
 0x15e   :  { %352 = vmatmul.f32.gmra.mxu2 %v284_v16  ;;  %v496_v16 = vld [vmem:[#allocation11 + $0x80] sm:$0xff] }
 0x1d9   :  { %v350_v17 = vpop.f32.mrf.mxu2 }
 0x1da   :  { %v356_v19 = vmul.f32 0.17677669, %v350_v17  ;;  %v497_v17 = vld [vmem:[#allocation11 + $0x88] sm:$0xff] }
 0x1db   :  { %548 = vmatpush.msrb.mxu3 %v497_v17 }
 0x1dc   :  { %v358_v20 = vadd.f32 %v356_v19, %v1608_v18  ;;  %v494_v19 = vld [vmem:[#allocation11 + $0x70] sm:$0xff] }
 0x1de   :  { %v361_v21 = vsel %vm360_vm0, %v358_v20, -inf }
 0x1df   :  { %362 = vmax.xlane.f32.xlu0 %v361_v21  ;;  %v492_v21 = vld [vmem:[#allocation11 + $0x60] sm:$0xff] }
 0x1e1   :  { %v353_v22 = vpop.f32.mrf.mxu2 }
 0x1e2   :  { %v357_v24 = vmul.f32 0.17677669, %v353_v22  ;;  %v493_v22 = vld [vmem:[#allocation11 + $0x68] sm:$0xff] }
 0x1e4   :  { %v359_v25 = vadd.f32 %v357_v24, %v1612_v23  ;;  %v490_v24 = vld [vmem:[#allocation11 + $0x50] sm:$0xff] }
 0x1e6   :  { %v364_v26 = vsel %vm360_vm0, %v359_v25, -inf }
 0x1e7   :  { %365 = vmax.xlane.f32.xlu0 %v364_v26  ;;  %v488_v26 = vld [vmem:[#allocation11 + $0x40] sm:$0xff] }
 0x252   :  { %v363_v27 = vpop.xlane.xlu0 %362 }
 0x253   :  { %v367_v28 = vsub.f32 %v358_v20, %v363_v27  ;;  %v495_v20 = vld [vmem:[#allocation11 + $0x78] sm:$0xff]  ;;  %v489_v27 = vld [vmem:[#allocation11 + $0x48] sm:$0xff] }
 0x254   :  { %549 = vmatpush.msrb.mxu3 %v495_v20 }
 0x255   :  { %v369_v29 = vmul.f32 1.442695, %v367_v28  ;;  %v486_v28 = vld [vmem:[#allocation11 + $0x30] sm:$0xff] }
 0x256   :  { %550 = vmatpush.msrb.mxu3 %v493_v22 }
 0x257   :  { %1213 = vpow2.f32 %v369_v29  ;;  %v487_v29 = vld [vmem:[#allocation11 + $0x38] sm:$0xff] }
 0x25a   :  { %v366_v30 = vpop.xlane.xlu0 %365 }
 0x25b   :  { %v368_v31 = vsub.f32 %v359_v25, %v366_v30  ;;  %v491_v25 = vld [vmem:[#allocation11 + $0x58] sm:$0xff]  ;;  %v484_v30 = vld [vmem:[#allocation11 + $0x20] sm:$0xff] }
 0x25c   :  { %551 = vmatpush.msrb.mxu3 %v491_v25 }
 0x25d   :  { %v1214_v32 = vpop.eup %1213  ;;  %v371_v33 = vmul.f32 1.442695, %v368_v31  ;;  %v485_v31 = vld [vmem:[#allocation11 + $0x28] sm:$0xff] }
 0x25e   :  { %v373_v34 = vsel %vm360_vm0, %v1214_v32, 0.0  ;;  %552 = vmatpush.msrb.mxu3 %v489_v27 }
 0x25f   :  { %1215 = vpow2.f32 %v371_v33  ;;  %374 = vadd.xlane.f32.xlu1 %v373_v34  ;;  %v483_v33 = vld [vmem:[#allocation11 + $0x18] sm:$0xff]  ;;  %v480_v34 = vld [vmem:[#allocation11] sm:$0xff] }
 0x260   :  { %553 = vmatpush.msrb.mxu3 %v487_v29 }
 0x262   :  { %554 = vmatpush.msrb.mxu3 %v485_v31 }
 0x264   :  { %555 = vmatpush.msrb.mxu3 %v483_v33 }
 0x265   :  { %v1216_v35 = vpop.eup %1215 }
 0x266   :  { %v376_v36 = vsel %vm360_vm0, %v1216_v35, 0.0 }
 0x267   :  { %377 = vadd.xlane.f32.xlu1 %v376_v36 }
 0x2d2   :  { %v375_v37 = vpop.xlane.xlu1 %374 }
 0x2d3   :  { %1217 = vrcp.f32 %v375_v37 }
 0x2d9   :  { %v1218_v38 = vpop.eup %1217 }
 0x2da   :  { %v378_v39 = vpop.xlane.xlu1 %377  ;;  %v381_v40 = vmul.f32 %v1218_v38, %v1214_v32  ;;  %v482_v32 = vld [vmem:[#allocation11 + $0x10] sm:$0xff] }
 0x2db   :  { %1219 = vrcp.f32 %v378_v39 }
 0x2dc   :  { %1172 = vmatmul.msk.f32.vlgmr.msrb.gmra.mxu1 %vm360_vm0, %v381_v40 }
 0x2e1   :  { %v1220_v41 = vpop.eup %1219 }
 0x2e2   :  { %v382_v42 = vmul.f32 %v1220_v41, %v1216_v35  ;;  %v481_v35 = vld [vmem:[#allocation11 + $0x8] sm:$0xff] }
 0x2e3   :  { %556 = vmatpush.msrb.mxu3 %v481_v35 }
 0x2e4   :  { %1173 = vmatmul.msk.f32.gmra.mxu1 %vm360_vm0, %v382_v42 }
 0x359   :  { %v406_v45 = vpop.f32.mrf.mxu1 }
 0x35a   :  { %v407_v48 = vadd.f32 %v406_v45, %v1595_v6  ;;  %v506_v6 = vld [vmem:[#allocation11 + $0xd0] sm:$0xff] }
 0x35b   :  { %520 = vmatpush.msra.mxu2 %v506_v6  ;;  %v512_v6 = vld [vmem:[%s1746_s10] sm:$0x3] }
 0x35c   :  { %v414_v49 = vmul.f32 %v1620_v47, %v407_v48  ;;  %v515_v7 = vperm.slane %v512_v6, 1 }
 0x35d   :  { %521 = vmatpush.msra.mxu2 %v504_v8 }
 0x35e   :  { %416 = vadd.xlane.f32.xlu2 %v414_v49 }
 0x361   :  { %v409_v50 = vpop.f32.mrf.mxu1 }
 0x362   :  { %v410_v51 = vadd.f32 %v409_v50, %v1603_v10  ;;  %v502_v10 = vld [vmem:[#allocation11 + $0xb0] sm:$0xff] }
 0x363   :  { %522 = vmatpush.msra.mxu2 %v502_v10 }
 0x364   :  { %v415_v52 = vmul.f32 %v1620_v47, %v410_v51 }
 0x365   :  { %523 = vmatpush.msra.mxu2 %v500_v12 }
 0x366   :  { %418 = vadd.xlane.f32.xlu2 %v415_v52 }
 0x367   :  { %524 = vmatpush.msra.mxu2 %v498_v14 }
 0x369   :  { %525 = vmatpush.msra.mxu2 %v496_v16 }
 0x36b   :  { %526 = vmatpush.msra.mxu2 %v494_v19 }
 0x36d   :  { %527 = vmatpush.msra.mxu2 %v492_v21 }
 0x36f   :  { %528 = vmatpush.msra.mxu2 %v490_v24  ;;  %v514_v24 = vperm.slane %v512_v6, 0  ;;  %v702_v6 = vld [vmem:[#allocation10 + $0x2b8] sm:$0xff] }
 0x371   :  { %529 = vmatpush.msra.mxu2 %v488_v26 }
 0x373   :  { %530 = vmatpush.msra.mxu2 %v486_v28 }
 0x375   :  { %531 = vmatpush.msra.mxu2 %v484_v30 }
 0x377   :  { %532 = vmatpush.msra.mxu2 %v482_v32 }
 0x379   :  { %533 = vmatpush.msra.mxu2 %v480_v34 }
 0x37e   :  { %470 = vperm.xlu2 %1201, %v158_v54  }
 0x3d1   :  { %v417_v57 = vpop.xlane.xlu2 %416 }
 0x3d2   :  { %v420_v58 = vmul.f32 0.03125, %v417_v57 }
 0x3d4   :  { %v422_v59 = vsub.f32 %v407_v48, %v420_v58 }
 0x3d6   :  { %v1630_v60 = vmul.f32 %v1620_v47, %v422_v59 }
 0x3d8   :  { %v426_v61 = vmul.f32 %v1630_v60, %v1630_v60 }
 0x3d9   :  { %v419_v62 = vpop.xlane.xlu2 %418 }
 0x3da   :  { %v421_v63 = vmul.f32 0.03125, %v419_v62  ;;  %428 = vadd.xlane.f32.xlu0 %v426_v61 }
 0x3dc   :  { %v423_v0 = vsub.f32 %v410_v51, %v421_v63  ;;  %v1204_v51 = vld [vmem:[%s1743_s7] ss:$0 sm:$0xff] }
 0x3de   :  { %v1635_v1 = vmul.f32 %v1620_v47, %v423_v0 }
 0x3e0   :  { %v427_v2 = vmul.f32 %v1635_v1, %v1635_v1 }
 0x3e1   :  { %v1649_v59 = vpop.permute.xlu2 %470 }
 0x3e2   :  { %430 = vadd.xlane.f32.xlu1 %v427_v2 }
 0x3ee   :  { %475 = vperm.xlu0 %1202, %v159_v3  }
 0x44d   :  { %v429_v36 = vpop.xlane.xlu0 %428 }
 0x44e   :  { %v432_v37 = vmul.f32 0.03125, %v429_v36 }
 0x450   :  { %v434_v38 = vadd.f32 1e-05, %v432_v37 }
 0x452   :  { %1221 = vrsqrt.f32 %v434_v38  ;;  %vm442_vm3 = vweird.f32 %v434_v38 }
 0x455   :  { %v431_v39 = vpop.xlane.xlu1 %430 }
 0x456   :  { %v433_v40 = vmul.f32 0.03125, %v431_v39 }
 0x458   :  { %v1222_v41 = vpop.eup %1221  ;;  %v435_v42 = vadd.f32 1e-05, %v433_v40 }
 0x459   :  { %v437_v43 = vmul.f32 %v1222_v41, %v434_v38  ;;  %vm443_vm2 = vweird.f32 %v1222_v41 }
 0x45a   :  { %1223 = vrsqrt.f32 %v435_v42  ;;  %vm444_vm4 = vmor %vm442_vm3, %vm443_vm2  ;;  %vm452_vm6 = vweird.f32 %v435_v42 }
 0x45b   :  { %v438_v44 = vmul.f32 %v1222_v41, %v437_v43 }
 0x45d   :  { %v439_v45 = vmul.f32 0.5, %v438_v44 }
 0x45f   :  { %v440_v46 = vsub.f32 1.5, %v439_v45 }
 0x460   :  { %v1224_v48 = vpop.eup %1223  ;;  %v1653_v3 = vpop.permute.xlu0 %475 }
 0x461   :  { %v441_v49 = vmul.f32 %v1222_v41, %v440_v46  ;;  %v447_v50 = vmul.f32 %v1224_v48, %v435_v42  ;;  %vm453_vm5 = vweird.f32 %v1224_v48 }
 0x462   :  { %vm454_vm7 = vmor %vm452_vm6, %vm453_vm5 }
 0x463   :  { %v448_v52 = vmul.f32 %v1224_v48, %v447_v50  ;;  %v445_v53 = vsel %vm444_vm4, %v1222_v41, %v441_v49 }
 0x464   :  { %v456_v54 = vmul.f32 %v445_v53, %v1630_v60  ;;  %v710_v53 = vld [vmem:[#allocation10 + $0x2f8] sm:$0xff] }
 0x465   :  { %v449_v56 = vmul.f32 0.5, %v448_v52  ;;  %v709_v52 = vld [vmem:[#allocation10 + $0x2f0] sm:$0xff]  ;;  %757 = vmatpush.msrb.mxu2 %v710_v53 }
 0x466   :  { %v461_v57 = vmul.f32 %v1204_v51, %v456_v54  ;;  %734 = vmatpush.msra.mxu1 %v709_v52  ;;  %v705_v54 = vld [vmem:[#allocation10 + $0x2d0] sm:$0xff] }
 0x467   :  { %v450_v58 = vsub.f32 1.5, %v449_v56  ;;  %v707_v56 = vld [vmem:[#allocation10 + $0x2e0] sm:$0xff] }
 0x468   :  { %v466_v61 = vadd.f32 %v1205_v55, %v461_v57  ;;  %758 = vmatpush.msrb.mxu2 %v707_v56 }
 0x469   :  { %v451_v62 = vmul.f32 %v1224_v48, %v450_v58 }
 0x46a   :  { %v478_v63 = vmul.f32 %v1649_v59, %v466_v61 }
 0x46b   :  { %v455_v0 = vsel %vm454_vm7, %v1224_v48, %v451_v62 }
 0x46c   :  { %534 = vmatmul.f32.vlgmr.msra.gmra.mxu2 %v478_v63  ;;  %557 = vmatmul.f32.vlgmr.msrb.gmra.mxu3 %v478_v63  ;;  %v457_v60 = vmul.f32 %v455_v0, %v1635_v1 }
 0x46e   :  { %v462_v2 = vmul.f32 %v1204_v51, %v457_v60  ;;  %v708_v51 = vld [vmem:[#allocation10 + $0x2e8] sm:$0xff] }
 0x46f   :  { %711 = vmatpush.msrb.mxu0 %v708_v51 }
 0x470   :  { %v467_v4 = vadd.f32 %v1205_v55, %v462_v2  ;;  %v706_v55 = vld [vmem:[#allocation10 + $0x2d8] sm:$0xff] }
 0x471   :  { %712 = vmatpush.msrb.mxu0 %v705_v54  ;;  %735 = vmatpush.msra.mxu1 %v706_v55 }
 0x472   :  { %v479_v5 = vmul.f32 %v1653_v3, %v467_v4 }
 0x473   :  { %713 = vmatpush.msrb.mxu0 %v702_v6 }
 0x474   :  { %537 = vmatmul.f32.gmra.mxu2 %v479_v5  ;;  %560 = vmatmul.f32.gmra.mxu3 %v479_v5 }
 0x4ef   :  { %v558_v8 = vpop.f32.mrf.mxu3  ;;  %v535_v21 = vpop.f32.mrf.mxu2 }
 0x4f0   :  { %v559_v9 = vadd.f32 %v558_v8, %v515_v7  ;;  %v536_v30 = vadd.f32 %v535_v21, %v514_v24  ;;  %v704_v8 = vld [vmem:[#allocation10 + $0x2c8] sm:$0xff]  ;;  %v687_v21 = vld [vmem:[#allocation10 + $0x240] sm:$0xff] }
 0x4f1   :  { %759 = vmatpush.msrb.mxu2 %v704_v8 }
 0x4f2   :  { %v1174_v10 = vmul.f32 -1.442695, %v559_v9  ;;  %v699_v9 = vld [vmem:[#allocation10 + $0x2a0] sm:$0xff] }
 0x4f3   :  { %714 = vmatpush.msrb.mxu0 %v699_v9  ;;  %v1207_v9 = vld [vmem:[%s1748_s12] ss:$0 sm:$0xff] }
 0x4f4   :  { %1225 = vpow2.f32 %v1174_v10  ;;  %v700_v10 = vld [vmem:[#allocation10 + $0x2a8] sm:$0xff] }
 0x4f7   :  { %v561_v11 = vpop.f32.mrf.mxu3  ;;  %v538_v40 = vpop.f32.mrf.mxu2 }
 0x4f8   :  { %v562_v12 = vadd.f32 %v561_v11, %v515_v7  ;;  %v539_v44 = vadd.f32 %v538_v40, %v514_v24  ;;  %v703_v7 = vld [vmem:[#allocation10 + $0x2c0] sm:$0xff]  ;;  %v701_v11 = vld [vmem:[#allocation10 + $0x2b0] sm:$0xff] }
 0x4f9   :  { %736 = vmatpush.msra.mxu1 %v703_v7  ;;  %760 = vmatpush.msrb.mxu2 %v701_v11  ;;  %v689_v24 = vld [vmem:[#allocation10 + $0x250] sm:$0xff] }
 0x4fa   :  { %v1226_v1 = vpop.eup %1225  ;;  %v1175_v13 = vmul.f32 -1.442695, %v562_v12  ;;  %v696_v12 = vld [vmem:[#allocation10 + $0x288] sm:$0xff]  ;;  %v669_v40 = vld [vmem:[#allocation10 + $0x1b0] sm:$0xff] }
 0x4fb   :  { %v570_v14 = vadd.f32 1.0, %v1226_v1  ;;  %737 = vmatpush.msra.mxu1 %v700_v10  ;;  %v697_v1 = vld [vmem:[#allocation10 + $0x290] sm:$0xff]  ;;  %715 = vmatpush.msrb.mxu0 %v696_v12 }
 0x4fc   :  { %1227 = vpow2.f32 %v1175_v13  ;;  %v698_v13 = vld [vmem:[#allocation10 + $0x298] sm:$0xff] }
 0x4fd   :  { %1229 = vrcp.f32 %v570_v14  ;;  %v583_v22 = vand.u32 2147483648, %v570_v14  ;;  %v581_v26 = vand.u32 2147483647, %v570_v14  ;;  %vm577_vm9 = vweird.f32 %v570_v14  ;;  %738 = vmatpush.msra.mxu1 %v697_v1  ;;  %761 = vmatpush.msrb.mxu2 %v698_v13 }
 0x4ff   :  { %v584_v29 = vor.u32 1.1754944e-38, %v583_v22  ;;  %vm582_vm11 = vcmp.eq.f32.partialorder %v581_v26, 8.507059e+37  ;;  %v688_v22 = vld [vmem:[#allocation10 + $0x248] sm:$0xff]  ;;  %v685_v26 = vld [vmem:[#allocation10 + $0x230] sm:$0xff] }
 0x502   :  { %v1228_v15 = vpop.eup %1227 }
 0x503   :  { %v1230_v16 = vpop.eup %1229  ;;  %v571_v17 = vadd.f32 1.0, %v1228_v15  ;;  %v694_v15 = vld [vmem:[#allocation10 + $0x278] sm:$0xff] }
 0x504   :  { %v573_v19 = vmul.f32 %v1230_v16, %v570_v14  ;;  %vm578_vm8 = vweird.f32 %v1230_v16  ;;  %v693_v14 = vld [vmem:[#allocation10 + $0x270] sm:$0xff]  ;;  %739 = vmatpush.msra.mxu1 %v694_v15 }
 0x505   :  { %1231 = vrcp.f32 %v571_v17  ;;  %vm579_vm10 = vmor %vm577_vm9, %vm578_vm8  ;;  %v598_v36 = vand.u32 2147483648, %v571_v17  ;;  %v596_v39 = vand.u32 2147483647, %v571_v17  ;;  %vm592_vm13 = vweird.f32 %v571_v17  ;;  %716 = vmatpush.msrb.mxu0 %v693_v14 }
 0x506   :  { %v574_v20 = vsub.f32 1.0, %v573_v19  ;;  %v691_v19 = vld [vmem:[#allocation10 + $0x260] sm:$0xff] }
 0x507   :  { %v599_v43 = vor.u32 1.1754944e-38, %v598_v36  ;;  %vm597_vm15 = vcmp.eq.f32.partialorder %v596_v39, 8.507059e+37  ;;  %740 = vmatpush.msra.mxu1 %v691_v19  ;;  %v677_v36 = vld [vmem:[#allocation10 + $0x1f0] sm:$0xff]  ;;  %v674_v39 = vld [vmem:[#allocation10 + $0x1d8] sm:$0xff] }
 0x508   :  { %v575_v25 = vmul.f32 %v1230_v16, %v574_v20  ;;  %v692_v20 = vld [vmem:[#allocation10 + $0x268] sm:$0xff] }
 0x509   :  { %741 = vmatpush.msra.mxu1 %v688_v22 }
 0x50a   :  { %v576_v27 = vadd.f32 %v1230_v16, %v575_v25  ;;  %v684_v25 = vld [vmem:[#allocation10 + $0x228] sm:$0xff] }
 0x50b   :  { %v1232_v28 = vpop.eup %1231  ;;  %742 = vmatpush.msra.mxu1 %v685_v26 }
 0x50c   :  { %v588_v31 = vmul.f32 %v1232_v28, %v571_v17  ;;  %v580_v32 = vsel %vm579_vm10, %v1230_v16, %v576_v27  ;;  %vm593_vm12 = vweird.f32 %v1232_v28  ;;  %v695_v16 = vld [vmem:[#allocation10 + $0x280] sm:$0xff]  ;;  %v690_v17 = vld [vmem:[#allocation10 + $0x258] sm:$0xff] }
 0x50d   :  { %v585_v33 = vsel %vm582_vm11, %v584_v29, %v580_v32  ;;  %vm594_vm14 = vmor %vm592_vm13, %vm593_vm12  ;;  %762 = vmatpush.msrb.mxu2 %v695_v16  ;;  %717 = vmatpush.msrb.mxu0 %v690_v17  ;;  %v686_v27 = vld [vmem:[#allocation10 + $0x238] sm:$0xff]  ;;  %v679_v32 = vld [vmem:[#allocation10 + $0x200] sm:$0xff] }
 0x50e   :  { %v589_v34 = vsub.f32 1.0, %v588_v31  ;;  %v602_v35 = vmul.f32 %v585_v33, %v536_v30  ;;  %v682_v29 = vld [vmem:[#allocation10 + $0x218] sm:$0xff]  ;;  %v683_v30 = vld [vmem:[#allocation10 + $0x220] sm:$0xff]  ;;  %v680_v33 = vld [vmem:[#allocation10 + $0x208] sm:$0xff] }
 0x50f   :  { %763 = vmatpush.msrb.mxu2 %v692_v20  ;;  %718 = vmatpush.msrb.mxu0 %v687_v21  ;;  %v678_v31 = vld [vmem:[#allocation10 + $0x1f8] sm:$0xff] }
 0x510   :  { %v604_v37 = vadd.f32 %v602_v35, %v478_v63  ;;  %v590_v38 = vmul.f32 %v1232_v28, %v589_v34  ;;  %743 = vmatpush.msra.mxu1 %v682_v29  ;;  %v675_v34 = vld [vmem:[#allocation10 + $0x1e0] sm:$0xff]  ;;  %v676_v35 = vld [vmem:[#allocation10 + $0x1e8] sm:$0xff] }
 0x511   :  { %764 = vmatpush.msrb.mxu2 %v689_v24  ;;  %719 = vmatpush.msrb.mxu0 %v684_v25 }
 0x512   :  { %v608_v41 = vmul.f32 %v1620_v47, %v604_v37  ;;  %v591_v42 = vadd.f32 %v1232_v28, %v590_v38  ;;  %744 = vmatpush.msra.mxu1 %v679_v32  ;;  %v673_v38 = vld [vmem:[#allocation10 + $0x1d0] sm:$0xff] }
 0x513   :  { %765 = vmatpush.msrb.mxu2 %v686_v27 }
 0x514   :  { %610 = vadd.xlane.f32.xlu1 %v608_v41  ;;  %v595_v45 = vsel %vm594_vm14, %v1232_v28, %v591_v42  ;;  %v681_v28 = vld [vmem:[#allocation10 + $0x210] sm:$0xff]  ;;  %745 = vmatpush.msra.mxu1 %v676_v35  ;;  %v670_v41 = vld [vmem:[#allocation10 + $0x1b8] sm:$0xff]  ;;  %v671_v42 = vld [vmem:[#allocation10 + $0x1c0] sm:$0xff] }
 0x515   :  { %v600_v46 = vsel %vm597_vm15, %v599_v43, %v595_v45  ;;  %720 = vmatpush.msrb.mxu0 %v681_v28  ;;  %766 = vmatpush.msrb.mxu2 %v683_v30  ;;  %v666_v43 = vld [vmem:[#allocation10 + $0x198] sm:$0xff]  ;;  %v668_v45 = vld [vmem:[#allocation10 + $0x1a8] sm:$0xff] }
 0x516   :  { %v603_v48 = vmul.f32 %v600_v46, %v539_v44  ;;  %746 = vmatpush.msra.mxu1 %v673_v38  ;;  %v667_v44 = vld [vmem:[#allocation10 + $0x1a0] sm:$0xff] }
 0x517   :  { %721 = vmatpush.msrb.mxu0 %v678_v31  ;;  %767 = vmatpush.msrb.mxu2 %v680_v33  ;;  %v663_v46 = vld [vmem:[#allocation10 + $0x180] sm:$0xff] }
 0x518   :  { %v605_v49 = vadd.f32 %v603_v48, %v479_v5  ;;  %747 = vmatpush.msra.mxu1 %v670_v41  ;;  %v664_v48 = vld [vmem:[#allocation10 + $0x188] sm:$0xff] }
 0x519   :  { %722 = vmatpush.msrb.mxu0 %v675_v34  ;;  %768 = vmatpush.msrb.mxu2 %v677_v36 }
 0x51a   :  { %v609_v50 = vmul.f32 %v1620_v47, %v605_v49  ;;  %748 = vmatpush.msra.mxu1 %v667_v44 }
 0x51b   :  { %769 = vmatpush.msrb.mxu2 %v674_v39 }
 0x51c   :  { %612 = vadd.xlane.f32.xlu1 %v609_v50  ;;  %749 = vmatpush.msra.mxu1 %v664_v48 }
 0x51d   :  { %770 = vmatpush.msrb.mxu2 %v671_v42 }
 0x51f   :  { %771 = vmatpush.msrb.mxu2 %v668_v45 }
 0x587   :  { %v611_v57 = vpop.xlane.xlu1 %610 }
 0x588   :  { %v614_v58 = vmul.f32 0.03125, %v611_v57 }
 0x58a   :  { %v616_v61 = vsub.f32 %v604_v37, %v614_v58  ;;  %v672_v37 = vld [vmem:[#allocation10 + $0x1c8] sm:$0xff] }
 0x58b   :  { %723 = vmatpush.msrb.mxu0 %v672_v37 }
 0x58c   :  { %v1662_v62 = vmul.f32 %v1620_v47, %v616_v61 }
 0x58d   :  { %724 = vmatpush.msrb.mxu0 %v669_v40 }
 0x58e   :  { %v620_v63 = vmul.f32 %v1662_v62, %v1662_v62 }
 0x58f   :  { %v613_v0 = vpop.xlane.xlu1 %612  ;;  %725 = vmatpush.msrb.mxu0 %v666_v43 }
 0x590   :  { %v615_v60 = vmul.f32 0.03125, %v613_v0  ;;  %622 = vadd.xlane.f32.xlu1 %v620_v63 }
 0x591   :  { %726 = vmatpush.msrb.mxu0 %v663_v46 }
 0x592   :  { %v617_v2 = vsub.f32 %v605_v49, %v615_v60  ;;  %v665_v49 = vld [vmem:[#allocation10 + $0x190] sm:$0xff] }
 0x593   :  { %772 = vmatpush.msrb.mxu2 %v665_v49 }
 0x594   :  { %v1667_v4 = vmul.f32 %v1620_v47, %v617_v2 }
 0x596   :  { %v621_v5 = vmul.f32 %v1667_v4, %v1667_v4 }
 0x598   :  { %624 = vadd.xlane.f32.xlu2 %v621_v5  ;;  %v1206_v5 = vld [vmem:[%s1747_s11] ss:$0 sm:$0xff] }
 0x603   :  { %v623_v50 = vpop.xlane.xlu1 %622 }
 0x604   :  { %v626_v51 = vmul.f32 0.03125, %v623_v50 }
 0x606   :  { %v628_v52 = vadd.f32 1e-05, %v626_v51 }
 0x608   :  { %1233 = vrsqrt.f32 %v628_v52  ;;  %vm636_vm2 = vweird.f32 %v628_v52 }
 0x60b   :  { %v625_v53 = vpop.xlane.xlu2 %624 }
 0x60c   :  { %v627_v54 = vmul.f32 0.03125, %v625_v53  ;;  %v949_v53 = vld [vmem:[#allocation11 + $0x1f0] sm:$0xff] }
 0x60d   :  { %958 = vmatpush.msrb.mxu1 %v949_v53 }
 0x60e   :  { %v1234_v55 = vpop.eup %1233  ;;  %v629_v56 = vadd.f32 1e-05, %v627_v54  ;;  %v950_v54 = vld [vmem:[#allocation11 + $0x1f8] sm:$0xff] }
 0x60f   :  { %v631_v57 = vmul.f32 %v1234_v55, %v628_v52  ;;  %vm637_vm1 = vweird.f32 %v1234_v55 }
 0x610   :  { %1235 = vrsqrt.f32 %v629_v56  ;;  %vm638_vm3 = vmor %vm636_vm2, %vm637_vm1  ;;  %vm646_vm5 = vweird.f32 %v629_v56 }
 0x611   :  { %v632_v58 = vmul.f32 %v1234_v55, %v631_v57 }
 0x613   :  { %v633_v61 = vmul.f32 0.5, %v632_v58 }
 0x615   :  { %v634_v63 = vsub.f32 1.5, %v633_v61 }
 0x616   :  { %v1236_v0 = vpop.eup %1235 }
 0x617   :  { %v635_v60 = vmul.f32 %v1234_v55, %v634_v63  ;;  %v641_v2 = vmul.f32 %v1236_v0, %v629_v56  ;;  %vm647_vm4 = vweird.f32 %v1236_v0 }
 0x618   :  { %vm648_vm6 = vmor %vm646_vm5, %vm647_vm4 }
 0x619   :  { %v639_v6 = vsel %vm638_vm3, %v1234_v55, %v635_v60  ;;  %v642_v7 = vmul.f32 %v1236_v0, %v641_v2 }
 0x61a   :  { %v650_v8 = vmul.f32 %v639_v6, %v1662_v62  ;;  %v947_v6 = vld [vmem:[#allocation11 + $0x1e0] sm:$0xff] }
 0x61b   :  { %v643_v10 = vmul.f32 0.5, %v642_v7  ;;  %v948_v7 = vld [vmem:[#allocation11 + $0x1e8] sm:$0xff]  ;;  %959 = vmatpush.msrb.mxu1 %v947_v6  ;;  %v1180_v6 = vld [vmem:[%s1746_s10 + $0x2] sm:$0x3] }
 0x61c   :  { %v655_v11 = vmul.f32 %v1206_v5, %v650_v8  ;;  %v945_v8 = vld [vmem:[#allocation11 + $0x1d0] sm:$0xff] }
 0x61d   :  { %v644_v12 = vsub.f32 1.5, %v643_v10  ;;  %960 = vmatpush.msrb.mxu1 %v945_v8  ;;  %v943_v10 = vld [vmem:[#allocation11 + $0x1c0] sm:$0xff] }
 0x61e   :  { %v660_v1 = vadd.f32 %v1207_v9, %v655_v11  ;;  %v944_v11 = vld [vmem:[#allocation11 + $0x1c8] sm:$0xff] }
 0x61f   :  { %v645_v13 = vmul.f32 %v1236_v0, %v644_v12  ;;  %961 = vmatpush.msrb.mxu1 %v943_v10  ;;  %v941_v12 = vld [vmem:[#allocation11 + $0x1b0] sm:$0xff] }
 0x620   :  { %727 = vmatmul.f32.vlgmr.msrb.gmra.mxu0 %v660_v1  ;;  %750 = vmatmul.f32.vlgmr.msra.gmra.mxu1 %v660_v1 }
 0x621   :  { %v649_v14 = vsel %vm648_vm6, %v1236_v0, %v645_v13  ;;  %773 = vmatmul.f32.vlgmr.msrb.gmra.mxu2 %v660_v1  ;;  %962 = vmatpush.msrb.mxu1 %v941_v12  ;;  %v939_v13 = vld [vmem:[#allocation11 + $0x1a0] sm:$0xff] }
 0x622   :  { %v651_v15 = vmul.f32 %v649_v14, %v1667_v4  ;;  %v940_v14 = vld [vmem:[#allocation11 + $0x1a8] sm:$0xff] }
 0x623   :  { %963 = vmatpush.msrb.mxu1 %v939_v13 }
 0x624   :  { %v656_v16 = vmul.f32 %v1206_v5, %v651_v15  ;;  %v937_v15 = vld [vmem:[#allocation11 + $0x190] sm:$0xff] }
 0x625   :  { %964 = vmatpush.msrb.mxu1 %v937_v15 }
 0x626   :  { %v661_v62 = vadd.f32 %v1207_v9, %v656_v16  ;;  %v946_v9 = vld [vmem:[#allocation11 + $0x1d8] sm:$0xff] }
 0x627   :  { %v938_v16 = vld [vmem:[#allocation11 + $0x198] sm:$0xff] }
 0x628   :  { %730 = vmatmul.f32.gmra.mxu0 %v661_v62  ;;  %753 = vmatmul.f32.gmra.mxu1 %v661_v62 }
 0x629   :  { %776 = vmatmul.f32.gmra.mxu2 %v661_v62 }
 0x69d   :  { %v751_v17 = vpop.f32.mrf.mxu1  ;;  %v728_v21 = vpop.f32.mrf.mxu0 }
 0x6a4   :  { %v774_v19 = vpop.f32.mrf.mxu2 }
 0x6a5   :  { %v754_v20 = vpop.f32.mrf.mxu1  ;;  %v731_v24 = vpop.f32.mrf.mxu0 }
 0x6a6   :  { %794 = vmatpush.xpose.msra.mxu3 %v754_v20  ;;  %v934_v20 = vld [vmem:[#allocation11 + $0x178] sm:$0xff] }
 0x6aa   :  { %795 = vmatpush.xpose.msra.mxu3 %v751_v17  ;;  %v936_v17 = vld [vmem:[#allocation11 + $0x188] sm:$0xff] }
 0x6ac   :  { %v777_v22 = vpop.f32.mrf.mxu2 }
 0x6ad   :  { %849 = vmatpush.msra.mxu0 %v777_v22  ;;  %796 = vmatmul.f32.vlgmr.msra.gmra.mxu3 %v728_v21  ;;  %v931_v21 = vld [vmem:[#allocation11 + $0x160] sm:$0xff]  ;;  %v932_v22 = vld [vmem:[#allocation11 + $0x168] sm:$0xff] }
 0x6ae   :  { %981 = vmatpush.msrb.mxu3 %v950_v54 }
 0x6af   :  { %850 = vmatpush.msra.mxu0 %v774_v19  ;;  %v933_v19 = vld [vmem:[#allocation11 + $0x170] sm:$0xff] }
 0x6b0   :  { %982 = vmatpush.msrb.mxu3 %v948_v7  ;;  %v955_v7 = vperm.slane %v1180_v6, 1 }
 0x6b2   :  { %983 = vmatpush.msrb.mxu3 %v946_v9 }
 0x6b4   :  { %984 = vmatpush.msrb.mxu3 %v944_v11 }
 0x6b5   :  { %799 = vmatmul.f32.gmra.mxu3 %v731_v24  ;;  %v929_v24 = vld [vmem:[#allocation11 + $0x150] sm:$0xff] }
 0x730   :  { %v797_v25 = vpop.f32.mrf.mxu3 }
 0x731   :  { %v803_v26 = vmul.f32 0.17677669, %v797_v25  ;;  %v930_v25 = vld [vmem:[#allocation11 + $0x158] sm:$0xff] }
 0x733   :  { %v805_v4 = vadd.f32 %v803_v26, %v1608_v18  ;;  %v927_v26 = vld [vmem:[#allocation11 + $0x140] sm:$0xff] }
 0x735   :  { %v807_v27 = vsel %vm360_vm0, %v805_v4, -inf }
 0x736   :  { %808 = vmax.xlane.f32.xlu1 %v807_v27  ;;  %v925_v27 = vld [vmem:[#allocation11 + $0x130] sm:$0xff] }
 0x738   :  { %v800_v28 = vpop.f32.mrf.mxu3 }
 0x739   :  { %v804_v29 = vmul.f32 0.17677669, %v800_v28  ;;  %v926_v28 = vld [vmem:[#allocation11 + $0x138] sm:$0xff] }
 0x73b   :  { %v806_v30 = vadd.f32 %v804_v29, %v1612_v23  ;;  %v923_v29 = vld [vmem:[#allocation11 + $0x120] sm:$0xff] }
 0x73d   :  { %v810_v31 = vsel %vm360_vm0, %v806_v30, -inf }
 0x73e   :  { %811 = vmax.xlane.f32.xlu1 %v810_v31  ;;  %v921_v31 = vld [vmem:[#allocation11 + $0x110] sm:$0xff] }
 0x7a9   :  { %v809_v32 = vpop.xlane.xlu1 %808 }
 0x7aa   :  { %v813_v33 = vsub.f32 %v805_v4, %v809_v32  ;;  %v928_v4 = vld [vmem:[#allocation11 + $0x148] sm:$0xff]  ;;  %v922_v32 = vld [vmem:[#allocation11 + $0x118] sm:$0xff] }
 0x7ac   :  { %v815_v34 = vmul.f32 1.442695, %v813_v33  ;;  %v919_v33 = vld [vmem:[#allocation11 + $0x100] sm:$0xff] }
 0x7ae   :  { %1237 = vpow2.f32 %v815_v34  ;;  %v920_v34 = vld [vmem:[#allocation11 + $0x108] sm:$0xff] }
 0x7b1   :  { %v812_v35 = vpop.xlane.xlu1 %811 }
 0x7b2   :  { %v814_v36 = vsub.f32 %v806_v30, %v812_v35  ;;  %v924_v30 = vld [vmem:[#allocation11 + $0x128] sm:$0xff] }
 0x7b4   :  { %v1238_v37 = vpop.eup %1237  ;;  %v817_v38 = vmul.f32 1.442695, %v814_v36 }
 0x7b5   :  { %v819_v18 = vsel %vm360_vm0, %v1238_v37, 0.0 }
 0x7b6   :  { %1239 = vpow2.f32 %v817_v38  ;;  %820 = vadd.xlane.f32.xlu0 %v819_v18 }
 0x7bc   :  { %v1240_v39 = vpop.eup %1239 }
 0x7bd   :  { %v822_v40 = vsel %vm360_vm0, %v1240_v39, 0.0 }
 0x7be   :  { %823 = vadd.xlane.f32.xlu1 %v822_v40 }
 0x829   :  { %v821_v23 = vpop.xlane.xlu0 %820 }
 0x82a   :  { %1241 = vrcp.f32 %v821_v23 }
 0x830   :  { %v1242_v41 = vpop.eup %1241 }
 0x831   :  { %v827_v42 = vmul.f32 %v1242_v41, %v1238_v37  ;;  %v824_v43 = vpop.xlane.xlu1 %823 }
 0x832   :  { %1243 = vrcp.f32 %v824_v43 }
 0x833   :  { %1176 = vmatmul.msk.f32.vlgmr.msra.gmra.mxu0 %vm360_vm0, %v827_v42 }
 0x838   :  { %v1244_v44 = vpop.eup %1243 }
 0x839   :  { %v828_v45 = vmul.f32 %v1244_v44, %v1240_v39 }
 0x83b   :  { %1177 = vmatmul.msk.f32.gmra.mxu0 %vm360_vm0, %v828_v45 }
 0x8b0   :  { %v852_v46 = vpop.f32.mrf.mxu0 }
 0x8b1   :  { %v853_v48 = vadd.f32 %v852_v46, %v660_v1  ;;  %v942_v1 = vld [vmem:[#allocation11 + $0x1b8] sm:$0xff] }
 0x8b2   :  { %985 = vmatpush.msrb.mxu3 %v942_v1 }
 0x8b3   :  { %v862_v49 = vmul.f32 %v1620_v47, %v853_v48 }
 0x8b4   :  { %986 = vmatpush.msrb.mxu3 %v940_v14 }
 0x8b5   :  { %864 = vadd.xlane.f32.xlu1 %v862_v49 }
 0x8b6   :  { %987 = vmatpush.msrb.mxu3 %v938_v16 }
 0x8b8   :  { %v855_v50 = vpop.f32.mrf.mxu0  ;;  %988 = vmatpush.msrb.mxu3 %v936_v17 }
 0x8b9   :  { %v856_v51 = vadd.f32 %v855_v50, %v661_v62  ;;  %v935_v62 = vld [vmem:[#allocation11 + $0x180] sm:$0xff] }
 0x8ba   :  { %965 = vmatpush.msrb.mxu1 %v935_v62  ;;  %989 = vmatpush.msrb.mxu3 %v934_v20 }
 0x8bb   :  { %v863_v52 = vmul.f32 %v1620_v47, %v856_v51 }
 0x8bc   :  { %966 = vmatpush.msrb.mxu1 %v933_v19  ;;  %990 = vmatpush.msrb.mxu3 %v932_v22  ;;  %v954_v19 = vperm.slane %v1180_v6, 0  ;;  %v1108_v6 = vld [vmem:[#allocation13 + $0x20] sm:$0xff] }
 0x8bd   :  { %866 = vadd.xlane.f32.xlu1 %v863_v52  ;;  %v1209_v52 = vld [vmem:[%s1744_s8 + $0x1] ss:$0 sm:$0xff] }
 0x8be   :  { %967 = vmatpush.msrb.mxu1 %v931_v21  ;;  %991 = vmatpush.msrb.mxu3 %v930_v25 }
 0x8c0   :  { %968 = vmatpush.msrb.mxu1 %v929_v24  ;;  %992 = vmatpush.msrb.mxu3 %v928_v4 }
 0x8c2   :  { %969 = vmatpush.msrb.mxu1 %v927_v26  ;;  %993 = vmatpush.msrb.mxu3 %v926_v28 }
 0x8c4   :  { %970 = vmatpush.msrb.mxu1 %v925_v27  ;;  %994 = vmatpush.msrb.mxu3 %v924_v30 }
 0x8c6   :  { %971 = vmatpush.msrb.mxu1 %v923_v29  ;;  %995 = vmatpush.msrb.mxu3 %v922_v32 }
 0x8c8   :  { %972 = vmatpush.msrb.mxu1 %v921_v31  ;;  %996 = vmatpush.msrb.mxu3 %v920_v34 }
 0x8ca   :  { %973 = vmatpush.msrb.mxu1 %v919_v33 }
 0x928   :  { %v865_v55 = vpop.xlane.xlu1 %864 }
 0x929   :  { %v868_v56 = vmul.f32 0.03125, %v865_v55 }
 0x92b   :  { %v870_v57 = vsub.f32 %v853_v48, %v868_v56  ;;  %v1208_v48 = vld [vmem:[%s1743_s7 + $0x1] ss:$0 sm:$0xff] }
 0x92d   :  { %v1690_v58 = vmul.f32 %v1620_v47, %v870_v57 }
 0x92f   :  { %v874_v61 = vmul.f32 %v1690_v58, %v1690_v58 }
 0x930   :  { %v867_v63 = vpop.xlane.xlu1 %866 }
 0x931   :  { %v869_v0 = vmul.f32 0.03125, %v867_v63  ;;  %876 = vadd.xlane.f32.xlu2 %v874_v61 }
 0x933   :  { %v871_v60 = vsub.f32 %v856_v51, %v869_v0 }
 0x935   :  { %v1695_v2 = vmul.f32 %v1620_v47, %v871_v60 }
 0x937   :  { %v875_v5 = vmul.f32 %v1695_v2, %v1695_v2 }
 0x939   :  { %878 = vadd.xlane.f32.xlu1 %v875_v5 }
 0x9a4   :  { %v877_v35 = vpop.xlane.xlu2 %876 }
 0x9a5   :  { %v880_v36 = vmul.f32 0.03125, %v877_v35 }
 0x9a7   :  { %v882_v37 = vadd.f32 1e-05, %v880_v36 }
 0x9a9   :  { %1245 = vrsqrt.f32 %v882_v37  ;;  %vm890_vm7 = vweird.f32 %v882_v37 }
 0x9ac   :  { %v879_v38 = vpop.xlane.xlu1 %878 }
 0x9ad   :  { %v881_v18 = vmul.f32 0.03125, %v879_v38 }
 0x9af   :  { %v1246_v39 = vpop.eup %1245  ;;  %v883_v40 = vadd.f32 1e-05, %v881_v18 }
 0x9b0   :  { %v885_v23 = vmul.f32 %v1246_v39, %v882_v37  ;;  %vm891_vm0 = vweird.f32 %v1246_v39 }
 0x9b1   :  { %1247 = vrsqrt.f32 %v883_v40  ;;  %vm892_vm8 = vmor %vm890_vm7, %vm891_vm0  ;;  %vm900_vm10 = vweird.f32 %v883_v40 }
 0x9b2   :  { %v886_v41 = vmul.f32 %v1246_v39, %v885_v23 }
 0x9b4   :  { %v887_v42 = vmul.f32 0.5, %v886_v41 }
 0x9b6   :  { %v888_v43 = vsub.f32 1.5, %v887_v42 }
 0x9b7   :  { %v1248_v44 = vpop.eup %1247 }
 0x9b8   :  { %v889_v45 = vmul.f32 %v1246_v39, %v888_v43  ;;  %v895_v46 = vmul.f32 %v1248_v44, %v883_v40  ;;  %vm901_vm9 = vweird.f32 %v1248_v44  ;;  %v1119_v43 = vld [vmem:[#allocation13 + $0x78] sm:$0xff] }
 0x9b9   :  { %vm902_vm11 = vmor %vm900_vm10, %vm901_vm9  ;;  %1124 = vmatpush.msrb.mxu0 %v1119_v43 }
 0x9ba   :  { %v893_v49 = vsel %vm892_vm8, %v1246_v39, %v889_v45  ;;  %v896_v50 = vmul.f32 %v1248_v44, %v895_v46 }
 0x9bb   :  { %v904_v51 = vmul.f32 %v893_v49, %v1690_v58 }
 0x9bc   :  { %v897_v53 = vmul.f32 0.5, %v896_v50 }
 0x9bd   :  { %v909_v54 = vmul.f32 %v1208_v48, %v904_v51 }
 0x9be   :  { %v898_v55 = vsub.f32 1.5, %v897_v53 }
 0x9bf   :  { %v914_v56 = vadd.f32 %v1209_v52, %v909_v54 }
 0x9c0   :  { %v899_v57 = vmul.f32 %v1248_v44, %v898_v55 }
 0x9c1   :  { %v916_v61 = vmul.f32 %v914_v56, %v1649_v59  ;;  %v1117_v56 = vld [vmem:[#allocation13 + $0x68] sm:$0xff] }
 0x9c2   :  { %v903_v63 = vsel %vm902_vm11, %v1248_v44, %v899_v57  ;;  %v1118_v44 = vld [vmem:[#allocation13 + $0x70] sm:$0xff]  ;;  %v1116_v57 = vld [vmem:[#allocation13 + $0x60] sm:$0xff] }
 0x9c3   :  { %v905_v0 = vmul.f32 %v903_v63, %v1695_v2  ;;  %974 = vmatmul.f32.vlgmr.msrb.gmra.mxu1 %v916_v61  ;;  %997 = vmatmul.f32.vlgmr.msrb.gmra.mxu3 %v916_v61  ;;  %v1114_v63 = vld [vmem:[#allocation13 + $0x50] sm:$0xff] }
 0x9c4   :  { %1125 = vmatpush.msrb.mxu0 %v1118_v44 }
 0x9c5   :  { %v910_v58 = vmul.f32 %v1208_v48, %v905_v0  ;;  %v1113_v0 = vld [vmem:[#allocation13 + $0x48] sm:$0xff] }
 0x9c6   :  { %1126 = vmatpush.msrb.mxu0 %v1117_v56 }
 0x9c7   :  { %v915_v60 = vadd.f32 %v1209_v52, %v910_v58  ;;  %v1112_v58 = vld [vmem:[#allocation13 + $0x40] sm:$0xff] }
 0x9c8   :  { %1127 = vmatpush.msrb.mxu0 %v1116_v57 }
 0x9c9   :  { %v917_v5 = vmul.f32 %v915_v60, %v1653_v3  ;;  %v1111_v60 = vld [vmem:[#allocation13 + $0x38] sm:$0xff] }
 0x9cb   :  { %977 = vmatmul.f32.gmra.mxu1 %v917_v5  ;;  %1000 = vmatmul.f32.gmra.mxu3 %v917_v5 }
 0xa40   :  { %v975_v62 = vpop.f32.mrf.mxu1 }
 0xa41   :  { %v976_v26 = vadd.f32 %v975_v62, %v954_v19 }
 0xa46   :  { %v998_v8 = vpop.f32.mrf.mxu3 }
 0xa47   :  { %v999_v9 = vadd.f32 %v998_v8, %v955_v7  ;;  %v1106_v8 = vld [vmem:[#allocation13 + $0x10] sm:$0xff] }
 0xa48   :  { %v978_v35 = vpop.f32.mrf.mxu1 }
 0xa49   :  { %v1181_v10 = vmul.f32 -1.442695, %v999_v9  ;;  %v979_v18 = vadd.f32 %v978_v35, %v954_v19  ;;  %v1105_v9 = vld [vmem:[#allocation13 + $0x8] sm:$0xff]  ;;  %v1212_v35 = vld [vmem:[%s1750_s14] ss:$0 sm:$0xff] }
 0xa4b   :  { %1249 = vpow2.f32 %v1181_v10  ;;  %v1104_v10 = vld [vmem:[#allocation13] sm:$0xff] }
 0xa4e   :  { %v1001_v59 = vpop.f32.mrf.mxu3 }
 0xa4f   :  { %v1002_v11 = vadd.f32 %v1001_v59, %v955_v7  ;;  %v1107_v7 = vld [vmem:[#allocation13 + $0x18] sm:$0xff] }
 0xa51   :  { %v1250_v2 = vpop.eup %1249  ;;  %v1182_v12 = vmul.f32 -1.442695, %v1002_v11 }
 0xa52   :  { %v1010_v1 = vadd.f32 1.0, %v1250_v2 }
 0xa53   :  { %1251 = vpow2.f32 %v1182_v12 }
 0xa54   :  { %1253 = vrcp.f32 %v1010_v1  ;;  %v1023_v17 = vand.u32 2147483648, %v1010_v1  ;;  %v1021_v21 = vand.u32 2147483647, %v1010_v1  ;;  %vm1017_vm13 = vweird.f32 %v1010_v1 }
 0xa56   :  { %v1024_v25 = vor.u32 1.1754944e-38, %v1023_v17  ;;  %vm1022_vm15 = vcmp.eq.f32.partialorder %v1021_v21, 8.507059e+37  ;;  %v1210_v21 = vld [vmem:[%s1747_s11 + $0x1] ss:$0 sm:$0xff] }
 0xa59   :  { %v1252_v13 = vpop.eup %1251 }
 0xa5a   :  { %v1254_v3 = vpop.eup %1253  ;;  %v1011_v14 = vadd.f32 1.0, %v1252_v13 }
 0xa5b   :  { %v1013_v15 = vmul.f32 %v1254_v3, %v1010_v1  ;;  %vm1018_vm12 = vweird.f32 %v1254_v3 }
 0xa5c   :  { %1255 = vrcp.f32 %v1011_v14  ;;  %vm1019_vm14 = vmor %vm1017_vm13, %vm1018_vm12  ;;  %v1038_v31 = vand.u32 2147483648, %v1011_v14  ;;  %v1036_v34 = vand.u32 2147483647, %v1011_v14  ;;  %vm1032_vm2 = vweird.f32 %v1011_v14 }
 0xa5d   :  { %v1014_v16 = vsub.f32 1.0, %v1013_v15 }
 0xa5e   :  { %v1039_v38 = vor.u32 1.1754944e-38, %v1038_v31  ;;  %vm1037_vm4 = vcmp.eq.f32.partialorder %v1036_v34, 8.507059e+37 }
 0xa5f   :  { %v1015_v20 = vmul.f32 %v1254_v3, %v1014_v16 }
 0xa61   :  { %v1016_v22 = vadd.f32 %v1254_v3, %v1015_v20 }
 0xa62   :  { %v1256_v24 = vpop.eup %1255 }
 0xa63   :  { %v1028_v4 = vmul.f32 %v1256_v24, %v1011_v14  ;;  %v1020_v27 = vsel %vm1019_vm14, %v1254_v3, %v1016_v22  ;;  %vm1033_vm1 = vweird.f32 %v1256_v24 }
 0xa64   :  { %v1025_v28 = vsel %vm1022_vm15, %v1024_v25, %v1020_v27  ;;  %vm1034_vm3 = vmor %vm1032_vm2, %vm1033_vm1 }
 0xa65   :  { %v1029_v29 = vsub.f32 1.0, %v1028_v4  ;;  %v1042_v30 = vmul.f32 %v1025_v28, %v976_v26  ;;  %v1211_v26 = vld [vmem:[%s1748_s12 + $0x1] ss:$0 sm:$0xff]  ;;  %s1478_s12 = smov [#allocation14]  }
 0xa66   :  { %s1153_s1 = sshll.u32 %s1478_s12, 4  ;;  %s1154_s1 = int_to_ptr.vmem [resolvable:$true] %s1153_s1 }
 0xa67   :  { %v1044_v32 = vadd.f32 %v1042_v30, %v916_v61  ;;  %v1030_v33 = vmul.f32 %v1256_v24, %v1029_v29  ;;  %v1115_v61 = vld [vmem:[#allocation13 + $0x58] sm:$0xff] }
 0xa68   :  { %1128 = vmatpush.msrb.mxu0 %v1115_v61 }
 0xa69   :  { %v1050_v36 = vmul.f32 %v1620_v47, %v1044_v32  ;;  %v1031_v37 = vadd.f32 %v1256_v24, %v1030_v33 }
 0xa6a   :  { %1129 = vmatpush.msrb.mxu0 %v1114_v63 }
 0xa6b   :  { %1052 = vadd.xlane.f32.xlu2 %v1050_v36  ;;  %v1035_v39 = vsel %vm1034_vm3, %v1256_v24, %v1031_v37 }
 0xa6c   :  { %v1040_v40 = vsel %vm1037_vm4, %v1039_v38, %v1035_v39  ;;  %1130 = vmatpush.msrb.mxu0 %v1113_v0 }
 0xa6d   :  { %v1043_v23 = vmul.f32 %v1040_v40, %v979_v18 }
 0xa6e   :  { %1131 = vmatpush.msrb.mxu0 %v1112_v58 }
 0xa6f   :  { %v1045_v41 = vadd.f32 %v1043_v23, %v917_v5  ;;  %v1109_v5 = vld [vmem:[#allocation13 + $0x28] sm:$0xff] }
 0xa70   :  { %1132 = vmatpush.msrb.mxu0 %v1111_v60 }
 0xa71   :  { %v1051_v42 = vmul.f32 %v1620_v47, %v1045_v41 }
 0xa73   :  { %1054 = vadd.xlane.f32.xlu1 %v1051_v42 }
 0xade   :  { %v1053_v45 = vpop.xlane.xlu2 %1052 }
 0xadf   :  { %v1056_v46 = vmul.f32 0.03125, %v1053_v45 }
 0xae1   :  { %v1058_v48 = vsub.f32 %v1044_v32, %v1056_v46 }
 0xae3   :  { %v1060_v49 = vmul.f32 %v1620_v47, %v1058_v48 }
 0xae5   :  { %v1062_v50 = vmul.f32 %v1060_v49, %v1060_v49 }
 0xae6   :  { %v1055_v51 = vpop.xlane.xlu1 %1054 }
 0xae7   :  { %v1057_v52 = vmul.f32 0.03125, %v1055_v51  ;;  %1064 = vadd.xlane.f32.xlu2 %v1062_v50 }
 0xae9   :  { %v1059_v53 = vsub.f32 %v1045_v41, %v1057_v52 }
 0xaeb   :  { %v1716_v54 = vmul.f32 %v1620_v47, %v1059_v53  ;;  %v1110_v47 = vld [vmem:[#allocation13 + $0x30] sm:$0xff] }
 0xaec   :  { %1133 = vmatpush.msrb.mxu0 %v1110_v47 }
 0xaed   :  { %v1063_v55 = vmul.f32 %v1716_v54, %v1716_v54 }
 0xaee   :  { %1134 = vmatpush.msrb.mxu0 %v1109_v5 }
 0xaef   :  { %1066 = vadd.xlane.f32.xlu1 %v1063_v55 }
 0xaf0   :  { %1135 = vmatpush.msrb.mxu0 %v1108_v6 }
 0xaf2   :  { %1136 = vmatpush.msrb.mxu0 %v1107_v7 }
 0xaf4   :  { %1137 = vmatpush.msrb.mxu0 %v1106_v8 }
 0xaf6   :  { %1138 = vmatpush.msrb.mxu0 %v1105_v9 }
 0xaf8   :  { %1139 = vmatpush.msrb.mxu0 %v1104_v10 }
 0xb5a   :  { %v1065_v59 = vpop.xlane.xlu2 %1064 }
 0xb5b   :  { %v1068_v11 = vmul.f32 0.03125, %v1065_v59 }
 0xb5d   :  { %v1070_v2 = vadd.f32 1e-05, %v1068_v11 }
 0xb5f   :  { %1257 = vrsqrt.f32 %v1070_v2  ;;  %vm1078_vm6 = vweird.f32 %v1070_v2 }
 0xb62   :  { %v1067_v12 = vpop.xlane.xlu1 %1066 }
 0xb63   :  { %v1069_v1 = vmul.f32 0.03125, %v1067_v12 }
 0xb65   :  { %v1258_v13 = vpop.eup %1257  ;;  %v1071_v3 = vadd.f32 1e-05, %v1069_v1 }
 0xb66   :  { %v1073_v14 = vmul.f32 %v1258_v13, %v1070_v2  ;;  %vm1079_vm5 = vweird.f32 %v1258_v13 }
 0xb67   :  { %1259 = vrsqrt.f32 %v1071_v3  ;;  %vm1080_vm0 = vmor %vm1078_vm6, %vm1079_vm5  ;;  %vm1088_vm8 = vweird.f32 %v1071_v3 }
 0xb68   :  { %v1074_v15 = vmul.f32 %v1258_v13, %v1073_v14 }
 0xb6a   :  { %v1075_v16 = vmul.f32 0.5, %v1074_v15 }
 0xb6c   :  { %v1076_v62 = vsub.f32 1.5, %v1075_v16 }
 0xb6d   :  { %v1260_v17 = vpop.eup %1259 }
 0xb6e   :  { %v1077_v19 = vmul.f32 %v1258_v13, %v1076_v62  ;;  %v1083_v20 = vmul.f32 %v1260_v17, %v1071_v3  ;;  %vm1089_vm7 = vweird.f32 %v1260_v17 }
 0xb6f   :  { %vm1090_vm9 = vmor %vm1088_vm8, %vm1089_vm7 }
 0xb70   :  { %v1081_v22 = vsel %vm1080_vm0, %v1258_v13, %v1077_v19  ;;  %v1084_v24 = vmul.f32 %v1260_v17, %v1083_v20 }
 0xb71   :  { %v1092_v25 = vmul.f32 %v1081_v22, %v1060_v49 }
 0xb72   :  { %v1085_v4 = vmul.f32 0.5, %v1084_v24 }
 0xb73   :  { %v1097_v27 = vmul.f32 %v1210_v21, %v1092_v25 }
 0xb74   :  { %v1086_v28 = vsub.f32 1.5, %v1085_v4 }
 0xb75   :  { %v1102_v29 = vadd.f32 %v1211_v26, %v1097_v27 }
 0xb76   :  { %v1087_v30 = vmul.f32 %v1260_v17, %v1086_v28 }
 0xb77   :  { %1140 = vmatmul.f32.vlgmr.msrb.gmra.mxu0 %v1102_v29 }
 0xb78   :  { %v1091_v31 = vsel %vm1090_vm9, %v1260_v17, %v1087_v30 }
 0xb79   :  { %v1093_v32 = vmul.f32 %v1091_v31, %v1716_v54 }
 0xb7b   :  { %v1098_v33 = vmul.f32 %v1210_v21, %v1093_v32 }
 0xb7d   :  { %v1103_v34 = vadd.f32 %v1211_v26, %v1098_v33 }
 0xb7f   :  { %1143 = vmatmul.f32.gmra.mxu0 %v1103_v34 }
 0xbf4   :  { %v1141_v36 = vpop.f32.mrf.mxu0 }
 0xbf5   :  { %v1142_v37 = vadd.f32 %v1212_v35, %v1141_v36 }
 0xbf7   :  { %1147 = vst [vmem:[#allocation14] sm:$0xff] %v1142_v37 }
 0xbfc   :  { %v1144_v38 = vpop.f32.mrf.mxu0 }
 0xbfd   :  { %v1145_v18 = vadd.f32 %v1212_v35, %v1144_v38 }
 0xbff   :  { %1148 = vst [vmem:[#allocation14 + $0x8] sm:$0xff] %v1145_v18 }
 0xc00   :  { %1161 = dma.vmem_to_hbm [thread:$0]  %s1154_s1, 256, %s1156_s29, [#allocation4], %s1754_s25, %s1754_s25, %s1465_s27  }
 0xc01   :  { %1461 = dma.done.wait [#allocation4], 256  }
 0xc02   :  { %1462 = vsyncadd [#allocation4], 4294967040 }
 0xc03   :  { %1166 = vsyncpa [#allocation3], 1 }
 0xc04   :  { %1167 = vsyncpa [#allocation6], 1 }
 0xc05   :  { %1168 = vsyncpa [#allocation9], 1 }
 0xc06   :  { %1169 = vsyncpa [#allocation12], 1 }
 0xc07   :  { %1170 = vsyncpa [#allocation4], 1 }

</bundles_post_ra>
